<compile_context>
chip_gen: v7x
topology: tpu7x:2x2x1
jax: 0.10.0
libtpu: 0.0.40
codegen_flags: <defaults>
</compile_context>

<pallas_src>
import functools
import math

import jax
import jax.numpy as jnp
from jax.experimental import pallas as pl
from jax.experimental.pallas import tpu as pltpu

BD = math.pi
DIM = 3          # number of input coordinates (must be >= 3, see note above)
NUM_BRANCH = 3   # three parallel ResNet stacks (fc1x / fc2x / fc3x)


# ---------------------------------------------------------------------------
# Pallas kernel: whole forward pass (all 3 branches, lane-packed) for one batch tile.
# ---------------------------------------------------------------------------
def _tanh_resnet_kernel(x_ref, ixp_ref, w1p_ref, b1p_ref, wmidp_ref, bmidp_ref,
                        woutp_ref, out_ref, *, boundary_control_type):
    x = x_ref[...].astype(jnp.float32)            # [TN, DIM]

    # Branch-invariant identity embedding, packed across the 3 branches: [TN, 3m].
    s = jnp.dot(x, ixp_ref[...], preferred_element_type=jnp.float32)

    # First layer (dim -> 3m), then 3 residual blocks of two (3m -> 3m) layers.
    y = jnp.tanh(jnp.dot(x, w1p_ref[...], preferred_element_type=jnp.float32)
                 + b1p_ref[...])
    y = jnp.tanh(jnp.dot(y, wmidp_ref[0], preferred_element_type=jnp.float32)
                 + bmidp_ref[0])
    y = y + s
    s = y
    y = jnp.tanh(jnp.dot(y, wmidp_ref[1], preferred_element_type=jnp.float32)
                 + bmidp_ref[1])
    y = jnp.tanh(jnp.dot(y, wmidp_ref[2], preferred_element_type=jnp.float32)
                 + bmidp_ref[2])
    y = y + s
    s = y
    y = jnp.tanh(jnp.dot(y, wmidp_ref[3], preferred_element_type=jnp.float32)
                 + bmidp_ref[3])
    y = jnp.tanh(jnp.dot(y, wmidp_ref[4], preferred_element_type=jnp.float32)
                 + bmidp_ref[4])
    y = y + s

    # Packed out layer: 3m -> 3 (block-structured, no bias).  One matmul, [TN, 3].
    out = jnp.dot(y, woutp_ref[...], preferred_element_type=jnp.float32)

    # Boundary-control factor, built once as a [TN, 3] tensor (single full-block store).
    if boundary_control_type == 'none':
        out_ref[...] = out.astype(out_ref.dtype)
    elif boundary_control_type in ('H_net', 'phiH_net'):
        # factor[:, b] = x[:, b] * (BD - x[:, b])  (branch b uses coordinate b)
        factor = x * (BD - x)                                           # [TN, 3]
        out_ref[...] = (out * factor).astype(out_ref.dtype)
    elif boundary_control_type in ('E_net', 'phiE_net'):
        # factor[:, b] = g[(b+1)%3] * g[(b+2)%3]   with g = x * (BD - x)
        g = x * (BD - x)                                                # [TN, 3]
        factor = jnp.concatenate(
            [g[:, 1:2] * g[:, 2:3],
             g[:, 2:3] * g[:, 0:1],
             g[:, 0:1] * g[:, 1:2]], axis=1)                            # [TN, 3]
        out_ref[...] = (out * factor).astype(out_ref.dtype)
    else:
        # 'cube' (the __init__ default) has no branch in the PyTorch forward either.
        raise ValueError(f"unsupported boundary_control_type: {boundary_control_type}")


# ---------------------------------------------------------------------------
# Wrapper: picks the batch tile, builds the grid / BlockSpecs and calls pallas_call.
# ---------------------------------------------------------------------------
def _pick_tile(N):
    # Prefer a tile that keeps grid >= 2 (pipelining + megacore) and stays VMEM-friendly
    # on v7x (64 MiB).  Multiples of 8 for sublane alignment.
    for cand in (1024, 512, 256, 128, 64, 32, 16, 8):
        if N % cand == 0 and N // cand >= 2:
            return cand
    return N


def tanh_resnet_para(x, packed, *, boundary_control_type='H_net', tile_n=None):
    N, dim = x.shape
    assert dim == DIM
    M3 = packed['w1p'].shape[-1]           # 3*m

    TN = _pick_tile(N) if tile_n is None else tile_n
    assert N % TN == 0

    kernel = functools.partial(_tanh_resnet_kernel,
                               boundary_control_type=boundary_control_type)

    return pl.pallas_call(
        kernel,
        out_shape=jax.ShapeDtypeStruct((N, NUM_BRANCH), x.dtype),
        grid=(N // TN,),
        in_specs=[
            pl.BlockSpec((TN, dim), lambda i: (i, 0)),               # x (tiled on batch)
            pl.BlockSpec((dim, M3), lambda i: (0, 0)),               # packed Ix
            pl.BlockSpec((dim, M3), lambda i: (0, 0)),               # packed first-layer W
            pl.BlockSpec((1, M3), lambda i: (0, 0)),                 # packed first-layer b
            pl.BlockSpec((5, M3, M3), lambda i: (0, 0, 0)),          # packed block-diag mid Ws
            pl.BlockSpec((5, 1, M3), lambda i: (0, 0, 0)),           # packed mid biases
            pl.BlockSpec((M3, NUM_BRANCH), lambda i: (0, 0)),        # packed out-layer W
        ],
        out_specs=pl.BlockSpec((TN, NUM_BRANCH), lambda i: (i, 0)),
        compiler_params=pltpu.CompilerParams(
            dimension_semantics=("parallel",)),
    )(x, packed['ixp'], packed['w1p'], packed['b1p'],
      packed['wmidp'], packed['bmidp'], packed['woutp'])


# ---------------------------------------------------------------------------
# Deterministic parameter init (PyTorch nn.Linear-style uniform(-1/sqrt(fan_in), .)).
# Per-branch layout (mirrors the PyTorch module); weights stored transposed [in, out].
# ---------------------------------------------------------------------------
def init_params(key, m, dim=DIM, dtype=jnp.float32):
    def linear(key, fan_in, fan_out, bias=True):
        kw, kb = jax.random.split(key)
        bound = 1.0 / math.sqrt(fan_in)
        w = jax.random.uniform(kw, (fan_in, fan_out), dtype, -bound, bound)
        b = jax.random.uniform(kb, (1, fan_out), dtype, -bound, bound) if bias else None
        return w, b

    keys = jax.random.split(key, NUM_BRANCH * 7)
    w1, b1, wmid, bmid, wout = [], [], [], [], []
    for br in range(NUM_BRANCH):
        k = keys[br * 7: (br + 1) * 7]
        w, b = linear(k[0], dim, m)
        w1.append(w); b1.append(b)
        wm, bm = [], []
        for j in range(5):                              # fc_2 .. fc_6
            w, b = linear(k[1 + j], m, m)
            wm.append(w); bm.append(b)
        wmid.append(jnp.stack(wm)); bmid.append(jnp.stack(bm))
        wo, _ = linear(k[6], m, 1, bias=False)
        wout.append(wo)

    ix = jnp.zeros((dim, m), dtype).at[0, 0].set(1.0).at[1, 1].set(1.0).at[2, 2].set(1.0)
    return {
        'ix': ix,                   # [dim, m]
        'w1': jnp.stack(w1),        # [3, dim, m]
        'b1': jnp.stack(b1),        # [3, 1, m]
        'wmid': jnp.stack(wmid),    # [3, 5, m, m]
        'bmid': jnp.stack(bmid),    # [3, 5, 1, m]
        'wout': jnp.stack(wout),    # [3, m, 1]
    }


# ---------------------------------------------------------------------------
# Lane-pack the 3 branches into block-diagonal / concatenated parameter slabs.
# (Exact: off-diagonal blocks are zeros, so numerics are unchanged.)
# ---------------------------------------------------------------------------
def pack_params(p):
    nb, dim, m = p['w1'].shape
    M3 = nb * m
    dtype = p['w1'].dtype

    ixp = jnp.concatenate([p['ix']] * nb, axis=1)                           # [dim, 3m]
    w1p = jnp.concatenate([p['w1'][b] for b in range(nb)], axis=1)          # [dim, 3m]
    b1p = jnp.concatenate([p['b1'][b] for b in range(nb)], axis=1)          # [1, 3m]

    wmidp = jnp.zeros((5, M3, M3), dtype)
    bmidp = jnp.zeros((5, 1, M3), dtype)
    for j in range(5):
        for b in range(nb):
            wmidp = wmidp.at[j, b * m:(b + 1) * m, b * m:(b + 1) * m].set(p['wmid'][b, j])
            bmidp = bmidp.at[j, 0, b * m:(b + 1) * m].set(p['bmid'][b, j, 0])

    woutp = jnp.zeros((M3, nb), dtype)
    for b in range(nb):
        woutp = woutp.at[b * m:(b + 1) * m, b].set(p['wout'][b][:, 0])

    return {'ixp': ixp, 'w1p': w1p, 'b1p': b1p,
            'wmidp': wmidp, 'bmidp': bmidp, 'woutp': woutp}


# ---------------------------------------------------------------------------
# Pure-JAX reference (mirrors the PyTorch forward, per-branch) for correctness checking.
# ---------------------------------------------------------------------------
def reference(x, params, boundary_control_type='H_net'):
    outs = []
    for b in range(NUM_BRANCH):
        s = x @ params['ix']
        y = jnp.tanh(x @ params['w1'][b] + params['b1'][b])
        y = jnp.tanh(y @ params['wmid'][b, 0] + params['bmid'][b, 0]) + s
        s = y
        y = jnp.tanh(y @ params['wmid'][b, 1] + params['bmid'][b, 1])
        y = jnp.tanh(y @ params['wmid'][b, 2] + params['bmid'][b, 2]) + s
        s = y
        y = jnp.tanh(y @ params['wmid'][b, 3] + params['bmid'][b, 3])
        y = jnp.tanh(y @ params['wmid'][b, 4] + params['bmid'][b, 4]) + s
        out = y @ params['wout'][b]
        if boundary_control_type == 'none':
            factor = 1.0
        elif boundary_control_type in ('H_net', 'phiH_net'):
            c = x[:, b:b + 1]
            factor = c * (BD - c)
        elif boundary_control_type in ('E_net', 'phiE_net'):
            i1, i2 = (b + 1) % 3, (b + 2) % 3
            c1, c2 = x[:, i1:i1 + 1], x[:, i2:i2 + 1]
            factor = c1 * c2 * (BD - c1) * (BD - c2)
        outs.append(out * factor)
    return jnp.concatenate(outs, axis=1)


if __name__ == "__main__":
    key = jax.random.PRNGKey(0)
    k_param, k_x = jax.random.split(key)

    m = 32        # hidden width per branch (packed width 3m = 96)
    N = 1024      # collocation points (tiled: TN=512, grid=2)
    params = init_params(k_param, m)
    packed = pack_params(params)
    x = jax.random.uniform(k_x, (N, DIM), jnp.float32, 0.0, BD)   # points in [0, pi]^3

    ok = True
    for bct in ('H_net', 'E_net', 'none'):
        y = tanh_resnet_para(x, packed, boundary_control_type=bct)
        y = jax.block_until_ready(y)
        y_ref = reference(x, params, bct)
        ok &= (y.shape == (N, NUM_BRANCH))
        ok &= bool(jnp.allclose(y, y_ref, atol=1e-5, rtol=1e-5))

    assert ok, "Pallas kernel mismatch vs reference"
    print("KERNEL_OK")
</pallas_src>

<mosaic_0001>
module attributes {stable_mosaic.version = 11 : i64} {
  func.func @_tanh_resnet_kernel(%arg0: i32, %arg1: memref<512x3xf32, #tpu.memory_space<vmem>>, %arg2: memref<3x96xf32, #tpu.memory_space<vmem>>, %arg3: memref<3x96xf32, #tpu.memory_space<vmem>>, %arg4: memref<1x96xf32, #tpu.memory_space<vmem>>, %arg5: memref<5x96x96xf32, #tpu.memory_space<vmem>>, %arg6: memref<5x1x96xf32, #tpu.memory_space<vmem>>, %arg7: memref<96x3xf32, #tpu.memory_space<vmem>>, %arg8: memref<512x3xf32, #tpu.memory_space<vmem>>) attributes {dimension_semantics = [#tpu.dimension_semantics<parallel>], iteration_bounds = array<i64: 2>, scalar_prefetch = 0 : i64, scratch_operands = 0 : i64, tpu.core_type = #tpu.core_type<tc>, window_params = [{transform_indices = @transform_0, window_bounds = array<i64: 512, 3>}, {pipeline_mode = #tpu.pipeline_mode<synchronous>, transform_indices = @transform_1, window_bounds = array<i64: 3, 96>}, {pipeline_mode = #tpu.pipeline_mode<synchronous>, transform_indices = @transform_2, window_bounds = array<i64: 3, 96>}, {pipeline_mode = #tpu.pipeline_mode<synchronous>, transform_indices = @transform_3, window_bounds = array<i64: 1, 96>}, {pipeline_mode = #tpu.pipeline_mode<synchronous>, transform_indices = @transform_4, window_bounds = array<i64: 5, 96, 96>}, {pipeline_mode = #tpu.pipeline_mode<synchronous>, transform_indices = @transform_5, window_bounds = array<i64: 5, 1, 96>}, {pipeline_mode = #tpu.pipeline_mode<synchronous>, transform_indices = @transform_6, window_bounds = array<i64: 96, 3>}, {transform_indices = @transform_7, window_bounds = array<i64: 512, 3>}]} {
    %c0 = arith.constant 0 : index
    %c0_0 = arith.constant 0 : index
    %0 = vector.load %arg1[%c0, %c0_0] : memref<512x3xf32, #tpu.memory_space<vmem>>, vector<512x3xf32>
    %c0_1 = arith.constant 0 : index
    %c0_2 = arith.constant 0 : index
    %1 = vector.load %arg2[%c0_1, %c0_2] : memref<3x96xf32, #tpu.memory_space<vmem>>, vector<3x96xf32>
    %cst = arith.constant dense<0.000000e+00> : vector<512x96xf32>
    %2 = tpu.matmul %0, %1, %cst {dimension_numbers = #tpu.dot_dimension_numbers<[1], [0], [0], [1], [0, 0, 1, 1], [], []>} : vector<512x3xf32>, vector<3x96xf32>, vector<512x96xf32> -> vector<512x96xf32>
    %c0_3 = arith.constant 0 : index
    %c0_4 = arith.constant 0 : index
    %3 = vector.load %arg3[%c0_3, %c0_4] : memref<3x96xf32, #tpu.memory_space<vmem>>, vector<3x96xf32>
    %cst_5 = arith.constant dense<0.000000e+00> : vector<512x96xf32>
    %4 = tpu.matmul %0, %3, %cst_5 {dimension_numbers = #tpu.dot_dimension_numbers<[1], [0], [0], [1], [0, 0, 1, 1], [], []>} : vector<512x3xf32>, vector<3x96xf32>, vector<512x96xf32> -> vector<512x96xf32>
    %c0_6 = arith.constant 0 : index
    %c0_7 = arith.constant 0 : index
    %5 = vector.load %arg4[%c0_6, %c0_7] : memref<1x96xf32, #tpu.memory_space<vmem>>, vector<1x96xf32>
    %6 = vector.broadcast %5 : vector<1x96xf32> to vector<512x96xf32>
    %7 = arith.addf %4, %6 : vector<512x96xf32>
    %8 = math.tanh %7 : vector<512x96xf32>
    %c0_8 = arith.constant 0 : index
    %c0_9 = arith.constant 0 : index
    %c0_10 = arith.constant 0 : index
    %9 = vector.load %arg5[%c0_8, %c0_9, %c0_10] : memref<5x96x96xf32, #tpu.memory_space<vmem>>, vector<1x96x96xf32>
    %10 = vector.shape_cast %9 : vector<1x96x96xf32> to vector<96x96xf32>
    %cst_11 = arith.constant dense<0.000000e+00> : vector<512x96xf32>
    %11 = tpu.matmul %8, %10, %cst_11 {dimension_numbers = #tpu.dot_dimension_numbers<[1], [0], [0], [1], [0, 0, 1, 1], [], []>} : vector<512x96xf32>, vector<96x96xf32>, vector<512x96xf32> -> vector<512x96xf32>
    %c0_12 = arith.constant 0 : index
    %c0_13 = arith.constant 0 : index
    %c0_14 = arith.constant 0 : index
    %12 = vector.load %arg6[%c0_12, %c0_13, %c0_14] : memref<5x1x96xf32, #tpu.memory_space<vmem>>, vector<1x1x96xf32>
    %13 = vector.shape_cast %12 : vector<1x1x96xf32> to vector<1x96xf32>
    %14 = vector.broadcast %13 : vector<1x96xf32> to vector<512x96xf32>
    %15 = arith.addf %11, %14 : vector<512x96xf32>
    %16 = math.tanh %15 : vector<512x96xf32>
    %17 = arith.addf %16, %2 : vector<512x96xf32>
    %c1 = arith.constant 1 : index
    %c0_15 = arith.constant 0 : index
    %c0_16 = arith.constant 0 : index
    %18 = vector.load %arg5[%c1, %c0_15, %c0_16] : memref<5x96x96xf32, #tpu.memory_space<vmem>>, vector<1x96x96xf32>
    %19 = vector.shape_cast %18 : vector<1x96x96xf32> to vector<96x96xf32>
    %cst_17 = arith.constant dense<0.000000e+00> : vector<512x96xf32>
    %20 = tpu.matmul %17, %19, %cst_17 {dimension_numbers = #tpu.dot_dimension_numbers<[1], [0], [0], [1], [0, 0, 1, 1], [], []>} : vector<512x96xf32>, vector<96x96xf32>, vector<512x96xf32> -> vector<512x96xf32>
    %c1_18 = arith.constant 1 : index
    %c0_19 = arith.constant 0 : index
    %c0_20 = arith.constant 0 : index
    %21 = vector.load %arg6[%c1_18, %c0_19, %c0_20] : memref<5x1x96xf32, #tpu.memory_space<vmem>>, vector<1x1x96xf32>
    %22 = vector.shape_cast %21 : vector<1x1x96xf32> to vector<1x96xf32>
    %23 = vector.broadcast %22 : vector<1x96xf32> to vector<512x96xf32>
    %24 = arith.addf %20, %23 : vector<512x96xf32>
    %25 = math.tanh %24 : vector<512x96xf32>
    %c2 = arith.constant 2 : index
    %c0_21 = arith.constant 0 : index
    %c0_22 = arith.constant 0 : index
    %26 = vector.load %arg5[%c2, %c0_21, %c0_22] : memref<5x96x96xf32, #tpu.memory_space<vmem>>, vector<1x96x96xf32>
    %27 = vector.shape_cast %26 : vector<1x96x96xf32> to vector<96x96xf32>
    %cst_23 = arith.constant dense<0.000000e+00> : vector<512x96xf32>
    %28 = tpu.matmul %25, %27, %cst_23 {dimension_numbers = #tpu.dot_dimension_numbers<[1], [0], [0], [1], [0, 0, 1, 1], [], []>} : vector<512x96xf32>, vector<96x96xf32>, vector<512x96xf32> -> vector<512x96xf32>
    %c2_24 = arith.constant 2 : index
    %c0_25 = arith.constant 0 : index
    %c0_26 = arith.constant 0 : index
    %29 = vector.load %arg6[%c2_24, %c0_25, %c0_26] : memref<5x1x96xf32, #tpu.memory_space<vmem>>, vector<1x1x96xf32>
    %30 = vector.shape_cast %29 : vector<1x1x96xf32> to vector<1x96xf32>
    %31 = vector.broadcast %30 : vector<1x96xf32> to vector<512x96xf32>
    %32 = arith.addf %28, %31 : vector<512x96xf32>
    %33 = math.tanh %32 : vector<512x96xf32>
    %34 = arith.addf %33, %17 : vector<512x96xf32>
    %c3 = arith.constant 3 : index
    %c0_27 = arith.constant 0 : index
    %c0_28 = arith.constant 0 : index
    %35 = vector.load %arg5[%c3, %c0_27, %c0_28] : memref<5x96x96xf32, #tpu.memory_space<vmem>>, vector<1x96x96xf32>
    %36 = vector.shape_cast %35 : vector<1x96x96xf32> to vector<96x96xf32>
    %cst_29 = arith.constant dense<0.000000e+00> : vector<512x96xf32>
    %37 = tpu.matmul %34, %36, %cst_29 {dimension_numbers = #tpu.dot_dimension_numbers<[1], [0], [0], [1], [0, 0, 1, 1], [], []>} : vector<512x96xf32>, vector<96x96xf32>, vector<512x96xf32> -> vector<512x96xf32>
    %c3_30 = arith.constant 3 : index
    %c0_31 = arith.constant 0 : index
    %c0_32 = arith.constant 0 : index
    %38 = vector.load %arg6[%c3_30, %c0_31, %c0_32] : memref<5x1x96xf32, #tpu.memory_space<vmem>>, vector<1x1x96xf32>
    %39 = vector.shape_cast %38 : vector<1x1x96xf32> to vector<1x96xf32>
    %40 = vector.broadcast %39 : vector<1x96xf32> to vector<512x96xf32>
    %41 = arith.addf %37, %40 : vector<512x96xf32>
    %42 = math.tanh %41 : vector<512x96xf32>
    %c4 = arith.constant 4 : index
    %c0_33 = arith.constant 0 : index
    %c0_34 = arith.constant 0 : index
    %43 = vector.load %arg5[%c4, %c0_33, %c0_34] : memref<5x96x96xf32, #tpu.memory_space<vmem>>, vector<1x96x96xf32>
    %44 = vector.shape_cast %43 : vector<1x96x96xf32> to vector<96x96xf32>
    %cst_35 = arith.constant dense<0.000000e+00> : vector<512x96xf32>
    %45 = tpu.matmul %42, %44, %cst_35 {dimension_numbers = #tpu.dot_dimension_numbers<[1], [0], [0], [1], [0, 0, 1, 1], [], []>} : vector<512x96xf32>, vector<96x96xf32>, vector<512x96xf32> -> vector<512x96xf32>
    %c4_36 = arith.constant 4 : index
    %c0_37 = arith.constant 0 : index
    %c0_38 = arith.constant 0 : index
    %46 = vector.load %arg6[%c4_36, %c0_37, %c0_38] : memref<5x1x96xf32, #tpu.memory_space<vmem>>, vector<1x1x96xf32>
    %47 = vector.shape_cast %46 : vector<1x1x96xf32> to vector<1x96xf32>
    %48 = vector.broadcast %47 : vector<1x96xf32> to vector<512x96xf32>
    %49 = arith.addf %45, %48 : vector<512x96xf32>
    %50 = math.tanh %49 : vector<512x96xf32>
    %51 = arith.addf %50, %34 : vector<512x96xf32>
    %c0_39 = arith.constant 0 : index
    %c0_40 = arith.constant 0 : index
    %52 = vector.load %arg7[%c0_39, %c0_40] : memref<96x3xf32, #tpu.memory_space<vmem>>, vector<96x3xf32>
    %cst_41 = arith.constant dense<0.000000e+00> : vector<512x3xf32>
    %53 = tpu.matmul %51, %52, %cst_41 {dimension_numbers = #tpu.dot_dimension_numbers<[1], [0], [0], [1], [0, 0, 1, 1], [], []>} : vector<512x96xf32>, vector<96x3xf32>, vector<512x3xf32> -> vector<512x3xf32>
    %cst_42 = arith.constant 3.14159274 : f32
    %54 = vector.broadcast %cst_42 : f32 to vector<512x3xf32>
    %55 = arith.subf %54, %0 : vector<512x3xf32>
    %56 = arith.mulf %0, %55 : vector<512x3xf32>
    %57 = arith.mulf %53, %56 : vector<512x3xf32>
    %c0_43 = arith.constant 0 : index
    %c0_44 = arith.constant 0 : index
    %58 = vector.load %arg8[%c0_43, %c0_44] : memref<512x3xf32, #tpu.memory_space<vmem>>, vector<512x3xf32>
    tpu.vector_store %arg8[%c0_43, %c0_44], %57 {strides = array<i32>} : memref<512x3xf32, #tpu.memory_space<vmem>>, vector<512x3xf32>,
    return
  }
  func.func @transform_0(%arg0: i32) -> (i32, i32) {
    %c0_i32 = arith.constant 0 : i32
    %c0_i32_0 = arith.constant 0 : i32
    return %arg0, %c0_i32 : i32, i32
  }
  func.func @transform_1(%arg0: i32) -> (i32, i32) {
    %c0_i32 = arith.constant 0 : i32
    %c0_i32_0 = arith.constant 0 : i32
    %c0_i32_1 = arith.constant 0 : i32
    return %c0_i32, %c0_i32_0 : i32, i32
  }
  func.func @transform_2(%arg0: i32) -> (i32, i32) {
    %c0_i32 = arith.constant 0 : i32
    %c0_i32_0 = arith.constant 0 : i32
    %c0_i32_1 = arith.constant 0 : i32
    return %c0_i32, %c0_i32_0 : i32, i32
  }
  func.func @transform_3(%arg0: i32) -> (i32, i32) {
    %c0_i32 = arith.constant 0 : i32
    %c0_i32_0 = arith.constant 0 : i32
    %c0_i32_1 = arith.constant 0 : i32
    return %c0_i32, %c0_i32_0 : i32, i32
  }
  func.func @transform_4(%arg0: i32) -> (i32, i32, i32) {
    %c0_i32 = arith.constant 0 : i32
    %c0_i32_0 = arith.constant 0 : i32
    %c0_i32_1 = arith.constant 0 : i32
    %c0_i32_2 = arith.constant 0 : i32
    return %c0_i32, %c0_i32_0, %c0_i32_1 : i32, i32, i32
  }
  func.func @transform_5(%arg0: i32) -> (i32, i32, i32) {
    %c0_i32 = arith.constant 0 : i32
    %c0_i32_0 = arith.constant 0 : i32
    %c0_i32_1 = arith.constant 0 : i32
    %c0_i32_2 = arith.constant 0 : i32
    return %c0_i32, %c0_i32_0, %c0_i32_1 : i32, i32, i32
  }
  func.func @transform_6(%arg0: i32) -> (i32, i32) {
    %c0_i32 = arith.constant 0 : i32
    %c0_i32_0 = arith.constant 0 : i32
    %c0_i32_1 = arith.constant 0 : i32
    return %c0_i32, %c0_i32_0 : i32, i32
  }
  func.func @transform_7(%arg0: i32) -> (i32, i32) {
    %c0_i32 = arith.constant 0 : i32
    %c0_i32_0 = arith.constant 0 : i32
    return %arg0, %c0_i32 : i32, i32
  }
}

</mosaic_0001>

<bundles_post_ra>
// kernel: tpu_custom_call.1
= control target key start
LH: loop header
LB: loop body
LE: loop exit
PB: predicated region body
PF: predicated region fallthrough
CT: control target
= control target key end

     0   :  { %s8908_s24 = smov 0   ;;  %s11044_s0 = inlined_call_operand.vmem [shape: f32[1024,3], index: 0, kind: input, shape index: {}]   ;;  %s11045_s1 = inlined_call_operand.vmem [shape: f32[3,96], index: 1, kind: input, shape index: {}]   ;;  %s11046_s2 = inlined_call_operand.vmem [shape: f32[3,96], index: 2, kind: input, shape index: {}]   ;;  %s11047_s3 = inlined_call_operand.vmem [shape: f32[1,96], index: 3, kind: input, shape index: {}]   ;;  %s11048_s4 = inlined_call_operand.vmem [shape: f32[5,96,96], index: 4, kind: input, shape index: {}]   ;;  %s11049_s5 = inlined_call_operand.vmem [shape: f32[5,1,96], index: 5, kind: input, shape index: {}]   ;;  %s11050_s6 = inlined_call_operand.vmem [shape: f32[96,3], index: 6, kind: input, shape index: {}]   ;;  %s11051_s7 = inlined_call_operand.vmem [shape: f32[1024,3], index: 7, kind: output, shape index: {}]  }
   0x1 LB: > { %s5791_s25 = sadd.s32 4294967295, %s8866_s24   ;;  %p5795_p0 = scmp.ge.s32.totalorder %s8866_s24, 1  ;;  %s8866_s24 = sphi %s8908_s24, %s17_s24  }
   0x2   : > { %p238_p1 = scmp.lt.s32.totalorder %s8866_s24, 3 }
   0x4   : > { %p239_p2 = pnand %p5795_p0, %p238_p1 }
   0x6   : > { %242 = sbr.rel (%p239_p2) target bundleno = 1729 (0x6c1), region = 48 }
   0xd   : > { %vm540_vm0 = vcmask 1042432   ;;  %v929_v0 = vld [vmem:[%s11046_s2] sm:$0x7]  ;;  %s5796_s28 = sshll.u32 %s5791_s25, 6  ;;  %v1390_v3 = vld [vmem:[%s11048_s4 + $0x8] sm:$0xff]  ;;  %v1391_v5 = vld [vmem:[%s11048_s4 + $0x10] sm:$0xff] }
   0xe   : > { %v1389_v1 = vld [vmem:[%s11048_s4] sm:$0xff]  ;;  %7058 = vmatprep.subr.msk.mxu1 %vm540_vm0, %v929_v0  ;;  %p271_p3 = scmp.lt.s32.totalorder %s5796_s28, 127  ;;  %v1392_v6 = vld [vmem:[%s11048_s4 + $0x18] sm:$0xff]  ;;  %vm347_vm1 = vcmask 23552   ;;  %v1394_v12 = vld [vmem:[%s11048_s4 + $0x28] sm:$0xff]  ;;  %vm1408_vm2 = vcmask 785408  }
   0xf   : > { %v346_v2 = vld [vmem:[%s11045_s1] sm:$0x7]  ;;  %7059 = vmatpush3.msk.msra.mxu1 %vm540_vm0, %v929_v0  ;;  %v7876_v4 = vpack.c.bf16 %v1390_v3, %v1389_v1  ;;  %v7880_v10 = vpack.c.bf16 %v1392_v6, %v1391_v5  ;;  %v1395_v16 = vld [vmem:[%s11048_s4 + $0x30] sm:$0xff]  ;;  %v1396_v17 = vld [vmem:[%s11048_s4 + $0x38] sm:$0xff] }
  0x10   : > { %6960 = vmatprep.subr.msk.mxu0 %vm540_vm0, %v346_v2  ;;  %s11183_s28 = smov (!%p271_p3, %s5796_s28), 127  ;;  %v1393_v11 = vld [vmem:[%s11048_s4 + $0x20] sm:$0xff]  ;;  %v7888_v20 = vpack.c.bf16 %v1396_v17, %v1395_v16  ;;  %v1398_v22 = vld [vmem:[%s11048_s4 + $0x48] sm:$0xff]  ;;  %v1399_v30 = vld [vmem:[%s11048_s4 + $0x50] sm:$0xff] }
  0x11   : > { %6961 = vmatpush3.msk.msra.mxu0 %vm540_vm0, %v346_v2  ;;  %s5797_s16 = sshll.u32 %s11183_s28, 3  ;;  %v7884_v15 = vpack.c.bf16 %v1394_v12, %v1393_v11  ;;  %v1397_v21 = vld [vmem:[%s11048_s4 + $0x40] sm:$0xff]  ;;  %v1400_v31 = vld [vmem:[%s11048_s4 + $0x58] sm:$0xff] }
  0x12   : > { %7877 = vmatprep.subr.bf16.mxu0 %v7876_v4  ;;  %s8942_s19 = scalar_lea.vmem %s11044_s0, %s5797_s16  ;;  %v7892_v25 = vpack.c.bf16 %v1398_v22, %v1397_v21  ;;  %v7896_v32 = vpack.c.bf16 %v1400_v31, %v1399_v30  ;;  %v5997_v21 = vld [vmem:[%s11048_s4 + $0x68] sm:$0xff]  ;;  %s10851_s17 = scalar_lea.vmem %s11051_s7, %s5797_s16 }
  0x13   : > { %v282_v7 = vld [vmem:[%s8942_s19] sm:$0xff]  ;;  %v283_v8 = vld [vmem:[%s8942_s19 + $0x8] sm:$0xff]  ;;  %v284_v9 = vld [vmem:[%s8942_s19 + $0x10] sm:$0xff] }
  0x14   : > { %7060 = vmatprep.mubr.msk.f32.mxu1 %vm347_vm1, %v282_v7  ;;  %6962 = vmatprep.mubr.msk.f32.mxu0 %vm347_vm1, %v282_v7  ;;  %v285_v13 = vld [vmem:[%s8942_s19 + $0x18] sm:$0xff]  ;;  %v286_v14 = vld [vmem:[%s8942_s19 + $0x20] sm:$0xff]  ;;  %v287_v18 = vld [vmem:[%s8942_s19 + $0x28] sm:$0xff] }
  0x15   : > { %7061 = vmatmul.mubr.msk.f32.vlgmr.msra.gmra.mrb[0].mxu1 %vm347_vm1, %v283_v8  ;;  %6963 = vmatmul.mubr.msk.f32.vlgmr.msra.gmra.mrb[0].mxu0 %vm347_vm1, %v283_v8  ;;  %v288_v19 = vld [vmem:[%s8942_s19 + $0x30] sm:$0xff]  ;;  %v289_v23 = vld [vmem:[%s8942_s19 + $0x38] sm:$0xff]  ;;  %v290_v24 = vld [vmem:[%s8942_s19 + $0x40] sm:$0xff] }
  0x16   : > { %7063 = vmatprep.mubr.msk.f32.mxu1 %vm347_vm1, %v284_v9  ;;  %7879 = vmatpush3.bf16.msra.mxu0 %v7876_v4  ;;  %v291_v26 = vld [vmem:[%s8942_s19 + $0x48] sm:$0xff]  ;;  %v292_v27 = vld [vmem:[%s8942_s19 + $0x50] sm:$0xff]  ;;  %v293_v28 = vld [vmem:[%s8942_s19 + $0x58] sm:$0xff] }
  0x17   : > { %6965 = vmatprep.mubr.msk.f32.mxu0 %vm347_vm1, %v284_v9  ;;  %7881 = vmatprep.subr.bf16.mxu0 %v7880_v10  ;;  %v294_v29 = vld [vmem:[%s8942_s19 + $0x60] sm:$0xff]  ;;  %v295_v33 = vld [vmem:[%s8942_s19 + $0x68] sm:$0xff]  ;;  %v296_v34 = vld [vmem:[%s8942_s19 + $0x70] sm:$0xff] }
  0x18   : > { %v297_v35 = vld [vmem:[%s8942_s19 + $0x78] sm:$0xff]  ;;  %v298_v36 = vld [vmem:[%s8942_s19 + $0x80] sm:$0xff]  ;;  %v299_v37 = vld [vmem:[%s8942_s19 + $0x88] sm:$0xff] }
  0x19   : > { %7064 = vmatmul.mubr.msk.f32.gmra.mrb[2].mxu1 %vm347_vm1, %v285_v13  ;;  %6966 = vmatmul.mubr.msk.f32.gmra.mrb[2].mxu0 %vm347_vm1, %v285_v13  ;;  %v300_v38 = vld [vmem:[%s8942_s19 + $0x90] sm:$0xff]  ;;  %v301_v39 = vld [vmem:[%s8942_s19 + $0x98] sm:$0xff]  ;;  %v302_v40 = vld [vmem:[%s8942_s19 + $0xa0] sm:$0xff] }
  0x1a   : > { %7066 = vmatprep.mubr.msk.f32.mxu1 %vm347_vm1, %v286_v14  ;;  %6968 = vmatprep.mubr.msk.f32.mxu0 %vm347_vm1, %v286_v14  ;;  %v303_v41 = vld [vmem:[%s8942_s19 + $0xa8] sm:$0xff]  ;;  %v304_v42 = vld [vmem:[%s8942_s19 + $0xb0] sm:$0xff]  ;;  %v305_v43 = vld [vmem:[%s8942_s19 + $0xb8] sm:$0xff] }
  0x1b   : > { %7883 = vmatpush3.bf16.msra.mxu0 %v7880_v10  ;;  %v306_v44 = vld [vmem:[%s8942_s19 + $0xc0] sm:$0xff]  ;;  %v307_v45 = vld [vmem:[%s8942_s19 + $0xc8] sm:$0xff]  ;;  %v308_v46 = vld [vmem:[%s8942_s19 + $0xd0] sm:$0xff] }
  0x1c   : > { %7885 = vmatprep.subr.bf16.mxu0 %v7884_v15  ;;  %v309_v47 = vld [vmem:[%s8942_s19 + $0xd8] sm:$0xff]  ;;  %v310_v48 = vld [vmem:[%s8942_s19 + $0xe0] sm:$0xff]  ;;  %v311_v49 = vld [vmem:[%s8942_s19 + $0xe8] sm:$0xff] }
  0x1d   : > { %7067 = vmatmul.mubr.msk.f32.gmra.mrb[4].mxu1 %vm347_vm1, %v287_v18  ;;  %6969 = vmatmul.mubr.msk.f32.gmra.mrb[4].mxu0 %vm347_vm1, %v287_v18  ;;  %v312_v50 = vld [vmem:[%s8942_s19 + $0xf0] sm:$0xff]  ;;  %v313_v51 = vld [vmem:[%s8942_s19 + $0xf8] sm:$0xff]  ;;  %v314_v52 = vld [vmem:[%s8942_s19 + $0x100] sm:$0xff] }
  0x1e   : > { %7069 = vmatprep.mubr.msk.f32.mxu1 %vm347_vm1, %v288_v19  ;;  %6971 = vmatprep.mubr.msk.f32.mxu0 %vm347_vm1, %v288_v19  ;;  %v315_v53 = vld [vmem:[%s8942_s19 + $0x108] sm:$0xff]  ;;  %v316_v54 = vld [vmem:[%s8942_s19 + $0x110] sm:$0xff]  ;;  %v317_v55 = vld [vmem:[%s8942_s19 + $0x118] sm:$0xff] }
  0x1f   : > { %7887 = vmatpush3.bf16.msra.mxu0 %v7884_v15  ;;  %v318_v56 = vld [vmem:[%s8942_s19 + $0x120] sm:$0xff]  ;;  %v319_v57 = vld [vmem:[%s8942_s19 + $0x128] sm:$0xff]  ;;  %v320_v58 = vld [vmem:[%s8942_s19 + $0x130] sm:$0xff] }
  0x20   : > { %7889 = vmatprep.subr.bf16.mxu0 %v7888_v20  ;;  %v321_v59 = vld [vmem:[%s8942_s19 + $0x138] sm:$0xff]  ;;  %v322_v60 = vld [vmem:[%s8942_s19 + $0x140] sm:$0xff]  ;;  %v323_v61 = vld [vmem:[%s8942_s19 + $0x148] sm:$0xff] }
  0x21   : > { %7070 = vmatmul.mubr.msk.f32.gmra.mrb[6].mxu1 %vm347_vm1, %v289_v23  ;;  %6972 = vmatmul.mubr.msk.f32.gmra.mrb[6].mxu0 %vm347_vm1, %v289_v23  ;;  %v324_v62 = vld [vmem:[%s8942_s19 + $0x150] sm:$0xff]  ;;  %v325_v63 = vld [vmem:[%s8942_s19 + $0x158] sm:$0xff]  ;;  %v326_v0 = vld [vmem:[%s8942_s19 + $0x160] sm:$0xff] }
  0x22   : > { %7072 = vmatprep.mubr.msk.f32.mxu1 %vm347_vm1, %v290_v24  ;;  %6974 = vmatprep.mubr.msk.f32.mxu0 %vm347_vm1, %v290_v24  ;;  %v327_v1 = vld [vmem:[%s8942_s19 + $0x168] sm:$0xff]  ;;  %v328_v2 = vld [vmem:[%s8942_s19 + $0x170] sm:$0xff]  ;;  %v329_v3 = vld [vmem:[%s8942_s19 + $0x178] sm:$0xff] }
  0x23   : > { %7891 = vmatpush3.bf16.msra.mxu0 %v7888_v20  ;;  %v330_v4 = vld [vmem:[%s8942_s19 + $0x180] sm:$0xff]  ;;  %v331_v5 = vld [vmem:[%s8942_s19 + $0x188] sm:$0xff]  ;;  %v332_v6 = vld [vmem:[%s8942_s19 + $0x190] sm:$0xff] }
  0x24   : > { %7893 = vmatprep.subr.bf16.mxu0 %v7892_v25  ;;  %v333_v7 = vld [vmem:[%s8942_s19 + $0x198] sm:$0xff]  ;;  %v334_v8 = vld [vmem:[%s8942_s19 + $0x1a0] sm:$0xff]  ;;  %v335_v9 = vld [vmem:[%s8942_s19 + $0x1a8] sm:$0xff] }
  0x25   : > { %7073 = vmatmul.mubr.msk.f32.gmra.mrb[8].mxu1 %vm347_vm1, %v291_v26  ;;  %6975 = vmatmul.mubr.msk.f32.gmra.mrb[8].mxu0 %vm347_vm1, %v291_v26  ;;  %v336_v10 = vld [vmem:[%s8942_s19 + $0x1b0] sm:$0xff]  ;;  %v337_v11 = vld [vmem:[%s8942_s19 + $0x1b8] sm:$0xff]  ;;  %v338_v12 = vld [vmem:[%s8942_s19 + $0x1c0] sm:$0xff] }
  0x26   : > { %7075 = vmatprep.mubr.msk.f32.mxu1 %vm347_vm1, %v292_v27  ;;  %6977 = vmatprep.mubr.msk.f32.mxu0 %vm347_vm1, %v292_v27  ;;  %v339_v13 = vld [vmem:[%s8942_s19 + $0x1c8] sm:$0xff]  ;;  %v340_v14 = vld [vmem:[%s8942_s19 + $0x1d0] sm:$0xff]  ;;  %v341_v15 = vld [vmem:[%s8942_s19 + $0x1d8] sm:$0xff] }
  0x27   : > { %7895 = vmatpush3.bf16.msra.mxu0 %v7892_v25  ;;  %v342_v16 = vld [vmem:[%s8942_s19 + $0x1e0] sm:$0xff]  ;;  %v343_v17 = vld [vmem:[%s8942_s19 + $0x1e8] sm:$0xff]  ;;  %v344_v18 = vld [vmem:[%s8942_s19 + $0x1f0] sm:$0xff] }
  0x28   : > { %7897 = vmatprep.subr.bf16.mxu0 %v7896_v32  ;;  %v345_v19 = vld [vmem:[%s8942_s19 + $0x1f8] sm:$0xff]  ;;  %v5996_v20 = vld [vmem:[%s11048_s4 + $0x60] sm:$0xff] }
  0x29   : > { %7076 = vmatmul.mubr.msk.f32.gmra.mrb[10].mxu1 %vm347_vm1, %v293_v28  ;;  %6978 = vmatmul.mubr.msk.f32.gmra.mrb[10].mxu0 %vm347_vm1, %v293_v28  ;;  %v7900_v22 = vpack.c.bf16 %v5997_v21, %v5996_v20  ;;  %v9169_v23 = vld [vmem:[%s11047_s3] ss:$0 sm:$0xff] }
  0x2a   : > { %7078 = vmatprep.mubr.msk.f32.mxu1 %vm347_vm1, %v294_v29  ;;  %6980 = vmatprep.mubr.msk.f32.mxu0 %vm347_vm1, %v294_v29 }
  0x2b   : > { %7899 = vmatpush3.bf16.msra.mxu0 %v7896_v32  ;;  %7901 = vmatprep.subr.bf16.mxu1 %v7900_v22 }
  0x2c   : > { %7903 = vmatpush3.bf16.msra.mxu1 %v7900_v22 }
  0x2d   : > { %7079 = vmatmul.mubr.msk.f32.gmra.mrb[12].mxu1 %vm347_vm1, %v295_v33  ;;  %6981 = vmatmul.mubr.msk.f32.gmra.mrb[12].mxu0 %vm347_vm1, %v295_v33 }
  0x2e   : > { %7081 = vmatprep.mubr.msk.f32.mxu1 %vm347_vm1, %v296_v34  ;;  %6983 = vmatprep.mubr.msk.f32.mxu0 %vm347_vm1, %v296_v34 }
  0x31   : > { %7082 = vmatmul.mubr.msk.f32.gmra.mrb[14].mxu1 %vm347_vm1, %v297_v35  ;;  %6984 = vmatmul.mubr.msk.f32.gmra.mrb[14].mxu0 %vm347_vm1, %v297_v35 }
  0x32   : > { %7084 = vmatprep.mubr.msk.f32.mxu1 %vm347_vm1, %v298_v36  ;;  %6986 = vmatprep.mubr.msk.f32.mxu0 %vm347_vm1, %v298_v36 }
  0x35   : > { %7085 = vmatmul.mubr.msk.f32.gmra.mrb[16].mxu1 %vm347_vm1, %v299_v37  ;;  %6987 = vmatmul.mubr.msk.f32.gmra.mrb[16].mxu0 %vm347_vm1, %v299_v37 }
  0x36   : > { %7087 = vmatprep.mubr.msk.f32.mxu1 %vm347_vm1, %v300_v38  ;;  %6989 = vmatprep.mubr.msk.f32.mxu0 %vm347_vm1, %v300_v38  ;;  %v5998_v38 = vld [vmem:[%s11048_s4 + $0x70] sm:$0xff] }
  0x39   : > { %7088 = vmatmul.mubr.msk.f32.gmra.mrb[18].mxu1 %vm347_vm1, %v301_v39  ;;  %6990 = vmatmul.mubr.msk.f32.gmra.mrb[18].mxu0 %vm347_vm1, %v301_v39  ;;  %v5999_v39 = vld [vmem:[%s11048_s4 + $0x78] sm:$0xff] }
  0x3a   : > { %7090 = vmatprep.mubr.msk.f32.mxu1 %vm347_vm1, %v302_v40  ;;  %6992 = vmatprep.mubr.msk.f32.mxu0 %vm347_vm1, %v302_v40 }
  0x3d   : > { %7091 = vmatmul.mubr.msk.f32.gmra.mrb[20].mxu1 %vm347_vm1, %v303_v41  ;;  %6993 = vmatmul.mubr.msk.f32.gmra.mrb[20].mxu0 %vm347_vm1, %v303_v41 }
  0x3e   : > { %7093 = vmatprep.mubr.msk.f32.mxu1 %vm347_vm1, %v304_v42  ;;  %6995 = vmatprep.mubr.msk.f32.mxu0 %vm347_vm1, %v304_v42 }
  0x41   : > { %7094 = vmatmul.mubr.msk.f32.gmra.mrb[22].mxu1 %vm347_vm1, %v305_v43  ;;  %6996 = vmatmul.mubr.msk.f32.gmra.mrb[22].mxu0 %vm347_vm1, %v305_v43  ;;  %v7904_v43 = vpack.c.bf16 %v5999_v39, %v5998_v38 }
  0x42   : > { %7096 = vmatprep.mubr.msk.f32.mxu1 %vm347_vm1, %v306_v44  ;;  %6998 = vmatprep.mubr.msk.f32.mxu0 %vm347_vm1, %v306_v44 }
  0x43   : > { %7905 = vmatprep.subr.bf16.mxu1 %v7904_v43 }
  0x44   : > { %7907 = vmatpush3.bf16.msra.mxu1 %v7904_v43 }
  0x45   : > { %7097 = vmatmul.mubr.msk.f32.gmra.mrb[24].mxu1 %vm347_vm1, %v307_v45  ;;  %6999 = vmatmul.mubr.msk.f32.gmra.mrb[24].mxu0 %vm347_vm1, %v307_v45 }
  0x46   : > { %7099 = vmatprep.mubr.msk.f32.mxu1 %vm347_vm1, %v308_v46  ;;  %7001 = vmatprep.mubr.msk.f32.mxu0 %vm347_vm1, %v308_v46 }
  0x49   : > { %7100 = vmatmul.mubr.msk.f32.gmra.mrb[26].mxu1 %vm347_vm1, %v309_v47  ;;  %7002 = vmatmul.mubr.msk.f32.gmra.mrb[26].mxu0 %vm347_vm1, %v309_v47  ;;  %v6000_v47 = vld [vmem:[%s11048_s4 + $0x80] sm:$0xff] }
  0x4a   : > { %7102 = vmatprep.mubr.msk.f32.mxu1 %vm347_vm1, %v310_v48  ;;  %7004 = vmatprep.mubr.msk.f32.mxu0 %vm347_vm1, %v310_v48  ;;  %v6001_v48 = vld [vmem:[%s11048_s4 + $0x88] sm:$0xff] }
  0x4d   : > { %7103 = vmatmul.mubr.msk.f32.gmra.mrb[28].mxu1 %vm347_vm1, %v311_v49  ;;  %7005 = vmatmul.mubr.msk.f32.gmra.mrb[28].mxu0 %vm347_vm1, %v311_v49  ;;  %v6002_v49 = vld [vmem:[%s11048_s4 + $0x90] sm:$0xff] }
  0x4e   : > { %7105 = vmatprep.mubr.msk.f32.mxu1 %vm347_vm1, %v312_v50  ;;  %7007 = vmatprep.mubr.msk.f32.mxu0 %vm347_vm1, %v312_v50 }
  0x51   : > { %7106 = vmatmul.mubr.msk.f32.gmra.mrb[30].mxu1 %vm347_vm1, %v313_v51  ;;  %7008 = vmatmul.mubr.msk.f32.gmra.mrb[30].mxu0 %vm347_vm1, %v313_v51 }
  0x52   : > { %7108 = vmatprep.mubr.msk.f32.mxu1 %vm347_vm1, %v314_v52  ;;  %7010 = vmatprep.mubr.msk.f32.mxu0 %vm347_vm1, %v314_v52 }
  0x55   : > { %7109 = vmatmul.mubr.msk.f32.gmra.mrb[32].mxu1 %vm347_vm1, %v315_v53  ;;  %7011 = vmatmul.mubr.msk.f32.gmra.mrb[32].mxu0 %vm347_vm1, %v315_v53  ;;  %v7908_v53 = vpack.c.bf16 %v6001_v48, %v6000_v47 }
  0x56   : > { %7111 = vmatprep.mubr.msk.f32.mxu1 %vm347_vm1, %v316_v54  ;;  %7013 = vmatprep.mubr.msk.f32.mxu0 %vm347_vm1, %v316_v54  ;;  %v6003_v54 = vld [vmem:[%s11048_s4 + $0x98] sm:$0xff] }
  0x57   : > { %7909 = vmatprep.subr.bf16.mxu1 %v7908_v53 }
  0x58   : > { %7911 = vmatpush3.bf16.msra.mxu1 %v7908_v53 }
  0x59   : > { %7112 = vmatmul.mubr.msk.f32.gmra.mrb[34].mxu1 %vm347_vm1, %v317_v55  ;;  %7014 = vmatmul.mubr.msk.f32.gmra.mrb[34].mxu0 %vm347_vm1, %v317_v55 }
  0x5a   : > { %7114 = vmatprep.mubr.msk.f32.mxu1 %vm347_vm1, %v318_v56  ;;  %7016 = vmatprep.mubr.msk.f32.mxu0 %vm347_vm1, %v318_v56 }
  0x5d   : > { %7115 = vmatmul.mubr.msk.f32.gmra.mrb[36].mxu1 %vm347_vm1, %v319_v57  ;;  %7017 = vmatmul.mubr.msk.f32.gmra.mrb[36].mxu0 %vm347_vm1, %v319_v57  ;;  %v7912_v57 = vpack.c.bf16 %v6003_v54, %v6002_v49 }
  0x5e   : > { %7117 = vmatprep.mubr.msk.f32.mxu1 %vm347_vm1, %v320_v58  ;;  %7019 = vmatprep.mubr.msk.f32.mxu0 %vm347_vm1, %v320_v58  ;;  %v6004_v58 = vld [vmem:[%s11048_s4 + $0xa0] sm:$0xff] }
  0x5f   : > { %7913 = vmatprep.subr.bf16.mxu1 %v7912_v57 }
  0x60   : > { %7915 = vmatpush3.bf16.msra.mxu1 %v7912_v57 }
  0x61   : > { %7118 = vmatmul.mubr.msk.f32.gmra.mrb[38].mxu1 %vm347_vm1, %v321_v59  ;;  %7020 = vmatmul.mubr.msk.f32.gmra.mrb[38].mxu0 %vm347_vm1, %v321_v59  ;;  %v6005_v59 = vld [vmem:[%s11048_s4 + $0xa8] sm:$0xff] }
  0x62   : > { %7120 = vmatprep.mubr.msk.f32.mxu1 %vm347_vm1, %v322_v60  ;;  %7022 = vmatprep.mubr.msk.f32.mxu0 %vm347_vm1, %v322_v60 }
  0x65   : > { %7121 = vmatmul.mubr.msk.f32.gmra.mrb[40].mxu1 %vm347_vm1, %v323_v61  ;;  %7023 = vmatmul.mubr.msk.f32.gmra.mrb[40].mxu0 %vm347_vm1, %v323_v61 }
  0x66   : > { %7123 = vmatprep.mubr.msk.f32.mxu1 %vm347_vm1, %v324_v62  ;;  %7025 = vmatprep.mubr.msk.f32.mxu0 %vm347_vm1, %v324_v62 }
  0x69   : > { %7124 = vmatmul.mubr.msk.f32.gmra.mrb[42].mxu1 %vm347_vm1, %v325_v63  ;;  %7026 = vmatmul.mubr.msk.f32.gmra.mrb[42].mxu0 %vm347_vm1, %v325_v63 }
  0x6a   : > { %7126 = vmatprep.mubr.msk.f32.mxu1 %vm347_vm1, %v326_v0  ;;  %7028 = vmatprep.mubr.msk.f32.mxu0 %vm347_vm1, %v326_v0 }
  0x6d   : > { %7127 = vmatmul.mubr.msk.f32.gmra.mrb[44].mxu1 %vm347_vm1, %v327_v1  ;;  %7029 = vmatmul.mubr.msk.f32.gmra.mrb[44].mxu0 %vm347_vm1, %v327_v1 }
  0x6e   : > { %7129 = vmatprep.mubr.msk.f32.mxu1 %vm347_vm1, %v328_v2  ;;  %7031 = vmatprep.mubr.msk.f32.mxu0 %vm347_vm1, %v328_v2  ;;  %v7916_v2 = vpack.c.bf16 %v6005_v59, %v6004_v58 }
  0x70   : > { %7917 = vmatprep.subr.bf16.mxu1 %v7916_v2 }
  0x71   : > { %7130 = vmatmul.mubr.msk.f32.gmra.mrb[46].mxu1 %vm347_vm1, %v329_v3  ;;  %7032 = vmatmul.mubr.msk.f32.gmra.mrb[46].mxu0 %vm347_vm1, %v329_v3 }
  0x72   : > { %7132 = vmatprep.mubr.msk.f32.mxu1 %vm347_vm1, %v330_v4  ;;  %7034 = vmatprep.mubr.msk.f32.mxu0 %vm347_vm1, %v330_v4 }
  0x73   : > { %7919 = vmatpush3.bf16.msra.mxu1 %v7916_v2 }
  0x75   : > { %7133 = vmatmul.mubr.msk.f32.gmra.mrb[48].mxu1 %vm347_vm1, %v331_v5  ;;  %7035 = vmatmul.mubr.msk.f32.gmra.mrb[48].mxu0 %vm347_vm1, %v331_v5  ;;  %v6006_v5 = vld [vmem:[%s11048_s4 + $0xb0] sm:$0xff] }
  0x76   : > { %7135 = vmatprep.mubr.msk.f32.mxu1 %vm347_vm1, %v332_v6  ;;  %7037 = vmatprep.mubr.msk.f32.mxu0 %vm347_vm1, %v332_v6  ;;  %v6007_v6 = vld [vmem:[%s11048_s4 + $0xb8] sm:$0xff] }
  0x79   : > { %7136 = vmatmul.mubr.msk.f32.gmra.mrb[50].mxu1 %vm347_vm1, %v333_v7  ;;  %7038 = vmatmul.mubr.msk.f32.gmra.mrb[50].mxu0 %vm347_vm1, %v333_v7 }
  0x7a   : > { %7138 = vmatprep.mubr.msk.f32.mxu1 %vm347_vm1, %v334_v8  ;;  %7040 = vmatprep.mubr.msk.f32.mxu0 %vm347_vm1, %v334_v8 }
  0x7d   : > { %7139 = vmatmul.mubr.msk.f32.gmra.mrb[52].mxu1 %vm347_vm1, %v335_v9  ;;  %7041 = vmatmul.mubr.msk.f32.gmra.mrb[52].mxu0 %vm347_vm1, %v335_v9 }
  0x7e   : > { %7141 = vmatprep.mubr.msk.f32.mxu1 %vm347_vm1, %v336_v10  ;;  %7043 = vmatprep.mubr.msk.f32.mxu0 %vm347_vm1, %v336_v10 }
  0x81   : > { %7142 = vmatmul.mubr.msk.f32.gmra.mrb[54].mxu1 %vm347_vm1, %v337_v11  ;;  %7044 = vmatmul.mubr.msk.f32.gmra.mrb[54].mxu0 %vm347_vm1, %v337_v11 }
  0x82   : > { %7144 = vmatprep.mubr.msk.f32.mxu1 %vm347_vm1, %v338_v12  ;;  %7046 = vmatprep.mubr.msk.f32.mxu0 %vm347_vm1, %v338_v12 }
  0x85   : > { %7145 = vmatmul.mubr.msk.f32.gmra.mrb[56].mxu1 %vm347_vm1, %v339_v13  ;;  %7047 = vmatmul.mubr.msk.f32.gmra.mrb[56].mxu0 %vm347_vm1, %v339_v13  ;;  %v7920_v13 = vpack.c.bf16 %v6007_v6, %v6006_v5 }
  0x86   : > { %7147 = vmatprep.mubr.msk.f32.mxu1 %vm347_vm1, %v340_v14  ;;  %7049 = vmatprep.mubr.msk.f32.mxu0 %vm347_vm1, %v340_v14 }
  0x87   : > { %7921 = vmatprep.subr.bf16.mxu1 %v7920_v13 }
  0x88   : > { %7923 = vmatpush3.bf16.msra.mxu1 %v7920_v13 }
  0x89   : > { %7148 = vmatmul.mubr.msk.f32.gmra.mrb[58].mxu1 %vm347_vm1, %v341_v15  ;;  %7050 = vmatmul.mubr.msk.f32.gmra.mrb[58].mxu0 %vm347_vm1, %v341_v15 }
  0x8a   : > { %7150 = vmatprep.mubr.msk.f32.mxu1 %vm347_vm1, %v342_v16  ;;  %7052 = vmatprep.mubr.msk.f32.mxu0 %vm347_vm1, %v342_v16 }
  0x8d   : > { %7151 = vmatmul.mubr.msk.f32.gmra.mrb[60].mxu1 %vm347_vm1, %v343_v17  ;;  %7053 = vmatmul.mubr.msk.f32.gmra.mrb[60].mxu0 %vm347_vm1, %v343_v17 }
  0x8e   : > { %7153 = vmatprep.mubr.msk.f32.mxu1 %vm347_vm1, %v344_v18  ;;  %7055 = vmatprep.mubr.msk.f32.mxu0 %vm347_vm1, %v344_v18 }
  0x91   : > { %7154 = vmatmul.mubr.msk.f32.gmra.mrb[62].mxu1 %vm347_vm1, %v345_v19  ;;  %7056 = vmatmul.mubr.msk.f32.gmra.mrb[62].mxu0 %vm347_vm1, %v345_v19 }
  0xe8   : > { %v7062_v24 = vpop.f32.mrb[0].mxu1  ;;  %v9171_v25 = vpop.f32.mrb[0].mxu0 }
  0xe9   : > { %v1012_v26 = vadd.f32 %v7062_v24, %v9169_v23  ;;  %v1006_v27 = vpop.f32.mrb[1].mxu1  ;;  %v9174_v28 = vpop.f32.mrb[1].mxu0 }
  0xea   : > { %v1007_v29 = vadd.f32 %v9169_v23, %v1006_v27 }
  0xec   : > { %8028 = vtanh.f32 %v1007_v29  ;;  %v7065_v30 = vpop.f32.mrb[2].mxu1  ;;  %v9177_v31 = vpop.f32.mrb[2].mxu0 }
  0xed   : > { %8030 = vtanh.f32 %v1012_v26  ;;  %v1022_v32 = vadd.f32 %v7065_v30, %v9169_v23  ;;  %v1016_v33 = vpop.f32.mrb[3].mxu1  ;;  %v9180_v34 = vpop.f32.mrb[3].mxu0 }
  0xee   : > { %v1017_v35 = vadd.f32 %v9169_v23, %v1016_v33 }
  0xf0   : > { %8032 = vtanh.f32 %v1017_v35  ;;  %v7068_v36 = vpop.f32.mrb[4].mxu1  ;;  %v9183_v37 = vpop.f32.mrb[4].mxu0 }
  0xf1   : > { %8034 = vtanh.f32 %v1022_v32  ;;  %v1032_v40 = vadd.f32 %v7068_v36, %v9169_v23  ;;  %v1026_v41 = vpop.f32.mrb[5].mxu1  ;;  %v9192_v42 = vpop.f32.mrb[5].mxu0 }
  0xf2   : > { %v1027_v44 = vadd.f32 %v9169_v23, %v1026_v41 }
  0xf4   : > { %8036 = vtanh.f32 %v1027_v44  ;;  %v7071_v45 = vpop.f32.mrb[6].mxu1  ;;  %v9195_v46 = vpop.f32.mrb[6].mxu0 }
  0xf5   : > { %8038 = vtanh.f32 %v1032_v40  ;;  %v1042_v50 = vadd.f32 %v7071_v45, %v9169_v23  ;;  %v1036_v51 = vpop.f32.mrb[7].mxu1  ;;  %v9207_v52 = vpop.f32.mrb[7].mxu0 }
  0xf6   : > { %v8029_v55 = vpop.eup %8028  ;;  %v1037_v56 = vadd.f32 %v9169_v23, %v1036_v51 }
  0xf7   : > { %v8031_v60 = vpop.eup %8030  ;;  %7180 = vmatprep.mubr.msk.f32.mxu0 %vm1408_vm2, %v8029_v55 }
  0xf8   : > { %8040 = vtanh.f32 %v1037_v56  ;;  %v7074_v61 = vpop.f32.mrb[8].mxu1  ;;  %7181 = vmatmul.mubr.msk.f32.vlgmr.msra.gmra.mrb[64].mxu0 %vm1408_vm2, %v8031_v60  ;;  %v9221_v62 = vpop.f32.mrb[8].mxu0 }
  0xf9   : > { %8042 = vtanh.f32 %v1042_v50  ;;  %v1052_v63 = vadd.f32 %v7074_v61, %v9169_v23  ;;  %v1046_v0 = vpop.f32.mrb[9].mxu1  ;;  %v9224_v1 = vpop.f32.mrb[9].mxu0 }
  0xfa   : > { %v8033_v3 = vpop.eup %8032  ;;  %v1047_v4 = vadd.f32 %v9169_v23, %v1046_v0 }
  0xfb   : > { %v8035_v7 = vpop.eup %8034  ;;  %7183 = vmatprep.mubr.msk.f32.mxu0 %vm1408_vm2, %v8033_v3 }
  0xfc   : > { %8044 = vtanh.f32 %v1047_v4  ;;  %v7077_v8 = vpop.f32.mrb[10].mxu1  ;;  %7184 = vmatmul.mubr.msk.f32.gmra.mrb[66].mxu0 %vm1408_vm2, %v8035_v7  ;;  %v9235_v9 = vpop.f32.mrb[10].mxu0 }
  0xfd   : > { %8046 = vtanh.f32 %v1052_v63  ;;  %v1062_v10 = vadd.f32 %v7077_v8, %v9169_v23  ;;  %v1056_v11 = vpop.f32.mrb[11].mxu1  ;;  %v9238_v12 = vpop.f32.mrb[11].mxu0 }
  0xfe   : > { %v8037_v14 = vpop.eup %8036  ;;  %v1057_v15 = vadd.f32 %v9169_v23, %v1056_v11 }
  0xff   : > { %v8039_v16 = vpop.eup %8038  ;;  %7186 = vmatprep.mubr.msk.f32.mxu0 %vm1408_vm2, %v8037_v14 }
 0x100   : > { %8048 = vtanh.f32 %v1057_v15  ;;  %v7080_v17 = vpop.f32.mrb[12].mxu1  ;;  %7187 = vmatmul.mubr.msk.f32.gmra.mrb[68].mxu0 %vm1408_vm2, %v8039_v16  ;;  %v9243_v18 = vpop.f32.mrb[12].mxu0 }
 0x101   : > { %8050 = vtanh.f32 %v1062_v10  ;;  %v1072_v19 = vadd.f32 %v7080_v17, %v9169_v23  ;;  %v1066_v20 = vpop.f32.mrb[13].mxu1  ;;  %v9246_v21 = vpop.f32.mrb[13].mxu0 }
 0x102   : > { %v8041_v22 = vpop.eup %8040  ;;  %v1067_v24 = vadd.f32 %v9169_v23, %v1066_v20 }
 0x103   : > { %v8043_v26 = vpop.eup %8042  ;;  %7189 = vmatprep.mubr.msk.f32.mxu0 %vm1408_vm2, %v8041_v22 }
 0x104   : > { %8052 = vtanh.f32 %v1067_v24  ;;  %v7083_v27 = vpop.f32.mrb[14].mxu1  ;;  %7190 = vmatmul.mubr.msk.f32.gmra.mrb[70].mxu0 %vm1408_vm2, %v8043_v26  ;;  %v9251_v29 = vpop.f32.mrb[14].mxu0 }
 0x105   : > { %8054 = vtanh.f32 %v1072_v19  ;;  %v1082_v30 = vadd.f32 %v7083_v27, %v9169_v23  ;;  %v1076_v32 = vpop.f32.mrb[15].mxu1  ;;  %v9254_v33 = vpop.f32.mrb[15].mxu0 }
 0x106   : > { %v8045_v35 = vpop.eup %8044  ;;  %v1077_v36 = vadd.f32 %v9169_v23, %v1076_v32 }
 0x107   : > { %v8047_v38 = vpop.eup %8046  ;;  %7192 = vmatprep.mubr.msk.f32.mxu0 %vm1408_vm2, %v8045_v35 }
 0x108   : > { %8056 = vtanh.f32 %v1077_v36  ;;  %v7086_v39 = vpop.f32.mrb[16].mxu1  ;;  %7193 = vmatmul.mubr.msk.f32.gmra.mrb[72].mxu0 %vm1408_vm2, %v8047_v38  ;;  %v9259_v40 = vpop.f32.mrb[16].mxu0 }
 0x109   : > { %8058 = vtanh.f32 %v1082_v30  ;;  %v1092_v41 = vadd.f32 %v7086_v39, %v9169_v23  ;;  %v1086_v43 = vpop.f32.mrb[17].mxu1  ;;  %v9262_v44 = vpop.f32.mrb[17].mxu0 }
 0x10a   : > { %v8049_v45 = vpop.eup %8048  ;;  %v1087_v47 = vadd.f32 %v9169_v23, %v1086_v43 }
 0x10b   : > { %v8051_v48 = vpop.eup %8050  ;;  %7195 = vmatprep.mubr.msk.f32.mxu0 %vm1408_vm2, %v8049_v45 }
 0x10c   : > { %8060 = vtanh.f32 %v1087_v47  ;;  %v7089_v49 = vpop.f32.mrb[18].mxu1  ;;  %7196 = vmatmul.mubr.msk.f32.gmra.mrb[74].mxu0 %vm1408_vm2, %v8051_v48  ;;  %v9267_v50 = vpop.f32.mrb[18].mxu0 }
 0x10d   : > { %8062 = vtanh.f32 %v1092_v41  ;;  %v1102_v51 = vadd.f32 %v7089_v49, %v9169_v23  ;;  %v1096_v53 = vpop.f32.mrb[19].mxu1  ;;  %v9270_v54 = vpop.f32.mrb[19].mxu0 }
 0x10e   : > { %v8053_v55 = vpop.eup %8052  ;;  %v1097_v56 = vadd.f32 %v9169_v23, %v1096_v53 }
 0x10f   : > { %v8055_v57 = vpop.eup %8054  ;;  %7198 = vmatprep.mubr.msk.f32.mxu0 %vm1408_vm2, %v8053_v55 }
 0x110   : > { %8064 = vtanh.f32 %v1097_v56  ;;  %v7092_v58 = vpop.f32.mrb[20].mxu1  ;;  %7199 = vmatmul.mubr.msk.f32.gmra.mrb[76].mxu0 %vm1408_vm2, %v8055_v57  ;;  %v9275_v59 = vpop.f32.mrb[20].mxu0 }
 0x111   : > { %8066 = vtanh.f32 %v1102_v51  ;;  %v1112_v60 = vadd.f32 %v7092_v58, %v9169_v23  ;;  %v1106_v61 = vpop.f32.mrb[21].mxu1  ;;  %v9278_v63 = vpop.f32.mrb[21].mxu0 }
 0x112   : > { %v8057_v0 = vpop.eup %8056  ;;  %v1107_v2 = vadd.f32 %v9169_v23, %v1106_v61 }
 0x113   : > { %v8059_v3 = vpop.eup %8058  ;;  %7201 = vmatprep.mubr.msk.f32.mxu0 %vm1408_vm2, %v8057_v0 }
 0x114   : > { %8068 = vtanh.f32 %v1107_v2  ;;  %v7095_v4 = vpop.f32.mrb[22].mxu1  ;;  %7202 = vmatmul.mubr.msk.f32.gmra.mrb[78].mxu0 %vm1408_vm2, %v8059_v3  ;;  %v9283_v5 = vpop.f32.mrb[22].mxu0 }
 0x115   : > { %8070 = vtanh.f32 %v1112_v60  ;;  %v1122_v6 = vadd.f32 %v7095_v4, %v9169_v23  ;;  %v1116_v7 = vpop.f32.mrb[23].mxu1  ;;  %v9286_v8 = vpop.f32.mrb[23].mxu0 }
 0x116   : > { %v8061_v10 = vpop.eup %8060  ;;  %v1117_v11 = vadd.f32 %v9169_v23, %v1116_v7 }
 0x117   : > { %v8063_v13 = vpop.eup %8062  ;;  %7204 = vmatprep.mubr.msk.f32.mxu0 %vm1408_vm2, %v8061_v10 }
 0x118   : > { %8072 = vtanh.f32 %v1117_v11  ;;  %v7098_v14 = vpop.f32.mrb[24].mxu1  ;;  %7205 = vmatmul.mubr.msk.f32.gmra.mrb[80].mxu0 %vm1408_vm2, %v8063_v13  ;;  %v9291_v15 = vpop.f32.mrb[24].mxu0 }
 0x119   : > { %8074 = vtanh.f32 %v1122_v6  ;;  %v1132_v16 = vadd.f32 %v7098_v14, %v9169_v23  ;;  %v1126_v17 = vpop.f32.mrb[25].mxu1  ;;  %v9294_v19 = vpop.f32.mrb[25].mxu0 }
 0x11a   : > { %v8065_v20 = vpop.eup %8064  ;;  %v1127_v22 = vadd.f32 %v9169_v23, %v1126_v17 }
 0x11b   : > { %v8067_v24 = vpop.eup %8066  ;;  %7207 = vmatprep.mubr.msk.f32.mxu0 %vm1408_vm2, %v8065_v20 }
 0x11c   : > { %8076 = vtanh.f32 %v1127_v22  ;;  %v7101_v26 = vpop.f32.mrb[26].mxu1  ;;  %7208 = vmatmul.mubr.msk.f32.gmra.mrb[82].mxu0 %vm1408_vm2, %v8067_v24  ;;  %v9299_v27 = vpop.f32.mrb[26].mxu0 }
 0x11d   : > { %8078 = vtanh.f32 %v1132_v16  ;;  %v1142_v30 = vadd.f32 %v7101_v26, %v9169_v23  ;;  %v1136_v32 = vpop.f32.mrb[27].mxu1  ;;  %v9302_v35 = vpop.f32.mrb[27].mxu0 }
 0x11e   : > { %v8069_v36 = vpop.eup %8068  ;;  %v1137_v38 = vadd.f32 %v9169_v23, %v1136_v32 }
 0x11f   : > { %v8071_v39 = vpop.eup %8070  ;;  %7210 = vmatprep.mubr.msk.f32.mxu0 %vm1408_vm2, %v8069_v36 }
 0x120   : > { %8080 = vtanh.f32 %v1137_v38  ;;  %v7104_v41 = vpop.f32.mrb[28].mxu1  ;;  %7211 = vmatmul.mubr.msk.f32.gmra.mrb[84].mxu0 %vm1408_vm2, %v8071_v39  ;;  %v9307_v43 = vpop.f32.mrb[28].mxu0 }
 0x121   : > { %8082 = vtanh.f32 %v1142_v30  ;;  %v1152_v45 = vadd.f32 %v7104_v41, %v9169_v23  ;;  %v1146_v47 = vpop.f32.mrb[29].mxu1  ;;  %v9310_v48 = vpop.f32.mrb[29].mxu0 }
 0x122   : > { %v8073_v49 = vpop.eup %8072  ;;  %v1147_v51 = vadd.f32 %v9169_v23, %v1146_v47 }
 0x123   : > { %v8075_v53 = vpop.eup %8074  ;;  %7213 = vmatprep.mubr.msk.f32.mxu0 %vm1408_vm2, %v8073_v49 }
 0x124   : > { %8084 = vtanh.f32 %v1147_v51  ;;  %v7107_v55 = vpop.f32.mrb[30].mxu1  ;;  %7214 = vmatmul.mubr.msk.f32.gmra.mrb[86].mxu0 %vm1408_vm2, %v8075_v53  ;;  %v9315_v56 = vpop.f32.mrb[30].mxu0 }
 0x125   : > { %8086 = vtanh.f32 %v1152_v45  ;;  %v1162_v57 = vadd.f32 %v7107_v55, %v9169_v23  ;;  %v1156_v58 = vpop.f32.mrb[31].mxu1  ;;  %v9318_v60 = vpop.f32.mrb[31].mxu0 }
 0x126   : > { %v8077_v61 = vpop.eup %8076  ;;  %v1157_v0 = vadd.f32 %v9169_v23, %v1156_v58 }
 0x127   : > { %v8079_v2 = vpop.eup %8078  ;;  %7216 = vmatprep.mubr.msk.f32.mxu0 %vm1408_vm2, %v8077_v61 }
 0x128   : > { %8088 = vtanh.f32 %v1157_v0  ;;  %v7110_v3 = vpop.f32.mrb[32].mxu1  ;;  %7217 = vmatmul.mubr.msk.f32.gmra.mrb[88].mxu0 %vm1408_vm2, %v8079_v2  ;;  %v9323_v4 = vpop.f32.mrb[32].mxu0 }
 0x129   : > { %8090 = vtanh.f32 %v1162_v57  ;;  %v1172_v6 = vadd.f32 %v7110_v3, %v9169_v23  ;;  %v1166_v7 = vpop.f32.mrb[33].mxu1  ;;  %v9326_v10 = vpop.f32.mrb[33].mxu0 }
 0x12a   : > { %v8081_v11 = vpop.eup %8080  ;;  %v1167_v13 = vadd.f32 %v9169_v23, %v1166_v7 }
 0x12b   : > { %v8083_v14 = vpop.eup %8082  ;;  %7219 = vmatprep.mubr.msk.f32.mxu0 %vm1408_vm2, %v8081_v11 }
 0x12c   : > { %8092 = vtanh.f32 %v1167_v13  ;;  %v7113_v16 = vpop.f32.mrb[34].mxu1  ;;  %7220 = vmatmul.mubr.msk.f32.gmra.mrb[90].mxu0 %vm1408_vm2, %v8083_v14  ;;  %v9331_v17 = vpop.f32.mrb[34].mxu0 }
 0x12d   : > { %8094 = vtanh.f32 %v1172_v6  ;;  %v1182_v20 = vadd.f32 %v7113_v16, %v9169_v23  ;;  %v1176_v22 = vpop.f32.mrb[35].mxu1  ;;  %v9334_v24 = vpop.f32.mrb[35].mxu0 }
 0x12e   : > { %v8085_v26 = vpop.eup %8084  ;;  %v1177_v30 = vadd.f32 %v9169_v23, %v1176_v22 }
 0x12f   : > { %v8087_v32 = vpop.eup %8086  ;;  %7222 = vmatprep.mubr.msk.f32.mxu0 %vm1408_vm2, %v8085_v26 }
 0x130   : > { %8096 = vtanh.f32 %v1177_v30  ;;  %v7116_v36 = vpop.f32.mrb[36].mxu1  ;;  %7223 = vmatmul.mubr.msk.f32.gmra.mrb[92].mxu0 %vm1408_vm2, %v8087_v32  ;;  %v9339_v38 = vpop.f32.mrb[36].mxu0 }
 0x131   : > { %8098 = vtanh.f32 %v1182_v20  ;;  %v1192_v39 = vadd.f32 %v7116_v36, %v9169_v23  ;;  %v1186_v41 = vpop.f32.mrb[37].mxu1  ;;  %v9342_v45 = vpop.f32.mrb[37].mxu0 }
 0x132   : > { %v8089_v47 = vpop.eup %8088  ;;  %v1187_v49 = vadd.f32 %v9169_v23, %v1186_v41 }
 0x133   : > { %v8091_v51 = vpop.eup %8090  ;;  %7225 = vmatprep.mubr.msk.f32.mxu0 %vm1408_vm2, %v8089_v47 }
 0x134   : > { %8100 = vtanh.f32 %v1187_v49  ;;  %v7119_v53 = vpop.f32.mrb[38].mxu1  ;;  %7226 = vmatmul.mubr.msk.f32.gmra.mrb[94].mxu0 %vm1408_vm2, %v8091_v51  ;;  %v9347_v55 = vpop.f32.mrb[38].mxu0 }
 0x135   : > { %8102 = vtanh.f32 %v1192_v39  ;;  %v1202_v57 = vadd.f32 %v7119_v53, %v9169_v23  ;;  %v1196_v58 = vpop.f32.mrb[39].mxu1  ;;  %v9350_v61 = vpop.f32.mrb[39].mxu0 }
 0x136   : > { %v8093_v0 = vpop.eup %8092  ;;  %v1197_v2 = vadd.f32 %v9169_v23, %v1196_v58 }
 0x137   : > { %v8095_v3 = vpop.eup %8094  ;;  %7228 = vmatprep.mubr.msk.f32.mxu0 %vm1408_vm2, %v8093_v0 }
 0x138   : > { %8104 = vtanh.f32 %v1197_v2  ;;  %v7122_v6 = vpop.f32.mrb[40].mxu1  ;;  %7229 = vmatmul.mubr.msk.f32.gmra.mrb[96].mxu0 %vm1408_vm2, %v8095_v3  ;;  %v9355_v7 = vpop.f32.mrb[40].mxu0 }
 0x139   : > { %8106 = vtanh.f32 %v1202_v57  ;;  %v1212_v11 = vadd.f32 %v7122_v6, %v9169_v23  ;;  %v1206_v13 = vpop.f32.mrb[41].mxu1  ;;  %v9358_v14 = vpop.f32.mrb[41].mxu0 }
 0x13a   : > { %v8097_v16 = vpop.eup %8096  ;;  %v1207_v20 = vadd.f32 %v9169_v23, %v1206_v13 }
 0x13b   : > { %v8099_v22 = vpop.eup %8098  ;;  %7231 = vmatprep.mubr.msk.f32.mxu0 %vm1408_vm2, %v8097_v16 }
 0x13c   : > { %8108 = vtanh.f32 %v1207_v20  ;;  %v7125_v26 = vpop.f32.mrb[42].mxu1  ;;  %7232 = vmatmul.mubr.msk.f32.gmra.mrb[98].mxu0 %vm1408_vm2, %v8099_v22  ;;  %v9363_v30 = vpop.f32.mrb[42].mxu0 }
 0x13d   : > { %8110 = vtanh.f32 %v1212_v11  ;;  %v1222_v32 = vadd.f32 %v7125_v26, %v9169_v23  ;;  %v1216_v36 = vpop.f32.mrb[43].mxu1  ;;  %v9366_v39 = vpop.f32.mrb[43].mxu0 }
 0x13e   : > { %v8101_v41 = vpop.eup %8100  ;;  %v1217_v47 = vadd.f32 %v9169_v23, %v1216_v36 }
 0x13f   : > { %v8103_v49 = vpop.eup %8102  ;;  %7234 = vmatprep.mubr.msk.f32.mxu0 %vm1408_vm2, %v8101_v41 }
 0x140   : > { %8112 = vtanh.f32 %v1217_v47  ;;  %v7128_v51 = vpop.f32.mrb[44].mxu1  ;;  %7235 = vmatmul.mubr.msk.f32.gmra.mrb[100].mxu0 %vm1408_vm2, %v8103_v49  ;;  %v9371_v53 = vpop.f32.mrb[44].mxu0 }
 0x141   : > { %8114 = vtanh.f32 %v1222_v32  ;;  %v1232_v57 = vadd.f32 %v7128_v51, %v9169_v23  ;;  %v1226_v58 = vpop.f32.mrb[45].mxu1  ;;  %v9374_v0 = vpop.f32.mrb[45].mxu0 }
 0x142   : > { %v8105_v2 = vpop.eup %8104  ;;  %v1227_v3 = vadd.f32 %v9169_v23, %v1226_v58 }
 0x143   : > { %v8107_v6 = vpop.eup %8106  ;;  %7237 = vmatprep.mubr.msk.f32.mxu0 %vm1408_vm2, %v8105_v2 }
 0x144   : > { %8116 = vtanh.f32 %v1227_v3  ;;  %v7131_v11 = vpop.f32.mrb[46].mxu1  ;;  %7238 = vmatmul.mubr.msk.f32.gmra.mrb[102].mxu0 %vm1408_vm2, %v8107_v6  ;;  %v9379_v13 = vpop.f32.mrb[46].mxu0 }
 0x145   : > { %8118 = vtanh.f32 %v1232_v57  ;;  %v1242_v16 = vadd.f32 %v7131_v11, %v9169_v23  ;;  %v1236_v20 = vpop.f32.mrb[47].mxu1  ;;  %v9382_v22 = vpop.f32.mrb[47].mxu0 }
 0x146   : > { %v8109_v26 = vpop.eup %8108  ;;  %v1237_v32 = vadd.f32 %v9169_v23, %v1236_v20 }
 0x147   : > { %v8111_v36 = vpop.eup %8110  ;;  %7240 = vmatprep.mubr.msk.f32.mxu0 %vm1408_vm2, %v8109_v26 }
 0x148   : > { %8120 = vtanh.f32 %v1237_v32  ;;  %v7134_v41 = vpop.f32.mrb[48].mxu1  ;;  %7241 = vmatmul.mubr.msk.f32.gmra.mrb[104].mxu0 %vm1408_vm2, %v8111_v36  ;;  %v9387_v47 = vpop.f32.mrb[48].mxu0 }
 0x149   : > { %8122 = vtanh.f32 %v1242_v16  ;;  %v1252_v49 = vadd.f32 %v7134_v41, %v9169_v23  ;;  %v1246_v51 = vpop.f32.mrb[49].mxu1  ;;  %v9390_v57 = vpop.f32.mrb[49].mxu0 }
 0x14a   : > { %v8113_v58 = vpop.eup %8112  ;;  %v1247_v2 = vadd.f32 %v9169_v23, %v1246_v51 }
 0x14b   : > { %v8115_v3 = vpop.eup %8114  ;;  %7243 = vmatprep.mubr.msk.f32.mxu0 %vm1408_vm2, %v8113_v58 }
 0x14c   : > { %8124 = vtanh.f32 %v1247_v2  ;;  %v7137_v6 = vpop.f32.mrb[50].mxu1  ;;  %7244 = vmatmul.mubr.msk.f32.gmra.mrb[106].mxu0 %vm1408_vm2, %v8115_v3  ;;  %v9395_v11 = vpop.f32.mrb[50].mxu0 }
 0x14d   : > { %11086 = vst [vmem:[#allocation2_spill] sm:$0xff] %v9395_v11  ;;  %8126 = vtanh.f32 %v1252_v49  ;;  %v1262_v16 = vadd.f32 %v7137_v6, %v9169_v23  ;;  %v1256_v20 = vpop.f32.mrb[51].mxu1  ;;  %v9398_v26 = vpop.f32.mrb[51].mxu0 }
 0x14e   : > { %11087 = vst [vmem:[#allocation3_spill] sm:$0xff] %v9398_v26  ;;  %v8117_v32 = vpop.eup %8116  ;;  %v1257_v36 = vadd.f32 %v9169_v23, %v1256_v20 }
 0x14f   : > { %v8119_v41 = vpop.eup %8118  ;;  %7246 = vmatprep.mubr.msk.f32.mxu0 %vm1408_vm2, %v8117_v32 }
 0x150   : > { %8128 = vtanh.f32 %v1257_v36  ;;  %v7140_v51 = vpop.f32.mrb[52].mxu1  ;;  %7247 = vmatmul.mubr.msk.f32.gmra.mrb[108].mxu0 %vm1408_vm2, %v8119_v41  ;;  %v9403_v58 = vpop.f32.mrb[52].mxu0 }
 0x151   : > { %11088 = vst [vmem:[#allocation4_spill] sm:$0xff] %v9403_v58  ;;  %8130 = vtanh.f32 %v1262_v16  ;;  %v1272_v49 = vadd.f32 %v7140_v51, %v9169_v23  ;;  %v1266_v2 = vpop.f32.mrb[53].mxu1  ;;  %v9406_v3 = vpop.f32.mrb[53].mxu0 }
 0x152   : > { %11089 = vst [vmem:[#allocation5_spill] sm:$0xff] %v9406_v3  ;;  %v8121_v6 = vpop.eup %8120  ;;  %v1267_v26 = vadd.f32 %v9169_v23, %v1266_v2 }
 0x153   : > { %v8123_v11 = vpop.eup %8122  ;;  %7249 = vmatprep.mubr.msk.f32.mxu0 %vm1408_vm2, %v8121_v6 }
 0x154   : > { %8132 = vtanh.f32 %v1267_v26  ;;  %v7143_v20 = vpop.f32.mrb[54].mxu1  ;;  %7250 = vmatmul.mubr.msk.f32.gmra.mrb[110].mxu0 %vm1408_vm2, %v8123_v11  ;;  %v9411_v32 = vpop.f32.mrb[54].mxu0 }
 0x155   : > { %11090 = vst [vmem:[#allocation6_spill] sm:$0xff] %v9411_v32  ;;  %8134 = vtanh.f32 %v1272_v49  ;;  %v1282_v16 = vadd.f32 %v7143_v20, %v9169_v23  ;;  %v1276_v36 = vpop.f32.mrb[55].mxu1  ;;  %v9414_v41 = vpop.f32.mrb[55].mxu0 }
 0x156   : > { %11091 = vst [vmem:[#allocation7_spill] sm:$0xff] %v9414_v41  ;;  %v8125_v51 = vpop.eup %8124  ;;  %v1277_v3 = vadd.f32 %v9169_v23, %v1276_v36 }
 0x157   : > { %v8127_v58 = vpop.eup %8126  ;;  %7252 = vmatprep.mubr.msk.f32.mxu0 %vm1408_vm2, %v8125_v51 }
 0x158   : > { %8136 = vtanh.f32 %v1277_v3  ;;  %v7146_v2 = vpop.f32.mrb[56].mxu1  ;;  %7253 = vmatmul.mubr.msk.f32.gmra.mrb[112].mxu0 %vm1408_vm2, %v8127_v58  ;;  %v9419_v26 = vpop.f32.mrb[56].mxu0 }
 0x159   : > { %11092 = vst [vmem:[#allocation8_spill] sm:$0xff] %v9419_v26  ;;  %8138 = vtanh.f32 %v1282_v16  ;;  %v1292_v11 = vadd.f32 %v7146_v2, %v9169_v23  ;;  %v1286_v49 = vpop.f32.mrb[57].mxu1  ;;  %v9422_v6 = vpop.f32.mrb[57].mxu0 }
 0x15a   : > { %11093 = vst [vmem:[#allocation9_spill] sm:$0xff] %v9422_v6  ;;  %v8129_v20 = vpop.eup %8128  ;;  %v1287_v41 = vadd.f32 %v9169_v23, %v1286_v49 }
 0x15b   : > { %v8131_v32 = vpop.eup %8130  ;;  %7255 = vmatprep.mubr.msk.f32.mxu0 %vm1408_vm2, %v8129_v20 }
 0x15c   : > { %8140 = vtanh.f32 %v1287_v41  ;;  %v7149_v36 = vpop.f32.mrb[58].mxu1  ;;  %7256 = vmatmul.mubr.msk.f32.gmra.mrb[114].mxu0 %vm1408_vm2, %v8131_v32  ;;  %v9427_v3 = vpop.f32.mrb[58].mxu0 }
 0x15d   : > { %11094 = vst [vmem:[#allocation10_spill] sm:$0xff] %v9427_v3  ;;  %8142 = vtanh.f32 %v1292_v11  ;;  %v1302_v58 = vadd.f32 %v7149_v36, %v9169_v23  ;;  %v1296_v16 = vpop.f32.mrb[59].mxu1  ;;  %v9430_v51 = vpop.f32.mrb[59].mxu0 }
 0x15e   : > { %11095 = vst [vmem:[#allocation11_spill] sm:$0xff] %v9430_v51  ;;  %v8133_v2 = vpop.eup %8132  ;;  %v1297_v6 = vadd.f32 %v9169_v23, %v1296_v16 }
 0x15f   : > { %v8135_v26 = vpop.eup %8134  ;;  %7258 = vmatprep.mubr.msk.f32.mxu0 %vm1408_vm2, %v8133_v2 }
 0x160   : > { %8144 = vtanh.f32 %v1297_v6  ;;  %v7152_v49 = vpop.f32.mrb[60].mxu1  ;;  %7259 = vmatmul.mubr.msk.f32.gmra.mrb[116].mxu0 %vm1408_vm2, %v8135_v26  ;;  %v9435_v41 = vpop.f32.mrb[60].mxu0 }
 0x161   : > { %11096 = vst [vmem:[#allocation12_spill] sm:$0xff] %v9435_v41  ;;  %8146 = vtanh.f32 %v1302_v58  ;;  %v1312_v32 = vadd.f32 %v7152_v49, %v9169_v23  ;;  %v1306_v11 = vpop.f32.mrb[61].mxu1  ;;  %v9438_v20 = vpop.f32.mrb[61].mxu0 }
 0x162   : > { %11097 = vst [vmem:[#allocation13_spill] sm:$0xff] %v9438_v20  ;;  %v8137_v36 = vpop.eup %8136  ;;  %v1307_v51 = vadd.f32 %v9169_v23, %v1306_v11 }
 0x163   : > { %v8139_v3 = vpop.eup %8138  ;;  %7261 = vmatprep.mubr.msk.f32.mxu0 %vm1408_vm2, %v8137_v36 }
 0x164   : > { %8148 = vtanh.f32 %v1307_v51  ;;  %v7155_v16 = vpop.f32.mrb[62].mxu1  ;;  %7262 = vmatmul.mubr.msk.f32.gmra.mrb[118].mxu0 %vm1408_vm2, %v8139_v3  ;;  %v9443_v6 = vpop.f32.mrb[62].mxu0 }
 0x165   : > { %11098 = vst [vmem:[#allocation14_spill] sm:$0xff] %v9443_v6  ;;  %8150 = vtanh.f32 %v1312_v32  ;;  %v1322_v26 = vadd.f32 %v7155_v16, %v9169_v23  ;;  %v1316_v58 = vpop.f32.mrb[63].mxu1  ;;  %v9446_v2 = vpop.f32.mrb[63].mxu0  ;;  %v6078_v6 = vld [vmem:[%s11048_s4 + $0xe0] sm:$0xff] }
 0x166   : > { %11099 = vst [vmem:[#allocation15_spill] sm:$0xff] %v9446_v2  ;;  %v8141_v49 = vpop.eup %8140  ;;  %v1317_v20 = vadd.f32 %v9169_v23, %v1316_v58 }
 0x167   : > { %v8143_v41 = vpop.eup %8142  ;;  %7264 = vmatprep.mubr.msk.f32.mxu0 %vm1408_vm2, %v8141_v49 }
 0x168   : > { %8152 = vtanh.f32 %v1317_v20  ;;  %7265 = vmatmul.mubr.msk.f32.gmra.mrb[120].mxu0 %vm1408_vm2, %v8143_v41  ;;  %v6074_v41 = vld [vmem:[%s11048_s4 + $0xc0] sm:$0xff]  ;;  %v6075_v20 = vld [vmem:[%s11048_s4 + $0xc8] sm:$0xff] }
 0x169   : > { %8154 = vtanh.f32 %v1322_v26  ;;  %v7924_v16 = vpack.c.bf16 %v6075_v20, %v6074_v41  ;;  %v9466_v26 = vld [vmem:[%s11049_s5] ss:$0 sm:$0xff] }
 0x16a   : > { %v8145_v51 = vpop.eup %8144 }
 0x16b   : > { %v8147_v3 = vpop.eup %8146  ;;  %7267 = vmatprep.mubr.msk.f32.mxu0 %vm1408_vm2, %v8145_v51  ;;  %7925 = vmatprep.subr.bf16.mxu0 %v7924_v16 }
 0x16c   : > { %7268 = vmatmul.mubr.msk.f32.gmra.mrb[122].mxu0 %vm1408_vm2, %v8147_v3 }
 0x16d   : > { %7927 = vmatpush3.bf16.msra.mxu0 %v7924_v16 }
 0x16e   : > { %v8149_v32 = vpop.eup %8148 }
 0x16f   : > { %v8151_v11 = vpop.eup %8150  ;;  %7270 = vmatprep.mubr.msk.f32.mxu0 %vm1408_vm2, %v8149_v32 }
 0x170   : > { %7271 = vmatmul.mubr.msk.f32.gmra.mrb[124].mxu0 %vm1408_vm2, %v8151_v11 }
 0x172   : > { %v8153_v23 = vpop.eup %8152 }
 0x173   : > { %v8155_v36 = vpop.eup %8154  ;;  %7273 = vmatprep.mubr.msk.f32.mxu0 %vm1408_vm2, %v8153_v23 }
 0x174   : > { %7274 = vmatmul.mubr.msk.f32.gmra.mrb[126].mxu0 %vm1408_vm2, %v8155_v36 }
 0x1cb   : > { %v7182_v58 = vpop.f32.mrb[64].mxu0 }
 0x1cc   : > { %v1673_v49 = vadd.f32 %v7182_v58, %v9466_v26  ;;  %v1667_v51 = vpop.f32.mrb[65].mxu0  ;;  %v6076_v58 = vld [vmem:[%s11048_s4 + $0xd0] sm:$0xff] }
 0x1cd   : > { %v1668_v3 = vadd.f32 %v9466_v26, %v1667_v51 }
 0x1ce   : > { %8156 = vtanh.f32 %v1673_v49  ;;  %v6077_v49 = vld [vmem:[%s11048_s4 + $0xd8] sm:$0xff] }
 0x1cf   : > { %8158 = vtanh.f32 %v1668_v3  ;;  %v7185_v32 = vpop.f32.mrb[66].mxu0  ;;  %v7928_v51 = vpack.c.bf16 %v6077_v49, %v6076_v58  ;;  %v6081_v49 = vld [vmem:[%s11048_s4 + $0xf8] sm:$0xff] }
 0x1d0   : > { %v1683_v11 = vadd.f32 %v7185_v32, %v9466_v26  ;;  %v1677_v23 = vpop.f32.mrb[67].mxu0 }
 0x1d1   : > { %v1678_v36 = vadd.f32 %v9466_v26, %v1677_v23  ;;  %7929 = vmatprep.subr.bf16.mxu0 %v7928_v51 }
 0x1d2   : > { %8160 = vtanh.f32 %v1683_v11  ;;  %7931 = vmatpush3.bf16.msra.mxu0 %v7928_v51 }
 0x1d3   : > { %8162 = vtanh.f32 %v1678_v36  ;;  %v7188_v41 = vpop.f32.mrb[68].mxu0 }
 0x1d4   : > { %v1693_v20 = vadd.f32 %v7188_v41, %v9466_v26  ;;  %v1687_v16 = vpop.f32.mrb[69].mxu0 }
 0x1d5   : > { %v1688_v2 = vadd.f32 %v9466_v26, %v1687_v16 }
 0x1d6   : > { %8164 = vtanh.f32 %v1693_v20  ;;  %v6080_v20 = vld [vmem:[%s11048_s4 + $0xf0] sm:$0xff] }
 0x1d7   : > { %8166 = vtanh.f32 %v1688_v2  ;;  %v7191_v3 = vpop.f32.mrb[70].mxu0  ;;  %v6079_v2 = vld [vmem:[%s11048_s4 + $0xe8] sm:$0xff] }
 0x1d8   : > { %v8157_v32 = vpop.eup %8156  ;;  %v1703_v11 = vadd.f32 %v7191_v3, %v9466_v26  ;;  %v1697_v23 = vpop.f32.mrb[71].mxu0  ;;  %v7936_v3 = vpack.c.bf16 %v6081_v49, %v6080_v20 }
 0x1d9   : > { %v8159_v36 = vpop.eup %8158  ;;  %v9482_v41 = vadd.f32 %v8157_v32, %v9171_v25  ;;  %v1698_v16 = vadd.f32 %v9466_v26, %v1697_v23  ;;  %v7932_v25 = vpack.c.bf16 %v6079_v2, %v6078_v6  ;;  %v6082_v32 = vld [vmem:[%s11048_s4 + $0x100] sm:$0xff]  ;;  %v6083_v23 = vld [vmem:[%s11048_s4 + $0x108] sm:$0xff] }
 0x1da   : > { %8168 = vtanh.f32 %v1703_v11  ;;  %v9495_v58 = vadd.f32 %v8159_v36, %v9174_v28  ;;  %v7940_v49 = vpack.c.bf16 %v6083_v23, %v6082_v32 }
 0x1db   : > { %11100 = vst [vmem:[#allocation16_spill] sm:$0xff] %v9482_v41  ;;  %8170 = vtanh.f32 %v1698_v16  ;;  %v7194_v51 = vpop.f32.mrb[72].mxu0  ;;  %7933 = vmatprep.subr.bf16.mxu0 %v7932_v25 }
 0x1dc   : > { %11101 = vst [vmem:[#allocation17_spill] sm:$0xff] %v9495_v58  ;;  %v8161_v11 = vpop.eup %8160  ;;  %v1713_v28 = vadd.f32 %v7194_v51, %v9466_v26  ;;  %v1707_v36 = vpop.f32.mrb[73].mxu0  ;;  %7300 = vmatprep.mubr.msk.f32.mxu1 %vm1408_vm2, %v9495_v58  ;;  %7935 = vmatpush3.bf16.msra.mxu0 %v7932_v25  ;;  %v6084_v58 = vld [vmem:[%s11048_s4 + $0x110] sm:$0xff] }
 0x1dd   : > { %v8163_v6 = vpop.eup %8162  ;;  %v1708_v16 = vadd.f32 %v9466_v26, %v1707_v36  ;;  %7301 = vmatmul.mubr.msk.f32.vlgmr.msra.gmra.mrb[64].mxu1 %vm1408_vm2, %v9482_v41  ;;  %v9513_v2 = vadd.f32 %v8161_v11, %v9177_v31  ;;  %7937 = vmatprep.subr.bf16.mxu0 %v7936_v3  ;;  %v6085_v36 = vld [vmem:[%s11048_s4 + $0x118] sm:$0xff] }
 0x1de   : > { %8172 = vtanh.f32 %v1713_v28  ;;  %v9516_v20 = vadd.f32 %v8163_v6, %v9180_v34  ;;  %v7944_v28 = vpack.c.bf16 %v6085_v36, %v6084_v58 }
 0x1df   : > { %8174 = vtanh.f32 %v1708_v16  ;;  %v7197_v51 = vpop.f32.mrb[74].mxu0 }
 0x1e0   : > { %11102 = vst [vmem:[#allocation18_spill] sm:$0xff] %v9516_v20  ;;  %v8165_v41 = vpop.eup %8164  ;;  %v1723_v31 = vadd.f32 %v7197_v51, %v9466_v26  ;;  %v1717_v25 = vpop.f32.mrb[75].mxu0  ;;  %7303 = vmatprep.mubr.msk.f32.mxu1 %vm1408_vm2, %v9516_v20  ;;  %7939 = vmatpush3.bf16.msra.mxu0 %v7936_v3 }
 0x1e1   : > { %v8167_v34 = vpop.eup %8166  ;;  %v1718_v32 = vadd.f32 %v9466_v26, %v1717_v25  ;;  %7304 = vmatmul.mubr.msk.f32.gmra.mrb[66].mxu1 %vm1408_vm2, %v9513_v2  ;;  %v9531_v23 = vadd.f32 %v8165_v41, %v9183_v37  ;;  %7941 = vmatprep.subr.bf16.mxu0 %v7940_v49 }
 0x1e2   : > { %8176 = vtanh.f32 %v1723_v31  ;;  %v9534_v11 = vadd.f32 %v8167_v34, %v9192_v42 }
 0x1e3   : > { %8178 = vtanh.f32 %v1718_v32  ;;  %v7200_v6 = vpop.f32.mrb[76].mxu0 }
 0x1e4   : > { %v8169_v16 = vpop.eup %8168  ;;  %v1733_v51 = vadd.f32 %v7200_v6, %v9466_v26  ;;  %v1727_v20 = vpop.f32.mrb[77].mxu0  ;;  %7306 = vmatprep.mubr.msk.f32.mxu1 %vm1408_vm2, %v9534_v11  ;;  %7943 = vmatpush3.bf16.msra.mxu0 %v7940_v49 }
 0x1e5   : > { %v8171_v25 = vpop.eup %8170  ;;  %v1728_v37 = vadd.f32 %v9466_v26, %v1727_v20  ;;  %7307 = vmatmul.mubr.msk.f32.gmra.mrb[68].mxu1 %vm1408_vm2, %v9531_v23  ;;  %v9543_v42 = vadd.f32 %v8169_v16, %v9195_v46  ;;  %7945 = vmatprep.subr.bf16.mxu0 %v7944_v28 }
 0x1e6   : > { %8180 = vtanh.f32 %v1733_v51  ;;  %v9546_v41 = vadd.f32 %v8171_v25, %v9207_v52 }
 0x1e7   : > { %8182 = vtanh.f32 %v1728_v37  ;;  %v7203_v58 = vpop.f32.mrb[78].mxu0 }
 0x1e8   : > { %v8173_v3 = vpop.eup %8172  ;;  %v1743_v36 = vadd.f32 %v7203_v58, %v9466_v26  ;;  %v1737_v31 = vpop.f32.mrb[79].mxu0  ;;  %7309 = vmatprep.mubr.msk.f32.mxu1 %vm1408_vm2, %v9546_v41  ;;  %7947 = vmatpush3.bf16.msra.mxu0 %v7944_v28 }
 0x1e9   : > { %v8175_v20 = vpop.eup %8174  ;;  %v1738_v34 = vadd.f32 %v9466_v26, %v1737_v31  ;;  %7310 = vmatmul.mubr.msk.f32.gmra.mrb[70].mxu1 %vm1408_vm2, %v9543_v42  ;;  %v9555_v46 = vadd.f32 %v8173_v3, %v9221_v62 }
 0x1ea   : > { %8184 = vtanh.f32 %v1743_v36  ;;  %v9558_v52 = vadd.f32 %v8175_v20, %v9224_v1 }
 0x1eb   : > { %8186 = vtanh.f32 %v1738_v34  ;;  %v7206_v49 = vpop.f32.mrb[80].mxu0 }
 0x1ec   : > { %v8177_v32 = vpop.eup %8176  ;;  %v1753_v6 = vadd.f32 %v7206_v49, %v9466_v26  ;;  %v1747_v16 = vpop.f32.mrb[81].mxu0  ;;  %7312 = vmatprep.mubr.msk.f32.mxu1 %vm1408_vm2, %v9558_v52 }
 0x1ed   : > { %v8179_v51 = vpop.eup %8178  ;;  %v1748_v25 = vadd.f32 %v9466_v26, %v1747_v16  ;;  %7313 = vmatmul.mubr.msk.f32.gmra.mrb[72].mxu1 %vm1408_vm2, %v9555_v46  ;;  %v9567_v62 = vadd.f32 %v8177_v32, %v9235_v9 }
 0x1ee   : > { %8188 = vtanh.f32 %v1753_v6  ;;  %v9570_v1 = vadd.f32 %v8179_v51, %v9238_v12 }
 0x1ef   : > { %8190 = vtanh.f32 %v1748_v25  ;;  %v7209_v28 = vpop.f32.mrb[82].mxu0 }
 0x1f0   : > { %v8181_v37 = vpop.eup %8180  ;;  %v1763_v58 = vadd.f32 %v7209_v28, %v9466_v26  ;;  %v1757_v3 = vpop.f32.mrb[83].mxu0  ;;  %7315 = vmatprep.mubr.msk.f32.mxu1 %vm1408_vm2, %v9570_v1 }
 0x1f1   : > { %v8183_v36 = vpop.eup %8182  ;;  %v1758_v31 = vadd.f32 %v9466_v26, %v1757_v3  ;;  %7316 = vmatmul.mubr.msk.f32.gmra.mrb[74].mxu1 %vm1408_vm2, %v9567_v62  ;;  %v9579_v9 = vadd.f32 %v8181_v37, %v9243_v18 }
 0x1f2   : > { %8192 = vtanh.f32 %v1763_v58  ;;  %v9582_v12 = vadd.f32 %v8183_v36, %v9246_v21 }
 0x1f3   : > { %8194 = vtanh.f32 %v1758_v31  ;;  %v7212_v20 = vpop.f32.mrb[84].mxu0 }
 0x1f4   : > { %v8185_v34 = vpop.eup %8184  ;;  %v1773_v49 = vadd.f32 %v7212_v20, %v9466_v26  ;;  %v1767_v32 = vpop.f32.mrb[85].mxu0  ;;  %7318 = vmatprep.mubr.msk.f32.mxu1 %vm1408_vm2, %v9582_v12 }
 0x1f5   : > { %v8187_v6 = vpop.eup %8186  ;;  %v1768_v16 = vadd.f32 %v9466_v26, %v1767_v32  ;;  %7319 = vmatmul.mubr.msk.f32.gmra.mrb[76].mxu1 %vm1408_vm2, %v9579_v9  ;;  %v9591_v18 = vadd.f32 %v8185_v34, %v9251_v29 }
 0x1f6   : > { %8196 = vtanh.f32 %v1773_v49  ;;  %v9594_v21 = vadd.f32 %v8187_v6, %v9254_v33 }
 0x1f7   : > { %8198 = vtanh.f32 %v1768_v16  ;;  %v7215_v51 = vpop.f32.mrb[86].mxu0 }
 0x1f8   : > { %v8189_v25 = vpop.eup %8188  ;;  %v1783_v28 = vadd.f32 %v7215_v51, %v9466_v26  ;;  %v1777_v37 = vpop.f32.mrb[87].mxu0  ;;  %7321 = vmatprep.mubr.msk.f32.mxu1 %vm1408_vm2, %v9594_v21 }
 0x1f9   : > { %v8191_v58 = vpop.eup %8190  ;;  %v1778_v3 = vadd.f32 %v9466_v26, %v1777_v37  ;;  %7322 = vmatmul.mubr.msk.f32.gmra.mrb[78].mxu1 %vm1408_vm2, %v9591_v18  ;;  %v9603_v29 = vadd.f32 %v8189_v25, %v9259_v40 }
 0x1fa   : > { %8200 = vtanh.f32 %v1783_v28  ;;  %v9606_v33 = vadd.f32 %v8191_v58, %v9262_v44 }
 0x1fb   : > { %8202 = vtanh.f32 %v1778_v3  ;;  %v7218_v36 = vpop.f32.mrb[88].mxu0 }
 0x1fc   : > { %v8193_v31 = vpop.eup %8192  ;;  %v1793_v20 = vadd.f32 %v7218_v36, %v9466_v26  ;;  %v1787_v34 = vpop.f32.mrb[89].mxu0  ;;  %7324 = vmatprep.mubr.msk.f32.mxu1 %vm1408_vm2, %v9606_v33 }
 0x1fd   : > { %v8195_v49 = vpop.eup %8194  ;;  %v1788_v32 = vadd.f32 %v9466_v26, %v1787_v34  ;;  %7325 = vmatmul.mubr.msk.f32.gmra.mrb[80].mxu1 %vm1408_vm2, %v9603_v29  ;;  %v9615_v40 = vadd.f32 %v8193_v31, %v9267_v50 }
 0x1fe   : > { %8204 = vtanh.f32 %v1793_v20  ;;  %v9618_v44 = vadd.f32 %v8195_v49, %v9270_v54 }
 0x1ff   : > { %8206 = vtanh.f32 %v1788_v32  ;;  %v7221_v6 = vpop.f32.mrb[90].mxu0 }
 0x200   : > { %v8197_v16 = vpop.eup %8196  ;;  %v1803_v51 = vadd.f32 %v7221_v6, %v9466_v26  ;;  %v1797_v25 = vpop.f32.mrb[91].mxu0  ;;  %7327 = vmatprep.mubr.msk.f32.mxu1 %vm1408_vm2, %v9618_v44 }
 0x201   : > { %v8199_v28 = vpop.eup %8198  ;;  %v1798_v37 = vadd.f32 %v9466_v26, %v1797_v25  ;;  %7328 = vmatmul.mubr.msk.f32.gmra.mrb[82].mxu1 %vm1408_vm2, %v9615_v40  ;;  %v9627_v50 = vadd.f32 %v8197_v16, %v9275_v59 }
 0x202   : > { %8208 = vtanh.f32 %v1803_v51  ;;  %v9630_v54 = vadd.f32 %v8199_v28, %v9278_v63 }
 0x203   : > { %8210 = vtanh.f32 %v1798_v37  ;;  %v7224_v58 = vpop.f32.mrb[92].mxu0 }
 0x204   : > { %v8201_v3 = vpop.eup %8200  ;;  %v1813_v36 = vadd.f32 %v7224_v58, %v9466_v26  ;;  %v1807_v31 = vpop.f32.mrb[93].mxu0  ;;  %7330 = vmatprep.mubr.msk.f32.mxu1 %vm1408_vm2, %v9630_v54 }
 0x205   : > { %v8203_v20 = vpop.eup %8202  ;;  %v1808_v34 = vadd.f32 %v9466_v26, %v1807_v31  ;;  %7331 = vmatmul.mubr.msk.f32.gmra.mrb[84].mxu1 %vm1408_vm2, %v9627_v50  ;;  %v9639_v59 = vadd.f32 %v8201_v3, %v9283_v5 }
 0x206   : > { %8212 = vtanh.f32 %v1813_v36  ;;  %v9642_v63 = vadd.f32 %v8203_v20, %v9286_v8 }
 0x207   : > { %8214 = vtanh.f32 %v1808_v34  ;;  %v7227_v49 = vpop.f32.mrb[94].mxu0 }
 0x208   : > { %v8205_v32 = vpop.eup %8204  ;;  %v1823_v6 = vadd.f32 %v7227_v49, %v9466_v26  ;;  %v1817_v16 = vpop.f32.mrb[95].mxu0  ;;  %7333 = vmatprep.mubr.msk.f32.mxu1 %vm1408_vm2, %v9642_v63 }
 0x209   : > { %v8207_v51 = vpop.eup %8206  ;;  %v1818_v25 = vadd.f32 %v9466_v26, %v1817_v16  ;;  %7334 = vmatmul.mubr.msk.f32.gmra.mrb[86].mxu1 %vm1408_vm2, %v9639_v59  ;;  %v9651_v5 = vadd.f32 %v8205_v32, %v9291_v15 }
 0x20a   : > { %8216 = vtanh.f32 %v1823_v6  ;;  %v9654_v8 = vadd.f32 %v8207_v51, %v9294_v19 }
 0x20b   : > { %8218 = vtanh.f32 %v1818_v25  ;;  %v7230_v28 = vpop.f32.mrb[96].mxu0 }
 0x20c   : > { %v8209_v37 = vpop.eup %8208  ;;  %v1833_v58 = vadd.f32 %v7230_v28, %v9466_v26  ;;  %v1827_v3 = vpop.f32.mrb[97].mxu0  ;;  %7336 = vmatprep.mubr.msk.f32.mxu1 %vm1408_vm2, %v9654_v8 }
 0x20d   : > { %v8211_v36 = vpop.eup %8210  ;;  %v1828_v31 = vadd.f32 %v9466_v26, %v1827_v3  ;;  %7337 = vmatmul.mubr.msk.f32.gmra.mrb[88].mxu1 %vm1408_vm2, %v9651_v5  ;;  %v9663_v15 = vadd.f32 %v8209_v37, %v9299_v27 }
 0x20e   : > { %8220 = vtanh.f32 %v1833_v58  ;;  %v9666_v19 = vadd.f32 %v8211_v36, %v9302_v35 }
 0x20f   : > { %8222 = vtanh.f32 %v1828_v31  ;;  %v7233_v20 = vpop.f32.mrb[98].mxu0 }
 0x210   : > { %v8213_v34 = vpop.eup %8212  ;;  %v1843_v49 = vadd.f32 %v7233_v20, %v9466_v26  ;;  %v1837_v32 = vpop.f32.mrb[99].mxu0  ;;  %7339 = vmatprep.mubr.msk.f32.mxu1 %vm1408_vm2, %v9666_v19 }
 0x211   : > { %v8215_v6 = vpop.eup %8214  ;;  %v1838_v16 = vadd.f32 %v9466_v26, %v1837_v32  ;;  %7340 = vmatmul.mubr.msk.f32.gmra.mrb[90].mxu1 %vm1408_vm2, %v9663_v15  ;;  %v9675_v27 = vadd.f32 %v8213_v34, %v9307_v43 }
 0x212   : > { %8224 = vtanh.f32 %v1843_v49  ;;  %v9678_v35 = vadd.f32 %v8215_v6, %v9310_v48 }
 0x213   : > { %8226 = vtanh.f32 %v1838_v16  ;;  %v7236_v51 = vpop.f32.mrb[100].mxu0 }
 0x214   : > { %v8217_v25 = vpop.eup %8216  ;;  %v1853_v28 = vadd.f32 %v7236_v51, %v9466_v26  ;;  %v1847_v37 = vpop.f32.mrb[101].mxu0  ;;  %7342 = vmatprep.mubr.msk.f32.mxu1 %vm1408_vm2, %v9678_v35 }
 0x215   : > { %v8219_v58 = vpop.eup %8218  ;;  %v1848_v3 = vadd.f32 %v9466_v26, %v1847_v37  ;;  %7343 = vmatmul.mubr.msk.f32.gmra.mrb[92].mxu1 %vm1408_vm2, %v9675_v27  ;;  %v9687_v43 = vadd.f32 %v8217_v25, %v9315_v56 }
 0x216   : > { %8228 = vtanh.f32 %v1853_v28  ;;  %v9690_v48 = vadd.f32 %v8219_v58, %v9318_v60 }
 0x217   : > { %8230 = vtanh.f32 %v1848_v3  ;;  %v7239_v36 = vpop.f32.mrb[102].mxu0 }
 0x218   : > { %v8221_v31 = vpop.eup %8220  ;;  %v1863_v20 = vadd.f32 %v7239_v36, %v9466_v26  ;;  %v1857_v34 = vpop.f32.mrb[103].mxu0  ;;  %7345 = vmatprep.mubr.msk.f32.mxu1 %vm1408_vm2, %v9690_v48 }
 0x219   : > { %v8223_v49 = vpop.eup %8222  ;;  %v1858_v32 = vadd.f32 %v9466_v26, %v1857_v34  ;;  %7346 = vmatmul.mubr.msk.f32.gmra.mrb[94].mxu1 %vm1408_vm2, %v9687_v43  ;;  %v9699_v56 = vadd.f32 %v8221_v31, %v9323_v4 }
 0x21a   : > { %8232 = vtanh.f32 %v1863_v20  ;;  %v9702_v60 = vadd.f32 %v8223_v49, %v9326_v10 }
 0x21b   : > { %8234 = vtanh.f32 %v1858_v32  ;;  %v7242_v6 = vpop.f32.mrb[104].mxu0 }
 0x21c   : > { %v8225_v16 = vpop.eup %8224  ;;  %v1873_v51 = vadd.f32 %v7242_v6, %v9466_v26  ;;  %v1867_v25 = vpop.f32.mrb[105].mxu0  ;;  %7348 = vmatprep.mubr.msk.f32.mxu1 %vm1408_vm2, %v9702_v60 }
 0x21d   : > { %v8227_v28 = vpop.eup %8226  ;;  %v1868_v37 = vadd.f32 %v9466_v26, %v1867_v25  ;;  %7349 = vmatmul.mubr.msk.f32.gmra.mrb[96].mxu1 %vm1408_vm2, %v9699_v56  ;;  %v9711_v4 = vadd.f32 %v8225_v16, %v9331_v17 }
 0x21e   : > { %8236 = vtanh.f32 %v1873_v51  ;;  %v9714_v10 = vadd.f32 %v8227_v28, %v9334_v24 }
 0x21f   : > { %8238 = vtanh.f32 %v1868_v37  ;;  %v7245_v58 = vpop.f32.mrb[106].mxu0 }
 0x220   : > { %v8229_v3 = vpop.eup %8228  ;;  %v1883_v36 = vadd.f32 %v7245_v58, %v9466_v26  ;;  %v1877_v31 = vpop.f32.mrb[107].mxu0  ;;  %7351 = vmatprep.mubr.msk.f32.mxu1 %vm1408_vm2, %v9714_v10 }
 0x221   : > { %v8231_v20 = vpop.eup %8230  ;;  %v1878_v34 = vadd.f32 %v9466_v26, %v1877_v31  ;;  %7352 = vmatmul.mubr.msk.f32.gmra.mrb[98].mxu1 %vm1408_vm2, %v9711_v4  ;;  %v9723_v17 = vadd.f32 %v8229_v3, %v9339_v38 }
 0x222   : > { %8240 = vtanh.f32 %v1883_v36  ;;  %v9726_v24 = vadd.f32 %v8231_v20, %v9342_v45 }
 0x223   : > { %8242 = vtanh.f32 %v1878_v34  ;;  %v7248_v49 = vpop.f32.mrb[108].mxu0 }
 0x224   : > { %v8233_v32 = vpop.eup %8232  ;;  %v1893_v6 = vadd.f32 %v7248_v49, %v9466_v26  ;;  %v1887_v16 = vpop.f32.mrb[109].mxu0  ;;  %7354 = vmatprep.mubr.msk.f32.mxu1 %vm1408_vm2, %v9726_v24 }
 0x225   : > { %v8235_v51 = vpop.eup %8234  ;;  %v1888_v25 = vadd.f32 %v9466_v26, %v1887_v16  ;;  %7355 = vmatmul.mubr.msk.f32.gmra.mrb[100].mxu1 %vm1408_vm2, %v9723_v17  ;;  %v9735_v38 = vadd.f32 %v8233_v32, %v9347_v55 }
 0x226   : > { %8244 = vtanh.f32 %v1893_v6  ;;  %v9738_v45 = vadd.f32 %v8235_v51, %v9350_v61 }
 0x227   : > { %8246 = vtanh.f32 %v1888_v25  ;;  %v7251_v28 = vpop.f32.mrb[110].mxu0 }
 0x228   : > { %v8237_v37 = vpop.eup %8236  ;;  %v1903_v58 = vadd.f32 %v7251_v28, %v9466_v26  ;;  %v1897_v3 = vpop.f32.mrb[111].mxu0  ;;  %7357 = vmatprep.mubr.msk.f32.mxu1 %vm1408_vm2, %v9738_v45 }
 0x229   : > { %v8239_v36 = vpop.eup %8238  ;;  %v1898_v31 = vadd.f32 %v9466_v26, %v1897_v3  ;;  %7358 = vmatmul.mubr.msk.f32.gmra.mrb[102].mxu1 %vm1408_vm2, %v9735_v38  ;;  %v9747_v55 = vadd.f32 %v8237_v37, %v9355_v7 }
 0x22a   : > { %8248 = vtanh.f32 %v1903_v58  ;;  %v9750_v61 = vadd.f32 %v8239_v36, %v9358_v14 }
 0x22b   : > { %8250 = vtanh.f32 %v1898_v31  ;;  %v7254_v20 = vpop.f32.mrb[112].mxu0 }
 0x22c   : > { %v8241_v34 = vpop.eup %8240  ;;  %v1913_v49 = vadd.f32 %v7254_v20, %v9466_v26  ;;  %v1907_v32 = vpop.f32.mrb[113].mxu0  ;;  %7360 = vmatprep.mubr.msk.f32.mxu1 %vm1408_vm2, %v9750_v61 }
 0x22d   : > { %v8243_v6 = vpop.eup %8242  ;;  %v1908_v16 = vadd.f32 %v9466_v26, %v1907_v32  ;;  %7361 = vmatmul.mubr.msk.f32.gmra.mrb[104].mxu1 %vm1408_vm2, %v9747_v55  ;;  %v9759_v7 = vadd.f32 %v8241_v34, %v9363_v30 }
 0x22e   : > { %8252 = vtanh.f32 %v1913_v49  ;;  %v9762_v14 = vadd.f32 %v8243_v6, %v9366_v39 }
 0x22f   : > { %8254 = vtanh.f32 %v1908_v16  ;;  %v7257_v51 = vpop.f32.mrb[114].mxu0 }
 0x230   : > { %v8245_v25 = vpop.eup %8244  ;;  %v1923_v28 = vadd.f32 %v7257_v51, %v9466_v26  ;;  %v1917_v37 = vpop.f32.mrb[115].mxu0  ;;  %7363 = vmatprep.mubr.msk.f32.mxu1 %vm1408_vm2, %v9762_v14 }
 0x231   : > { %v8247_v58 = vpop.eup %8246  ;;  %v1918_v3 = vadd.f32 %v9466_v26, %v1917_v37  ;;  %7364 = vmatmul.mubr.msk.f32.gmra.mrb[106].mxu1 %vm1408_vm2, %v9759_v7  ;;  %v9771_v30 = vadd.f32 %v8245_v25, %v9371_v53 }
 0x232   : > { %8256 = vtanh.f32 %v1923_v28  ;;  %v9774_v39 = vadd.f32 %v8247_v58, %v9374_v0 }
 0x233   : > { %8258 = vtanh.f32 %v1918_v3  ;;  %v7260_v36 = vpop.f32.mrb[116].mxu0 }
 0x234   : > { %v8249_v31 = vpop.eup %8248  ;;  %v1933_v20 = vadd.f32 %v7260_v36, %v9466_v26  ;;  %v1927_v34 = vpop.f32.mrb[117].mxu0  ;;  %7366 = vmatprep.mubr.msk.f32.mxu1 %vm1408_vm2, %v9774_v39 }
 0x235   : > { %v8251_v49 = vpop.eup %8250  ;;  %v1928_v32 = vadd.f32 %v9466_v26, %v1927_v34  ;;  %7367 = vmatmul.mubr.msk.f32.gmra.mrb[108].mxu1 %vm1408_vm2, %v9771_v30  ;;  %v9783_v53 = vadd.f32 %v8249_v31, %v9379_v13 }
 0x236   : > { %8260 = vtanh.f32 %v1933_v20  ;;  %v9786_v0 = vadd.f32 %v8251_v49, %v9382_v22 }
 0x237   : > { %8262 = vtanh.f32 %v1928_v32  ;;  %v7263_v6 = vpop.f32.mrb[118].mxu0 }
 0x238   : > { %v8253_v16 = vpop.eup %8252  ;;  %v1943_v51 = vadd.f32 %v7263_v6, %v9466_v26  ;;  %v1937_v25 = vpop.f32.mrb[119].mxu0  ;;  %7369 = vmatprep.mubr.msk.f32.mxu1 %vm1408_vm2, %v9786_v0 }
 0x239   : > { %v8255_v28 = vpop.eup %8254  ;;  %v1938_v37 = vadd.f32 %v9466_v26, %v1937_v25  ;;  %7370 = vmatmul.mubr.msk.f32.gmra.mrb[110].mxu1 %vm1408_vm2, %v9783_v53  ;;  %v9795_v13 = vadd.f32 %v8253_v16, %v9387_v47  ;;  %v11103_v47 = vld [vmem:[#allocation2_spill] sm:$0xff] }
 0x23a   : > { %8264 = vtanh.f32 %v1943_v51  ;;  %v9798_v22 = vadd.f32 %v8255_v28, %v9390_v57  ;;  %v11105_v57 = vld [vmem:[#allocation3_spill] sm:$0xff] }
 0x23b   : > { %8266 = vtanh.f32 %v1938_v37  ;;  %v7266_v58 = vpop.f32.mrb[120].mxu0 }
 0x23c   : > { %v8257_v3 = vpop.eup %8256  ;;  %v1953_v36 = vadd.f32 %v7266_v58, %v9466_v26  ;;  %v1947_v31 = vpop.f32.mrb[121].mxu0  ;;  %7372 = vmatprep.mubr.msk.f32.mxu1 %vm1408_vm2, %v9798_v22  ;;  %v11107_v58 = vld [vmem:[#allocation4_spill] sm:$0xff] }
 0x23d   : > { %v8259_v20 = vpop.eup %8258  ;;  %v1948_v34 = vadd.f32 %v9466_v26, %v1947_v31  ;;  %7373 = vmatmul.mubr.msk.f32.gmra.mrb[112].mxu1 %vm1408_vm2, %v9795_v13  ;;  %v9807_v49 = vadd.f32 %v8257_v3, %v11103_v47 }
 0x23e   : > { %8268 = vtanh.f32 %v1953_v36  ;;  %v9810_v32 = vadd.f32 %v8259_v20, %v11105_v57  ;;  %v11109_v36 = vld [vmem:[#allocation5_spill] sm:$0xff] }
 0x23f   : > { %11104 = vst [vmem:[#allocation2_spill] sm:$0xff] %v9807_v49  ;;  %8270 = vtanh.f32 %v1948_v34  ;;  %v7269_v6 = vpop.f32.mrb[122].mxu0 }
 0x240   : > { %11106 = vst [vmem:[#allocation3_spill] sm:$0xff] %v9810_v32  ;;  %v8261_v16 = vpop.eup %8260  ;;  %v1963_v51 = vadd.f32 %v7269_v6, %v9466_v26  ;;  %v1957_v25 = vpop.f32.mrb[123].mxu0  ;;  %7375 = vmatprep.mubr.msk.f32.mxu1 %vm1408_vm2, %v9810_v32 }
 0x241   : > { %v8263_v28 = vpop.eup %8262  ;;  %v1958_v37 = vadd.f32 %v9466_v26, %v1957_v25  ;;  %7376 = vmatmul.mubr.msk.f32.gmra.mrb[114].mxu1 %vm1408_vm2, %v9807_v49  ;;  %v9819_v3 = vadd.f32 %v8261_v16, %v11107_v58  ;;  %v11111_v16 = vld [vmem:[#allocation6_spill] sm:$0xff] }
 0x242   : > { %8272 = vtanh.f32 %v1963_v51  ;;  %v9822_v31 = vadd.f32 %v8263_v28, %v11109_v36  ;;  %v11113_v28 = vld [vmem:[#allocation7_spill] sm:$0xff] }
 0x243   : > { %11108 = vst [vmem:[#allocation4_spill] sm:$0xff] %v9819_v3  ;;  %8274 = vtanh.f32 %v1958_v37  ;;  %v7272_v20 = vpop.f32.mrb[124].mxu0 }
 0x244   : > { %11110 = vst [vmem:[#allocation5_spill] sm:$0xff] %v9822_v31  ;;  %v8265_v34 = vpop.eup %8264  ;;  %v1973_v47 = vadd.f32 %v7272_v20, %v9466_v26  ;;  %v1967_v57 = vpop.f32.mrb[125].mxu0  ;;  %7378 = vmatprep.mubr.msk.f32.mxu1 %vm1408_vm2, %v9822_v31 }
 0x245   : > { %v8267_v6 = vpop.eup %8266  ;;  %v1968_v25 = vadd.f32 %v9466_v26, %v1967_v57  ;;  %7379 = vmatmul.mubr.msk.f32.gmra.mrb[116].mxu1 %vm1408_vm2, %v9819_v3  ;;  %v9831_v51 = vadd.f32 %v8265_v34, %v11111_v16  ;;  %v11115_v34 = vld [vmem:[#allocation8_spill] sm:$0xff] }
 0x246   : > { %8276 = vtanh.f32 %v1973_v47  ;;  %v9834_v37 = vadd.f32 %v8267_v6, %v11113_v28  ;;  %v11117_v6 = vld [vmem:[#allocation9_spill] sm:$0xff]  ;;  %v6162_v3 = vld [vmem:[%s11048_s4 + $0x170] sm:$0xff] }
 0x247   : > { %11112 = vst [vmem:[#allocation6_spill] sm:$0xff] %v9831_v51  ;;  %8278 = vtanh.f32 %v1968_v25  ;;  %v7275_v58 = vpop.f32.mrb[126].mxu0 }
 0x248   : > { %11114 = vst [vmem:[#allocation7_spill] sm:$0xff] %v9834_v37  ;;  %v8269_v36 = vpop.eup %8268  ;;  %v1983_v20 = vadd.f32 %v7275_v58, %v9466_v26  ;;  %v1977_v49 = vpop.f32.mrb[127].mxu0  ;;  %7381 = vmatprep.mubr.msk.f32.mxu1 %vm1408_vm2, %v9834_v37  ;;  %v11121_v58 = vld [vmem:[#allocation11_spill] sm:$0xff] }
 0x249   : > { %v8271_v57 = vpop.eup %8270  ;;  %v1978_v31 = vadd.f32 %v9466_v26, %v1977_v49  ;;  %7382 = vmatmul.mubr.msk.f32.gmra.mrb[118].mxu1 %vm1408_vm2, %v9831_v51  ;;  %v9843_v47 = vadd.f32 %v8269_v36, %v11115_v34  ;;  %v11119_v26 = vld [vmem:[#allocation10_spill] sm:$0xff]  ;;  %v11125_v34 = vld [vmem:[#allocation13_spill] sm:$0xff] }
 0x24a   : > { %8280 = vtanh.f32 %v1983_v20  ;;  %v9846_v25 = vadd.f32 %v8271_v57, %v11117_v6 }
 0x24b   : > { %11116 = vst [vmem:[#allocation8_spill] sm:$0xff] %v9843_v47  ;;  %8282 = vtanh.f32 %v1978_v31  ;;  %v11123_v31 = vld [vmem:[#allocation12_spill] sm:$0xff] }
 0x24c   : > { %11118 = vst [vmem:[#allocation9_spill] sm:$0xff] %v9846_v25  ;;  %v8273_v16 = vpop.eup %8272  ;;  %7384 = vmatprep.mubr.msk.f32.mxu1 %vm1408_vm2, %v9846_v25  ;;  %v6160_v25 = vld [vmem:[%s11048_s4 + $0x160] sm:$0xff] }
 0x24d   : > { %v8275_v28 = vpop.eup %8274  ;;  %7385 = vmatmul.mubr.msk.f32.gmra.mrb[120].mxu1 %vm1408_vm2, %v9843_v47  ;;  %v9853_v49 = vadd.f32 %v8273_v16, %v11119_v26 }
 0x24e   : > { %v9856_v51 = vadd.f32 %v8275_v28, %v11121_v58  ;;  %v11127_v28 = vld [vmem:[#allocation14_spill] sm:$0xff]  ;;  %v11129_v58 = vld [vmem:[#allocation15_spill] sm:$0xff] }
 0x24f   : > { %11120 = vst [vmem:[#allocation10_spill] sm:$0xff] %v9853_v49 }
 0x250   : > { %11122 = vst [vmem:[#allocation11_spill] sm:$0xff] %v9856_v51  ;;  %v8277_v36 = vpop.eup %8276  ;;  %7387 = vmatprep.mubr.msk.f32.mxu1 %vm1408_vm2, %v9856_v51 }
 0x251   : > { %v8279_v20 = vpop.eup %8278  ;;  %7388 = vmatmul.mubr.msk.f32.gmra.mrb[122].mxu1 %vm1408_vm2, %v9853_v49  ;;  %v9863_v57 = vadd.f32 %v8277_v36, %v11123_v31  ;;  %v6152_v36 = vld [vmem:[%s11048_s4 + $0x120] sm:$0xff] }
 0x252   : > { %v9866_v6 = vadd.f32 %v8279_v20, %v11125_v34  ;;  %v6153_v20 = vld [vmem:[%s11048_s4 + $0x128] sm:$0xff] }
 0x253   : > { %11124 = vst [vmem:[#allocation12_spill] sm:$0xff] %v9863_v57  ;;  %v7948_v31 = vpack.c.bf16 %v6153_v20, %v6152_v36 }
 0x254   : > { %11126 = vst [vmem:[#allocation13_spill] sm:$0xff] %v9866_v6  ;;  %v8281_v47 = vpop.eup %8280  ;;  %7390 = vmatprep.mubr.msk.f32.mxu1 %vm1408_vm2, %v9866_v6  ;;  %v6157_v6 = vld [vmem:[%s11048_s4 + $0x148] sm:$0xff] }
 0x255   : > { %v8283_v16 = vpop.eup %8282  ;;  %7391 = vmatmul.mubr.msk.f32.gmra.mrb[124].mxu1 %vm1408_vm2, %v9863_v57  ;;  %v9873_v26 = vadd.f32 %v8281_v47, %v11127_v28  ;;  %7949 = vmatprep.subr.bf16.mxu1 %v7948_v31  ;;  %v9891_v47 = vld [vmem:[%s11049_s5 + $0x1] ss:$0 sm:$0xff] }
 0x256   : > { %v9876_v51 = vadd.f32 %v8283_v16, %v11129_v58  ;;  %7951 = vmatpush3.bf16.msra.mxu1 %v7948_v31  ;;  %v6154_v31 = vld [vmem:[%s11048_s4 + $0x130] sm:$0xff] }
 0x257   : > { %11128 = vst [vmem:[#allocation14_spill] sm:$0xff] %v9873_v26 }
 0x258   : > { %11130 = vst [vmem:[#allocation15_spill] sm:$0xff] %v9876_v51  ;;  %7393 = vmatprep.mubr.msk.f32.mxu1 %vm1408_vm2, %v9876_v51 }
 0x259   : > { %7394 = vmatmul.mubr.msk.f32.gmra.mrb[126].mxu1 %vm1408_vm2, %v9873_v26 }
 0x2b0   : > { %v7302_v34 = vpop.f32.mrb[64].mxu1 }
 0x2b1   : > { %v2399_v16 = vadd.f32 %v7302_v34, %v9891_v47  ;;  %v2393_v28 = vpop.f32.mrb[65].mxu1  ;;  %v6155_v34 = vld [vmem:[%s11048_s4 + $0x138] sm:$0xff] }
 0x2b2   : > { %v2394_v58 = vadd.f32 %v9891_v47, %v2393_v28 }
 0x2b4   : > { %8284 = vtanh.f32 %v2394_v58  ;;  %v7305_v26 = vpop.f32.mrb[66].mxu1 }
 0x2b5   : > { %8286 = vtanh.f32 %v2399_v16  ;;  %v2409_v51 = vadd.f32 %v7305_v26, %v9891_v47  ;;  %v2403_v57 = vpop.f32.mrb[67].mxu1  ;;  %v7952_v16 = vpack.c.bf16 %v6155_v34, %v6154_v31 }
 0x2b6   : > { %v2404_v36 = vadd.f32 %v9891_v47, %v2403_v57 }
 0x2b7   : > { %7953 = vmatprep.subr.bf16.mxu1 %v7952_v16 }
 0x2b8   : > { %8288 = vtanh.f32 %v2404_v36  ;;  %v7308_v20 = vpop.f32.mrb[68].mxu1  ;;  %7955 = vmatpush3.bf16.msra.mxu1 %v7952_v16  ;;  %v6156_v36 = vld [vmem:[%s11048_s4 + $0x140] sm:$0xff] }
 0x2b9   : > { %8290 = vtanh.f32 %v2409_v51  ;;  %v2419_v28 = vadd.f32 %v7308_v20, %v9891_v47  ;;  %v2413_v58 = vpop.f32.mrb[69].mxu1  ;;  %v6158_v51 = vld [vmem:[%s11048_s4 + $0x150] sm:$0xff]  ;;  %v7956_v34 = vpack.c.bf16 %v6157_v6, %v6156_v36 }
 0x2ba   : > { %v2414_v26 = vadd.f32 %v9891_v47, %v2413_v58  ;;  %v6159_v58 = vld [vmem:[%s11048_s4 + $0x158] sm:$0xff] }
 0x2bb   : > { %v7960_v49 = vpack.c.bf16 %v6159_v58, %v6158_v51  ;;  %7957 = vmatprep.subr.bf16.mxu1 %v7956_v34 }
 0x2bc   : > { %8292 = vtanh.f32 %v2414_v26  ;;  %v7311_v57 = vpop.f32.mrb[70].mxu1  ;;  %7959 = vmatpush3.bf16.msra.mxu1 %v7956_v34 }
 0x2bd   : > { %8294 = vtanh.f32 %v2419_v28  ;;  %v2429_v20 = vadd.f32 %v7311_v57, %v9891_v47  ;;  %v2423_v31 = vpop.f32.mrb[71].mxu1  ;;  %v6161_v28 = vld [vmem:[%s11048_s4 + $0x168] sm:$0xff]  ;;  %7961 = vmatprep.subr.bf16.mxu1 %v7960_v49 }
 0x2be   : > { %v8285_v16 = vpop.eup %8284  ;;  %v2424_v26 = vadd.f32 %v9891_v47, %v2423_v31  ;;  %v7964_v51 = vpack.c.bf16 %v6161_v28, %v6160_v25 }
 0x2bf   : > { %v8287_v37 = vpop.eup %8286  ;;  %7420 = vmatprep.mubr.msk.f32.mxu0 %vm1408_vm2, %v8285_v16  ;;  %v6163_v16 = vld [vmem:[%s11048_s4 + $0x178] sm:$0xff] }
 0x2c0   : > { %8296 = vtanh.f32 %v2424_v26  ;;  %v7314_v6 = vpop.f32.mrb[72].mxu1  ;;  %7421 = vmatmul.mubr.msk.f32.vlgmr.msra.gmra.mrb[128].mxu0 %vm1408_vm2, %v8287_v37  ;;  %7963 = vmatpush3.bf16.msra.mxu1 %v7960_v49  ;;  %v7968_v34 = vpack.c.bf16 %v6163_v16, %v6162_v3 }
 0x2c1   : > { %8298 = vtanh.f32 %v2429_v20  ;;  %v2439_v57 = vadd.f32 %v7314_v6, %v9891_v47  ;;  %v2433_v36 = vpop.f32.mrb[73].mxu1  ;;  %7965 = vmatprep.subr.bf16.mxu1 %v7964_v51 }
 0x2c2   : > { %v8289_v31 = vpop.eup %8288  ;;  %v2434_v58 = vadd.f32 %v9891_v47, %v2433_v36 }
 0x2c3   : > { %v8291_v26 = vpop.eup %8290  ;;  %7423 = vmatprep.mubr.msk.f32.mxu0 %vm1408_vm2, %v8289_v31 }
 0x2c4   : > { %8300 = vtanh.f32 %v2434_v58  ;;  %v7317_v37 = vpop.f32.mrb[74].mxu1  ;;  %7424 = vmatmul.mubr.msk.f32.gmra.mrb[130].mxu0 %vm1408_vm2, %v8291_v26  ;;  %7967 = vmatpush3.bf16.msra.mxu1 %v7964_v51 }
 0x2c5   : > { %8302 = vtanh.f32 %v2439_v57  ;;  %v2449_v25 = vadd.f32 %v7317_v37, %v9891_v47  ;;  %v2443_v20 = vpop.f32.mrb[75].mxu1  ;;  %7969 = vmatprep.subr.bf16.mxu1 %v7968_v34 }
 0x2c6   : > { %v8293_v28 = vpop.eup %8292  ;;  %v2444_v6 = vadd.f32 %v9891_v47, %v2443_v20 }
 0x2c7   : > { %v8295_v36 = vpop.eup %8294  ;;  %7426 = vmatprep.mubr.msk.f32.mxu0 %vm1408_vm2, %v8293_v28 }
 0x2c8   : > { %8304 = vtanh.f32 %v2444_v6  ;;  %v7320_v32 = vpop.f32.mrb[76].mxu1  ;;  %7427 = vmatmul.mubr.msk.f32.gmra.mrb[132].mxu0 %vm1408_vm2, %v8295_v36  ;;  %7971 = vmatpush3.bf16.msra.mxu1 %v7968_v34 }
 0x2c9   : > { %8306 = vtanh.f32 %v2449_v25  ;;  %v2459_v49 = vadd.f32 %v7320_v32, %v9891_v47  ;;  %v2453_v57 = vpop.f32.mrb[77].mxu1 }
 0x2ca   : > { %v8297_v31 = vpop.eup %8296  ;;  %v2454_v58 = vadd.f32 %v9891_v47, %v2453_v57 }
 0x2cb   : > { %v8299_v3 = vpop.eup %8298  ;;  %7429 = vmatprep.mubr.msk.f32.mxu0 %vm1408_vm2, %v8297_v31 }
 0x2cc   : > { %8308 = vtanh.f32 %v2454_v58  ;;  %v7323_v16 = vpop.f32.mrb[78].mxu1  ;;  %7430 = vmatmul.mubr.msk.f32.gmra.mrb[134].mxu0 %vm1408_vm2, %v8299_v3 }
 0x2cd   : > { %8310 = vtanh.f32 %v2459_v49  ;;  %v2469_v26 = vadd.f32 %v7323_v16, %v9891_v47  ;;  %v2463_v51 = vpop.f32.mrb[79].mxu1 }
 0x2ce   : > { %v8301_v37 = vpop.eup %8300  ;;  %v2464_v32 = vadd.f32 %v9891_v47, %v2463_v51 }
 0x2cf   : > { %v8303_v25 = vpop.eup %8302  ;;  %7432 = vmatprep.mubr.msk.f32.mxu0 %vm1408_vm2, %v8301_v37 }
 0x2d0   : > { %8312 = vtanh.f32 %v2464_v32  ;;  %v7326_v20 = vpop.f32.mrb[80].mxu1  ;;  %7433 = vmatmul.mubr.msk.f32.gmra.mrb[136].mxu0 %vm1408_vm2, %v8303_v25 }
 0x2d1   : > { %8314 = vtanh.f32 %v2469_v26  ;;  %v2479_v28 = vadd.f32 %v7326_v20, %v9891_v47  ;;  %v2473_v6 = vpop.f32.mrb[81].mxu1 }
 0x2d2   : > { %v8305_v36 = vpop.eup %8304  ;;  %v2474_v34 = vadd.f32 %v9891_v47, %v2473_v6 }
 0x2d3   : > { %v8307_v49 = vpop.eup %8306  ;;  %7435 = vmatprep.mubr.msk.f32.mxu0 %vm1408_vm2, %v8305_v36 }
 0x2d4   : > { %8316 = vtanh.f32 %v2474_v34  ;;  %v7329_v57 = vpop.f32.mrb[82].mxu1  ;;  %7436 = vmatmul.mubr.msk.f32.gmra.mrb[138].mxu0 %vm1408_vm2, %v8307_v49 }
 0x2d5   : > { %8318 = vtanh.f32 %v2479_v28  ;;  %v2489_v31 = vadd.f32 %v7329_v57, %v9891_v47  ;;  %v2483_v58 = vpop.f32.mrb[83].mxu1 }
 0x2d6   : > { %v8309_v3 = vpop.eup %8308  ;;  %v2484_v16 = vadd.f32 %v9891_v47, %v2483_v58 }
 0x2d7   : > { %v8311_v26 = vpop.eup %8310  ;;  %7438 = vmatprep.mubr.msk.f32.mxu0 %vm1408_vm2, %v8309_v3 }
 0x2d8   : > { %8320 = vtanh.f32 %v2484_v16  ;;  %v7332_v51 = vpop.f32.mrb[84].mxu1  ;;  %7439 = vmatmul.mubr.msk.f32.gmra.mrb[140].mxu0 %vm1408_vm2, %v8311_v26 }
 0x2d9   : > { %8322 = vtanh.f32 %v2489_v31  ;;  %v2499_v37 = vadd.f32 %v7332_v51, %v9891_v47  ;;  %v2493_v32 = vpop.f32.mrb[85].mxu1 }
 0x2da   : > { %v8313_v25 = vpop.eup %8312  ;;  %v2494_v20 = vadd.f32 %v9891_v47, %v2493_v32 }
 0x2db   : > { %v8315_v28 = vpop.eup %8314  ;;  %7441 = vmatprep.mubr.msk.f32.mxu0 %vm1408_vm2, %v8313_v25 }
 0x2dc   : > { %8324 = vtanh.f32 %v2494_v20  ;;  %v7335_v6 = vpop.f32.mrb[86].mxu1  ;;  %7442 = vmatmul.mubr.msk.f32.gmra.mrb[142].mxu0 %vm1408_vm2, %v8315_v28 }
 0x2dd   : > { %8326 = vtanh.f32 %v2499_v37  ;;  %v2509_v36 = vadd.f32 %v7335_v6, %v9891_v47  ;;  %v2503_v34 = vpop.f32.mrb[87].mxu1 }
 0x2de   : > { %v8317_v49 = vpop.eup %8316  ;;  %v2504_v57 = vadd.f32 %v9891_v47, %v2503_v34 }
 0x2df   : > { %v8319_v31 = vpop.eup %8318  ;;  %7444 = vmatprep.mubr.msk.f32.mxu0 %vm1408_vm2, %v8317_v49 }
 0x2e0   : > { %8328 = vtanh.f32 %v2504_v57  ;;  %v7338_v58 = vpop.f32.mrb[88].mxu1  ;;  %7445 = vmatmul.mubr.msk.f32.gmra.mrb[144].mxu0 %vm1408_vm2, %v8319_v31 }
 0x2e1   : > { %8330 = vtanh.f32 %v2509_v36  ;;  %v2519_v3 = vadd.f32 %v7338_v58, %v9891_v47  ;;  %v2513_v16 = vpop.f32.mrb[89].mxu1 }
 0x2e2   : > { %v8321_v26 = vpop.eup %8320  ;;  %v2514_v51 = vadd.f32 %v9891_v47, %v2513_v16 }
 0x2e3   : > { %v8323_v37 = vpop.eup %8322  ;;  %7447 = vmatprep.mubr.msk.f32.mxu0 %vm1408_vm2, %v8321_v26 }
 0x2e4   : > { %8332 = vtanh.f32 %v2514_v51  ;;  %v7341_v32 = vpop.f32.mrb[90].mxu1  ;;  %7448 = vmatmul.mubr.msk.f32.gmra.mrb[146].mxu0 %vm1408_vm2, %v8323_v37 }
 0x2e5   : > { %8334 = vtanh.f32 %v2519_v3  ;;  %v2529_v25 = vadd.f32 %v7341_v32, %v9891_v47  ;;  %v2523_v20 = vpop.f32.mrb[91].mxu1 }
 0x2e6   : > { %v8325_v28 = vpop.eup %8324  ;;  %v2524_v6 = vadd.f32 %v9891_v47, %v2523_v20 }
 0x2e7   : > { %v8327_v36 = vpop.eup %8326  ;;  %7450 = vmatprep.mubr.msk.f32.mxu0 %vm1408_vm2, %v8325_v28 }
 0x2e8   : > { %8336 = vtanh.f32 %v2524_v6  ;;  %v7344_v34 = vpop.f32.mrb[92].mxu1  ;;  %7451 = vmatmul.mubr.msk.f32.gmra.mrb[148].mxu0 %vm1408_vm2, %v8327_v36 }
 0x2e9   : > { %8338 = vtanh.f32 %v2529_v25  ;;  %v2539_v49 = vadd.f32 %v7344_v34, %v9891_v47  ;;  %v2533_v57 = vpop.f32.mrb[93].mxu1 }
 0x2ea   : > { %v8329_v31 = vpop.eup %8328  ;;  %v2534_v58 = vadd.f32 %v9891_v47, %v2533_v57 }
 0x2eb   : > { %v8331_v3 = vpop.eup %8330  ;;  %7453 = vmatprep.mubr.msk.f32.mxu0 %vm1408_vm2, %v8329_v31 }
 0x2ec   : > { %8340 = vtanh.f32 %v2534_v58  ;;  %v7347_v16 = vpop.f32.mrb[94].mxu1  ;;  %7454 = vmatmul.mubr.msk.f32.gmra.mrb[150].mxu0 %vm1408_vm2, %v8331_v3 }
 0x2ed   : > { %8342 = vtanh.f32 %v2539_v49  ;;  %v2549_v26 = vadd.f32 %v7347_v16, %v9891_v47  ;;  %v2543_v51 = vpop.f32.mrb[95].mxu1 }
 0x2ee   : > { %v8333_v37 = vpop.eup %8332  ;;  %v2544_v32 = vadd.f32 %v9891_v47, %v2543_v51 }
 0x2ef   : > { %v8335_v25 = vpop.eup %8334  ;;  %7456 = vmatprep.mubr.msk.f32.mxu0 %vm1408_vm2, %v8333_v37 }
 0x2f0   : > { %8344 = vtanh.f32 %v2544_v32  ;;  %v7350_v20 = vpop.f32.mrb[96].mxu1  ;;  %7457 = vmatmul.mubr.msk.f32.gmra.mrb[152].mxu0 %vm1408_vm2, %v8335_v25 }
 0x2f1   : > { %8346 = vtanh.f32 %v2549_v26  ;;  %v2559_v28 = vadd.f32 %v7350_v20, %v9891_v47  ;;  %v2553_v6 = vpop.f32.mrb[97].mxu1 }
 0x2f2   : > { %v8337_v36 = vpop.eup %8336  ;;  %v2554_v34 = vadd.f32 %v9891_v47, %v2553_v6 }
 0x2f3   : > { %v8339_v49 = vpop.eup %8338  ;;  %7459 = vmatprep.mubr.msk.f32.mxu0 %vm1408_vm2, %v8337_v36 }
 0x2f4   : > { %8348 = vtanh.f32 %v2554_v34  ;;  %v7353_v57 = vpop.f32.mrb[98].mxu1  ;;  %7460 = vmatmul.mubr.msk.f32.gmra.mrb[154].mxu0 %vm1408_vm2, %v8339_v49 }
 0x2f5   : > { %8350 = vtanh.f32 %v2559_v28  ;;  %v2569_v31 = vadd.f32 %v7353_v57, %v9891_v47  ;;  %v2563_v58 = vpop.f32.mrb[99].mxu1 }
 0x2f6   : > { %v8341_v3 = vpop.eup %8340  ;;  %v2564_v16 = vadd.f32 %v9891_v47, %v2563_v58 }
 0x2f7   : > { %v8343_v26 = vpop.eup %8342  ;;  %7462 = vmatprep.mubr.msk.f32.mxu0 %vm1408_vm2, %v8341_v3 }
 0x2f8   : > { %8352 = vtanh.f32 %v2564_v16  ;;  %v7356_v51 = vpop.f32.mrb[100].mxu1  ;;  %7463 = vmatmul.mubr.msk.f32.gmra.mrb[156].mxu0 %vm1408_vm2, %v8343_v26 }
 0x2f9   : > { %8354 = vtanh.f32 %v2569_v31  ;;  %v2579_v37 = vadd.f32 %v7356_v51, %v9891_v47  ;;  %v2573_v32 = vpop.f32.mrb[101].mxu1 }
 0x2fa   : > { %v8345_v25 = vpop.eup %8344  ;;  %v2574_v20 = vadd.f32 %v9891_v47, %v2573_v32 }
 0x2fb   : > { %v8347_v28 = vpop.eup %8346  ;;  %7465 = vmatprep.mubr.msk.f32.mxu0 %vm1408_vm2, %v8345_v25 }
 0x2fc   : > { %8356 = vtanh.f32 %v2574_v20  ;;  %v7359_v6 = vpop.f32.mrb[102].mxu1  ;;  %7466 = vmatmul.mubr.msk.f32.gmra.mrb[158].mxu0 %vm1408_vm2, %v8347_v28 }
 0x2fd   : > { %8358 = vtanh.f32 %v2579_v37  ;;  %v2589_v36 = vadd.f32 %v7359_v6, %v9891_v47  ;;  %v2583_v34 = vpop.f32.mrb[103].mxu1 }
 0x2fe   : > { %v8349_v49 = vpop.eup %8348  ;;  %v2584_v57 = vadd.f32 %v9891_v47, %v2583_v34 }
 0x2ff   : > { %v8351_v31 = vpop.eup %8350  ;;  %7468 = vmatprep.mubr.msk.f32.mxu0 %vm1408_vm2, %v8349_v49 }
 0x300   : > { %8360 = vtanh.f32 %v2584_v57  ;;  %v7362_v58 = vpop.f32.mrb[104].mxu1  ;;  %7469 = vmatmul.mubr.msk.f32.gmra.mrb[160].mxu0 %vm1408_vm2, %v8351_v31 }
 0x301   : > { %8362 = vtanh.f32 %v2589_v36  ;;  %v2599_v3 = vadd.f32 %v7362_v58, %v9891_v47  ;;  %v2593_v16 = vpop.f32.mrb[105].mxu1 }
 0x302   : > { %v8353_v26 = vpop.eup %8352  ;;  %v2594_v51 = vadd.f32 %v9891_v47, %v2593_v16 }
 0x303   : > { %v8355_v37 = vpop.eup %8354  ;;  %7471 = vmatprep.mubr.msk.f32.mxu0 %vm1408_vm2, %v8353_v26 }
 0x304   : > { %8364 = vtanh.f32 %v2594_v51  ;;  %v7365_v32 = vpop.f32.mrb[106].mxu1  ;;  %7472 = vmatmul.mubr.msk.f32.gmra.mrb[162].mxu0 %vm1408_vm2, %v8355_v37 }
 0x305   : > { %8366 = vtanh.f32 %v2599_v3  ;;  %v2609_v25 = vadd.f32 %v7365_v32, %v9891_v47  ;;  %v2603_v20 = vpop.f32.mrb[107].mxu1 }
 0x306   : > { %v8357_v28 = vpop.eup %8356  ;;  %v2604_v6 = vadd.f32 %v9891_v47, %v2603_v20 }
 0x307   : > { %v8359_v36 = vpop.eup %8358  ;;  %7474 = vmatprep.mubr.msk.f32.mxu0 %vm1408_vm2, %v8357_v28 }
 0x308   : > { %8368 = vtanh.f32 %v2604_v6  ;;  %v7368_v34 = vpop.f32.mrb[108].mxu1  ;;  %7475 = vmatmul.mubr.msk.f32.gmra.mrb[164].mxu0 %vm1408_vm2, %v8359_v36 }
 0x309   : > { %8370 = vtanh.f32 %v2609_v25  ;;  %v2619_v49 = vadd.f32 %v7368_v34, %v9891_v47  ;;  %v2613_v57 = vpop.f32.mrb[109].mxu1 }
 0x30a   : > { %v8361_v31 = vpop.eup %8360  ;;  %v2614_v58 = vadd.f32 %v9891_v47, %v2613_v57 }
 0x30b   : > { %v8363_v3 = vpop.eup %8362  ;;  %7477 = vmatprep.mubr.msk.f32.mxu0 %vm1408_vm2, %v8361_v31 }
 0x30c   : > { %8372 = vtanh.f32 %v2614_v58  ;;  %v7371_v16 = vpop.f32.mrb[110].mxu1  ;;  %7478 = vmatmul.mubr.msk.f32.gmra.mrb[166].mxu0 %vm1408_vm2, %v8363_v3 }
 0x30d   : > { %8374 = vtanh.f32 %v2619_v49  ;;  %v2629_v26 = vadd.f32 %v7371_v16, %v9891_v47  ;;  %v2623_v51 = vpop.f32.mrb[111].mxu1 }
 0x30e   : > { %v8365_v37 = vpop.eup %8364  ;;  %v2624_v32 = vadd.f32 %v9891_v47, %v2623_v51 }
 0x30f   : > { %v8367_v25 = vpop.eup %8366  ;;  %7480 = vmatprep.mubr.msk.f32.mxu0 %vm1408_vm2, %v8365_v37 }
 0x310   : > { %8376 = vtanh.f32 %v2624_v32  ;;  %v7374_v20 = vpop.f32.mrb[112].mxu1  ;;  %7481 = vmatmul.mubr.msk.f32.gmra.mrb[168].mxu0 %vm1408_vm2, %v8367_v25 }
 0x311   : > { %8378 = vtanh.f32 %v2629_v26  ;;  %v2639_v28 = vadd.f32 %v7374_v20, %v9891_v47  ;;  %v2633_v6 = vpop.f32.mrb[113].mxu1 }
 0x312   : > { %v8369_v36 = vpop.eup %8368  ;;  %v2634_v34 = vadd.f32 %v9891_v47, %v2633_v6 }
 0x313   : > { %v8371_v49 = vpop.eup %8370  ;;  %7483 = vmatprep.mubr.msk.f32.mxu0 %vm1408_vm2, %v8369_v36 }
 0x314   : > { %8380 = vtanh.f32 %v2634_v34  ;;  %v7377_v57 = vpop.f32.mrb[114].mxu1  ;;  %7484 = vmatmul.mubr.msk.f32.gmra.mrb[170].mxu0 %vm1408_vm2, %v8371_v49 }
 0x315   : > { %8382 = vtanh.f32 %v2639_v28  ;;  %v2649_v31 = vadd.f32 %v7377_v57, %v9891_v47  ;;  %v2643_v58 = vpop.f32.mrb[115].mxu1 }
 0x316   : > { %v8373_v3 = vpop.eup %8372  ;;  %v2644_v16 = vadd.f32 %v9891_v47, %v2643_v58 }
 0x317   : > { %v8375_v26 = vpop.eup %8374  ;;  %7486 = vmatprep.mubr.msk.f32.mxu0 %vm1408_vm2, %v8373_v3 }
 0x318   : > { %8384 = vtanh.f32 %v2644_v16  ;;  %v7380_v51 = vpop.f32.mrb[116].mxu1  ;;  %7487 = vmatmul.mubr.msk.f32.gmra.mrb[172].mxu0 %vm1408_vm2, %v8375_v26 }
 0x319   : > { %8386 = vtanh.f32 %v2649_v31  ;;  %v2659_v37 = vadd.f32 %v7380_v51, %v9891_v47  ;;  %v2653_v32 = vpop.f32.mrb[117].mxu1 }
 0x31a   : > { %v8377_v25 = vpop.eup %8376  ;;  %v2654_v20 = vadd.f32 %v9891_v47, %v2653_v32 }
 0x31b   : > { %v8379_v28 = vpop.eup %8378  ;;  %7489 = vmatprep.mubr.msk.f32.mxu0 %vm1408_vm2, %v8377_v25 }
 0x31c   : > { %8388 = vtanh.f32 %v2654_v20  ;;  %v7383_v6 = vpop.f32.mrb[118].mxu1  ;;  %7490 = vmatmul.mubr.msk.f32.gmra.mrb[174].mxu0 %vm1408_vm2, %v8379_v28 }
 0x31d   : > { %8390 = vtanh.f32 %v2659_v37  ;;  %v2669_v36 = vadd.f32 %v7383_v6, %v9891_v47  ;;  %v2663_v34 = vpop.f32.mrb[119].mxu1 }
 0x31e   : > { %v8381_v49 = vpop.eup %8380  ;;  %v2664_v57 = vadd.f32 %v9891_v47, %v2663_v34 }
 0x31f   : > { %v8383_v31 = vpop.eup %8382  ;;  %7492 = vmatprep.mubr.msk.f32.mxu0 %vm1408_vm2, %v8381_v49 }
 0x320   : > { %8392 = vtanh.f32 %v2664_v57  ;;  %v7386_v58 = vpop.f32.mrb[120].mxu1  ;;  %7493 = vmatmul.mubr.msk.f32.gmra.mrb[176].mxu0 %vm1408_vm2, %v8383_v31 }
 0x321   : > { %8394 = vtanh.f32 %v2669_v36  ;;  %v2679_v3 = vadd.f32 %v7386_v58, %v9891_v47  ;;  %v2673_v16 = vpop.f32.mrb[121].mxu1 }
 0x322   : > { %v8385_v26 = vpop.eup %8384  ;;  %v2674_v51 = vadd.f32 %v9891_v47, %v2673_v16 }
 0x323   : > { %v8387_v37 = vpop.eup %8386  ;;  %7495 = vmatprep.mubr.msk.f32.mxu0 %vm1408_vm2, %v8385_v26 }
 0x324   : > { %8396 = vtanh.f32 %v2674_v51  ;;  %v7389_v32 = vpop.f32.mrb[122].mxu1  ;;  %7496 = vmatmul.mubr.msk.f32.gmra.mrb[178].mxu0 %vm1408_vm2, %v8387_v37 }
 0x325   : > { %8398 = vtanh.f32 %v2679_v3  ;;  %v2689_v25 = vadd.f32 %v7389_v32, %v9891_v47  ;;  %v2683_v20 = vpop.f32.mrb[123].mxu1 }
 0x326   : > { %v8389_v28 = vpop.eup %8388  ;;  %v2684_v6 = vadd.f32 %v9891_v47, %v2683_v20 }
 0x327   : > { %v8391_v36 = vpop.eup %8390  ;;  %7498 = vmatprep.mubr.msk.f32.mxu0 %vm1408_vm2, %v8389_v28 }
 0x328   : > { %8400 = vtanh.f32 %v2684_v6  ;;  %v7392_v34 = vpop.f32.mrb[124].mxu1  ;;  %7499 = vmatmul.mubr.msk.f32.gmra.mrb[180].mxu0 %vm1408_vm2, %v8391_v36 }
 0x329   : > { %8402 = vtanh.f32 %v2689_v25  ;;  %v2699_v49 = vadd.f32 %v7392_v34, %v9891_v47  ;;  %v2693_v57 = vpop.f32.mrb[125].mxu1 }
 0x32a   : > { %v8393_v31 = vpop.eup %8392  ;;  %v2694_v58 = vadd.f32 %v9891_v47, %v2693_v57  ;;  %v6231_v57 = vld [vmem:[%s11048_s4 + $0x188] sm:$0xff] }
 0x32b   : > { %v8395_v3 = vpop.eup %8394  ;;  %7501 = vmatprep.mubr.msk.f32.mxu0 %vm1408_vm2, %v8393_v31 }
 0x32c   : > { %8404 = vtanh.f32 %v2694_v58  ;;  %v7395_v16 = vpop.f32.mrb[126].mxu1  ;;  %7502 = vmatmul.mubr.msk.f32.gmra.mrb[182].mxu0 %vm1408_vm2, %v8395_v3  ;;  %v10060_v58 = vld [vmem:[%s11049_s5 + $0x2] ss:$0 sm:$0xff] }
 0x32d   : > { %8406 = vtanh.f32 %v2699_v49  ;;  %v2709_v26 = vadd.f32 %v7395_v16, %v9891_v47  ;;  %v2703_v51 = vpop.f32.mrb[127].mxu1  ;;  %v6230_v49 = vld [vmem:[%s11048_s4 + $0x180] sm:$0xff] }
 0x32e   : > { %v8397_v37 = vpop.eup %8396  ;;  %v2704_v32 = vadd.f32 %v9891_v47, %v2703_v51  ;;  %v7972_v31 = vpack.c.bf16 %v6231_v57, %v6230_v49  ;;  %v6233_v49 = vld [vmem:[%s11048_s4 + $0x198] sm:$0xff] }
 0x32f   : > { %v8399_v25 = vpop.eup %8398  ;;  %7504 = vmatprep.mubr.msk.f32.mxu0 %vm1408_vm2, %v8397_v37 }
 0x330   : > { %8408 = vtanh.f32 %v2704_v32  ;;  %7505 = vmatmul.mubr.msk.f32.gmra.mrb[184].mxu0 %vm1408_vm2, %v8399_v25  ;;  %7973 = vmatprep.subr.bf16.mxu0 %v7972_v31 }
 0x331   : > { %8410 = vtanh.f32 %v2709_v26  ;;  %7975 = vmatpush3.bf16.msra.mxu0 %v7972_v31 }
 0x332   : > { %v8401_v20 = vpop.eup %8400 }
 0x333   : > { %v8403_v28 = vpop.eup %8402  ;;  %7507 = vmatprep.mubr.msk.f32.mxu0 %vm1408_vm2, %v8401_v20 }
 0x334   : > { %7508 = vmatmul.mubr.msk.f32.gmra.mrb[186].mxu0 %vm1408_vm2, %v8403_v28 }
 0x336   : > { %v8405_v6 = vpop.eup %8404 }
 0x337   : > { %v8407_v36 = vpop.eup %8406  ;;  %7510 = vmatprep.mubr.msk.f32.mxu0 %vm1408_vm2, %v8405_v6 }
 0x338   : > { %7511 = vmatmul.mubr.msk.f32.gmra.mrb[188].mxu0 %vm1408_vm2, %v8407_v36 }
 0x33a   : > { %v8409_v47 = vpop.eup %8408 }
 0x33b   : > { %v8411_v34 = vpop.eup %8410  ;;  %7513 = vmatprep.mubr.msk.f32.mxu0 %vm1408_vm2, %v8409_v47 }
 0x33c   : > { %7514 = vmatmul.mubr.msk.f32.gmra.mrb[190].mxu0 %vm1408_vm2, %v8411_v34  ;;  %v6232_v34 = vld [vmem:[%s11048_s4 + $0x190] sm:$0xff] }
 0x33d   : > { %v7976_v57 = vpack.c.bf16 %v6233_v49, %v6232_v34  ;;  %v11133_v34 = vld [vmem:[#allocation16_spill] sm:$0xff] }
 0x33f   : > { %7977 = vmatprep.subr.bf16.mxu0 %v7976_v57 }
 0x340   : > { %7979 = vmatpush3.bf16.msra.mxu0 %v7976_v57 }
 0x393   : > { %v7422_v3 = vpop.f32.mrb[128].mxu0 }
 0x394   : > { %v3061_v16 = vadd.f32 %v7422_v3, %v10060_v58  ;;  %v3055_v26 = vpop.f32.mrb[129].mxu0 }
 0x395   : > { %v3056_v51 = vadd.f32 %v10060_v58, %v3055_v26 }
 0x396   : > { %8412 = vtanh.f32 %v3061_v16 }
 0x397   : > { %8414 = vtanh.f32 %v3056_v51  ;;  %v7425_v37 = vpop.f32.mrb[130].mxu0 }
 0x398   : > { %v3071_v32 = vadd.f32 %v7425_v37, %v10060_v58  ;;  %v3065_v25 = vpop.f32.mrb[131].mxu0 }
 0x399   : > { %v3066_v20 = vadd.f32 %v10060_v58, %v3065_v25  ;;  %v6235_v25 = vld [vmem:[%s11048_s4 + $0x1a8] sm:$0xff] }
 0x39a   : > { %8416 = vtanh.f32 %v3071_v32  ;;  %v6234_v32 = vld [vmem:[%s11048_s4 + $0x1a0] sm:$0xff] }
 0x39b   : > { %8418 = vtanh.f32 %v3066_v20  ;;  %v7428_v28 = vpop.f32.mrb[132].mxu0  ;;  %v6236_v20 = vld [vmem:[%s11048_s4 + $0x1b0] sm:$0xff] }
 0x39c   : > { %v3081_v6 = vadd.f32 %v7428_v28, %v10060_v58  ;;  %v3075_v36 = vpop.f32.mrb[133].mxu0  ;;  %v11131_v28 = vld [vmem:[#allocation17_spill] sm:$0xff] }
 0x39d   : > { %v3076_v47 = vadd.f32 %v10060_v58, %v3075_v36  ;;  %v7980_v36 = vpack.c.bf16 %v6235_v25, %v6234_v32 }
 0x39e   : > { %8420 = vtanh.f32 %v3081_v6 }
 0x39f   : > { %8422 = vtanh.f32 %v3076_v47  ;;  %v7431_v31 = vpop.f32.mrb[134].mxu0  ;;  %v6237_v47 = vld [vmem:[%s11048_s4 + $0x1b8] sm:$0xff]  ;;  %7981 = vmatprep.subr.bf16.mxu0 %v7980_v36 }
 0x3a0   : > { %v8413_v3 = vpop.eup %8412  ;;  %v3091_v16 = vadd.f32 %v7431_v31, %v10060_v58  ;;  %v3085_v26 = vpop.f32.mrb[135].mxu0  ;;  %v7984_v31 = vpack.c.bf16 %v6237_v47, %v6236_v20  ;;  %7983 = vmatpush3.bf16.msra.mxu0 %v7980_v36  ;;  %v11135_v20 = vld [vmem:[#allocation18_spill] sm:$0xff] }
 0x3a1   : > { %v8415_v51 = vpop.eup %8414  ;;  %v3086_v37 = vadd.f32 %v10060_v58, %v3085_v26  ;;  %v10092_v49 = vadd.f32 %v8413_v3, %v11133_v34  ;;  %v6238_v26 = vld [vmem:[%s11048_s4 + $0x1c0] sm:$0xff] }
 0x3a2   : > { %8424 = vtanh.f32 %v3091_v16  ;;  %v10086_v6 = vadd.f32 %v8415_v51, %v11131_v28  ;;  %v6239_v16 = vld [vmem:[%s11048_s4 + $0x1c8] sm:$0xff]  ;;  %7985 = vmatprep.subr.bf16.mxu0 %v7984_v31 }
 0x3a3   : > { %11134 = vst [vmem:[#allocation16_spill] sm:$0xff] %v10092_v49  ;;  %8426 = vtanh.f32 %v3086_v37  ;;  %v7434_v57 = vpop.f32.mrb[136].mxu0  ;;  %v7988_v47 = vpack.c.bf16 %v6239_v16, %v6238_v26 }
 0x3a4   : > { %11132 = vst [vmem:[#allocation17_spill] sm:$0xff] %v10086_v6  ;;  %v8417_v51 = vpop.eup %8416  ;;  %v3101_v32 = vadd.f32 %v7434_v57, %v10060_v58  ;;  %v3095_v25 = vpop.f32.mrb[137].mxu0  ;;  %7540 = vmatprep.mubr.msk.f32.mxu1 %vm1408_vm2, %v10086_v6  ;;  %v6240_v6 = vld [vmem:[%s11048_s4 + $0x1d0] sm:$0xff]  ;;  %7987 = vmatpush3.bf16.msra.mxu0 %v7984_v31 }
 0x3a5   : > { %v8419_v3 = vpop.eup %8418  ;;  %v3096_v37 = vadd.f32 %v10060_v58, %v3095_v25  ;;  %7541 = vmatmul.mubr.msk.f32.vlgmr.msra.gmra.mrb[128].mxu1 %vm1408_vm2, %v10092_v49  ;;  %v10110_v57 = vadd.f32 %v8417_v51, %v9513_v2  ;;  %v6241_v25 = vld [vmem:[%s11048_s4 + $0x1d8] sm:$0xff]  ;;  %7989 = vmatprep.subr.bf16.mxu0 %v7988_v47 }
 0x3a6   : > { %8428 = vtanh.f32 %v3101_v32  ;;  %v10107_v28 = vadd.f32 %v8419_v3, %v11135_v20  ;;  %v7992_v51 = vpack.c.bf16 %v6241_v25, %v6240_v6 }
 0x3a7   : > { %8430 = vtanh.f32 %v3096_v37  ;;  %v7437_v34 = vpop.f32.mrb[138].mxu0 }
 0x3a8   : > { %11136 = vst [vmem:[#allocation18_spill] sm:$0xff] %v10107_v28  ;;  %v8421_v36 = vpop.eup %8420  ;;  %v3111_v32 = vadd.f32 %v7437_v34, %v10060_v58  ;;  %v3105_v3 = vpop.f32.mrb[139].mxu0  ;;  %7543 = vmatprep.mubr.msk.f32.mxu1 %vm1408_vm2, %v10107_v28  ;;  %7991 = vmatpush3.bf16.msra.mxu0 %v7988_v47 }
 0x3a9   : > { %v8423_v26 = vpop.eup %8422  ;;  %v3106_v16 = vadd.f32 %v10060_v58, %v3105_v3  ;;  %7544 = vmatmul.mubr.msk.f32.gmra.mrb[130].mxu1 %vm1408_vm2, %v10110_v57  ;;  %v10128_v20 = vadd.f32 %v8421_v36, %v9531_v23  ;;  %7993 = vmatprep.subr.bf16.mxu0 %v7992_v51 }
 0x3aa   : > { %8432 = vtanh.f32 %v3111_v32  ;;  %v10125_v2 = vadd.f32 %v8423_v26, %v9534_v11 }
 0x3ab   : > { %8434 = vtanh.f32 %v3106_v16  ;;  %v7440_v37 = vpop.f32.mrb[140].mxu0 }
 0x3ac   : > { %v8425_v34 = vpop.eup %8424  ;;  %v3121_v28 = vadd.f32 %v7440_v37, %v10060_v58  ;;  %v3115_v49 = vpop.f32.mrb[141].mxu0  ;;  %7546 = vmatprep.mubr.msk.f32.mxu1 %vm1408_vm2, %v10125_v2  ;;  %7995 = vmatpush3.bf16.msra.mxu0 %v7992_v51 }
 0x3ad   : > { %v8427_v3 = vpop.eup %8426  ;;  %v3116_v31 = vadd.f32 %v10060_v58, %v3115_v49  ;;  %7547 = vmatmul.mubr.msk.f32.gmra.mrb[132].mxu1 %vm1408_vm2, %v10128_v20  ;;  %v10140_v6 = vadd.f32 %v8425_v34, %v9543_v42 }
 0x3ae   : > { %8436 = vtanh.f32 %v3121_v28  ;;  %v10137_v11 = vadd.f32 %v8427_v3, %v9546_v41 }
 0x3af   : > { %8438 = vtanh.f32 %v3116_v31  ;;  %v7443_v23 = vpop.f32.mrb[142].mxu0 }
 0x3b0   : > { %v8429_v25 = vpop.eup %8428  ;;  %v3131_v36 = vadd.f32 %v7443_v23, %v10060_v58  ;;  %v3125_v32 = vpop.f32.mrb[143].mxu0  ;;  %7549 = vmatprep.mubr.msk.f32.mxu1 %vm1408_vm2, %v10137_v11 }
 0x3b1   : > { %v8431_v49 = vpop.eup %8430  ;;  %v3126_v47 = vadd.f32 %v10060_v58, %v3125_v32  ;;  %7550 = vmatmul.mubr.msk.f32.gmra.mrb[134].mxu1 %vm1408_vm2, %v10140_v6  ;;  %v10152_v28 = vadd.f32 %v8429_v25, %v9555_v46 }
 0x3b2   : > { %8440 = vtanh.f32 %v3131_v36  ;;  %v10149_v41 = vadd.f32 %v8431_v49, %v9558_v52 }
 0x3b3   : > { %8442 = vtanh.f32 %v3126_v47  ;;  %v7446_v42 = vpop.f32.mrb[144].mxu0 }
 0x3b4   : > { %v8433_v26 = vpop.eup %8432  ;;  %v3141_v16 = vadd.f32 %v7446_v42, %v10060_v58  ;;  %v3135_v37 = vpop.f32.mrb[145].mxu0  ;;  %7552 = vmatprep.mubr.msk.f32.mxu1 %vm1408_vm2, %v10149_v41 }
 0x3b5   : > { %v8435_v34 = vpop.eup %8434  ;;  %v3136_v3 = vadd.f32 %v10060_v58, %v3135_v37  ;;  %7553 = vmatmul.mubr.msk.f32.gmra.mrb[136].mxu1 %vm1408_vm2, %v10152_v28  ;;  %v10164_v51 = vadd.f32 %v8433_v26, %v9567_v62 }
 0x3b6   : > { %8444 = vtanh.f32 %v3141_v16  ;;  %v10161_v52 = vadd.f32 %v8435_v34, %v9570_v1 }
 0x3b7   : > { %8446 = vtanh.f32 %v3136_v3  ;;  %v7449_v46 = vpop.f32.mrb[146].mxu0 }
 0x3b8   : > { %v8437_v31 = vpop.eup %8436  ;;  %v3151_v23 = vadd.f32 %v7449_v46, %v10060_v58  ;;  %v3145_v25 = vpop.f32.mrb[147].mxu0  ;;  %7555 = vmatprep.mubr.msk.f32.mxu1 %vm1408_vm2, %v10161_v52 }
 0x3b9   : > { %v8439_v36 = vpop.eup %8438  ;;  %v3146_v32 = vadd.f32 %v10060_v58, %v3145_v25  ;;  %7556 = vmatmul.mubr.msk.f32.gmra.mrb[138].mxu1 %vm1408_vm2, %v10164_v51  ;;  %v10176_v49 = vadd.f32 %v8437_v31, %v9579_v9 }
 0x3ba   : > { %8448 = vtanh.f32 %v3151_v23  ;;  %v10173_v1 = vadd.f32 %v8439_v36, %v9582_v12 }
 0x3bb   : > { %8450 = vtanh.f32 %v3146_v32  ;;  %v7452_v62 = vpop.f32.mrb[148].mxu0 }
 0x3bc   : > { %v8441_v47 = vpop.eup %8440  ;;  %v3161_v42 = vadd.f32 %v7452_v62, %v10060_v58  ;;  %v3155_v26 = vpop.f32.mrb[149].mxu0  ;;  %7558 = vmatprep.mubr.msk.f32.mxu1 %vm1408_vm2, %v10173_v1 }
 0x3bd   : > { %v8443_v16 = vpop.eup %8442  ;;  %v3156_v37 = vadd.f32 %v10060_v58, %v3155_v26  ;;  %7559 = vmatmul.mubr.msk.f32.gmra.mrb[140].mxu1 %vm1408_vm2, %v10176_v49  ;;  %v10188_v34 = vadd.f32 %v8441_v47, %v9591_v18 }
 0x3be   : > { %8452 = vtanh.f32 %v3161_v42  ;;  %v10185_v12 = vadd.f32 %v8443_v16, %v9594_v21 }
 0x3bf   : > { %8454 = vtanh.f32 %v3156_v37  ;;  %v7455_v9 = vpop.f32.mrb[150].mxu0 }
 0x3c0   : > { %v8445_v3 = vpop.eup %8444  ;;  %v3171_v46 = vadd.f32 %v7455_v9, %v10060_v58  ;;  %v3165_v31 = vpop.f32.mrb[151].mxu0  ;;  %7561 = vmatprep.mubr.msk.f32.mxu1 %vm1408_vm2, %v10185_v12 }
 0x3c1   : > { %v8447_v23 = vpop.eup %8446  ;;  %v3166_v25 = vadd.f32 %v10060_v58, %v3165_v31  ;;  %7562 = vmatmul.mubr.msk.f32.gmra.mrb[142].mxu1 %vm1408_vm2, %v10188_v34  ;;  %v10200_v36 = vadd.f32 %v8445_v3, %v9603_v29 }
 0x3c2   : > { %8456 = vtanh.f32 %v3171_v46  ;;  %v10197_v21 = vadd.f32 %v8447_v23, %v9606_v33 }
 0x3c3   : > { %8458 = vtanh.f32 %v3166_v25  ;;  %v7458_v18 = vpop.f32.mrb[152].mxu0 }
 0x3c4   : > { %v8449_v32 = vpop.eup %8448  ;;  %v3181_v62 = vadd.f32 %v7458_v18, %v10060_v58  ;;  %v3175_v47 = vpop.f32.mrb[153].mxu0  ;;  %7564 = vmatprep.mubr.msk.f32.mxu1 %vm1408_vm2, %v10197_v21 }
 0x3c5   : > { %v8451_v42 = vpop.eup %8450  ;;  %v3176_v26 = vadd.f32 %v10060_v58, %v3175_v47  ;;  %7565 = vmatmul.mubr.msk.f32.gmra.mrb[144].mxu1 %vm1408_vm2, %v10200_v36  ;;  %v10212_v16 = vadd.f32 %v8449_v32, %v9615_v40 }
 0x3c6   : > { %8460 = vtanh.f32 %v3181_v62  ;;  %v10209_v33 = vadd.f32 %v8451_v42, %v9618_v44 }
 0x3c7   : > { %8462 = vtanh.f32 %v3176_v26  ;;  %v7461_v29 = vpop.f32.mrb[154].mxu0 }
 0x3c8   : > { %v8453_v37 = vpop.eup %8452  ;;  %v3191_v9 = vadd.f32 %v7461_v29, %v10060_v58  ;;  %v3185_v3 = vpop.f32.mrb[155].mxu0  ;;  %7567 = vmatprep.mubr.msk.f32.mxu1 %vm1408_vm2, %v10209_v33 }
 0x3c9   : > { %v8455_v46 = vpop.eup %8454  ;;  %v3186_v31 = vadd.f32 %v10060_v58, %v3185_v3  ;;  %7568 = vmatmul.mubr.msk.f32.gmra.mrb[146].mxu1 %vm1408_vm2, %v10212_v16  ;;  %v10224_v23 = vadd.f32 %v8453_v37, %v9627_v50 }
 0x3ca   : > { %8464 = vtanh.f32 %v3191_v9  ;;  %v10221_v44 = vadd.f32 %v8455_v46, %v9630_v54 }
 0x3cb   : > { %8466 = vtanh.f32 %v3186_v31  ;;  %v7464_v40 = vpop.f32.mrb[156].mxu0 }
 0x3cc   : > { %v8457_v25 = vpop.eup %8456  ;;  %v3201_v18 = vadd.f32 %v7464_v40, %v10060_v58  ;;  %v3195_v32 = vpop.f32.mrb[157].mxu0  ;;  %7570 = vmatprep.mubr.msk.f32.mxu1 %vm1408_vm2, %v10221_v44 }
 0x3cd   : > { %v8459_v62 = vpop.eup %8458  ;;  %v3196_v47 = vadd.f32 %v10060_v58, %v3195_v32  ;;  %7571 = vmatmul.mubr.msk.f32.gmra.mrb[148].mxu1 %vm1408_vm2, %v10224_v23  ;;  %v10236_v42 = vadd.f32 %v8457_v25, %v9639_v59 }
 0x3ce   : > { %8468 = vtanh.f32 %v3201_v18  ;;  %v10233_v54 = vadd.f32 %v8459_v62, %v9642_v63 }
 0x3cf   : > { %8470 = vtanh.f32 %v3196_v47  ;;  %v7467_v50 = vpop.f32.mrb[158].mxu0 }
 0x3d0   : > { %v8461_v26 = vpop.eup %8460  ;;  %v3211_v29 = vadd.f32 %v7467_v50, %v10060_v58  ;;  %v3205_v37 = vpop.f32.mrb[159].mxu0  ;;  %7573 = vmatprep.mubr.msk.f32.mxu1 %vm1408_vm2, %v10233_v54 }
 0x3d1   : > { %v8463_v9 = vpop.eup %8462  ;;  %v3206_v3 = vadd.f32 %v10060_v58, %v3205_v37  ;;  %7574 = vmatmul.mubr.msk.f32.gmra.mrb[150].mxu1 %vm1408_vm2, %v10236_v42  ;;  %v10248_v46 = vadd.f32 %v8461_v26, %v9651_v5 }
 0x3d2   : > { %8472 = vtanh.f32 %v3211_v29  ;;  %v10245_v63 = vadd.f32 %v8463_v9, %v9654_v8 }
 0x3d3   : > { %8474 = vtanh.f32 %v3206_v3  ;;  %v7470_v59 = vpop.f32.mrb[160].mxu0 }
 0x3d4   : > { %v8465_v31 = vpop.eup %8464  ;;  %v3221_v40 = vadd.f32 %v7470_v59, %v10060_v58  ;;  %v3215_v25 = vpop.f32.mrb[161].mxu0  ;;  %7576 = vmatprep.mubr.msk.f32.mxu1 %vm1408_vm2, %v10245_v63 }
 0x3d5   : > { %v8467_v18 = vpop.eup %8466  ;;  %v3216_v32 = vadd.f32 %v10060_v58, %v3215_v25  ;;  %7577 = vmatmul.mubr.msk.f32.gmra.mrb[152].mxu1 %vm1408_vm2, %v10248_v46  ;;  %v10260_v62 = vadd.f32 %v8465_v31, %v9663_v15 }
 0x3d6   : > { %8476 = vtanh.f32 %v3221_v40  ;;  %v10257_v8 = vadd.f32 %v8467_v18, %v9666_v19 }
 0x3d7   : > { %8478 = vtanh.f32 %v3216_v32  ;;  %v7473_v5 = vpop.f32.mrb[162].mxu0 }
 0x3d8   : > { %v8469_v47 = vpop.eup %8468  ;;  %v3231_v50 = vadd.f32 %v7473_v5, %v10060_v58  ;;  %v3225_v26 = vpop.f32.mrb[163].mxu0  ;;  %7579 = vmatprep.mubr.msk.f32.mxu1 %vm1408_vm2, %v10257_v8 }
 0x3d9   : > { %v8471_v29 = vpop.eup %8470  ;;  %v3226_v37 = vadd.f32 %v10060_v58, %v3225_v26  ;;  %7580 = vmatmul.mubr.msk.f32.gmra.mrb[154].mxu1 %vm1408_vm2, %v10260_v62  ;;  %v10272_v9 = vadd.f32 %v8469_v47, %v9675_v27 }
 0x3da   : > { %8480 = vtanh.f32 %v3231_v50  ;;  %v10269_v19 = vadd.f32 %v8471_v29, %v9678_v35 }
 0x3db   : > { %8482 = vtanh.f32 %v3226_v37  ;;  %v7476_v15 = vpop.f32.mrb[164].mxu0 }
 0x3dc   : > { %v8473_v3 = vpop.eup %8472  ;;  %v3241_v59 = vadd.f32 %v7476_v15, %v10060_v58  ;;  %v3235_v31 = vpop.f32.mrb[165].mxu0  ;;  %7582 = vmatprep.mubr.msk.f32.mxu1 %vm1408_vm2, %v10269_v19 }
 0x3dd   : > { %v8475_v40 = vpop.eup %8474  ;;  %v3236_v25 = vadd.f32 %v10060_v58, %v3235_v31  ;;  %7583 = vmatmul.mubr.msk.f32.gmra.mrb[156].mxu1 %vm1408_vm2, %v10272_v9  ;;  %v10284_v18 = vadd.f32 %v8473_v3, %v9687_v43 }
 0x3de   : > { %8484 = vtanh.f32 %v3241_v59  ;;  %v10281_v35 = vadd.f32 %v8475_v40, %v9690_v48 }
 0x3df   : > { %8486 = vtanh.f32 %v3236_v25  ;;  %v7479_v27 = vpop.f32.mrb[166].mxu0 }
 0x3e0   : > { %v8477_v32 = vpop.eup %8476  ;;  %v3251_v5 = vadd.f32 %v7479_v27, %v10060_v58  ;;  %v3245_v47 = vpop.f32.mrb[167].mxu0  ;;  %7585 = vmatprep.mubr.msk.f32.mxu1 %vm1408_vm2, %v10281_v35 }
 0x3e1   : > { %v8479_v50 = vpop.eup %8478  ;;  %v3246_v26 = vadd.f32 %v10060_v58, %v3245_v47  ;;  %7586 = vmatmul.mubr.msk.f32.gmra.mrb[158].mxu1 %vm1408_vm2, %v10284_v18  ;;  %v10296_v29 = vadd.f32 %v8477_v32, %v9699_v56 }
 0x3e2   : > { %8488 = vtanh.f32 %v3251_v5  ;;  %v10293_v48 = vadd.f32 %v8479_v50, %v9702_v60 }
 0x3e3   : > { %8490 = vtanh.f32 %v3246_v26  ;;  %v7482_v43 = vpop.f32.mrb[168].mxu0 }
 0x3e4   : > { %v8481_v37 = vpop.eup %8480  ;;  %v3261_v15 = vadd.f32 %v7482_v43, %v10060_v58  ;;  %v3255_v3 = vpop.f32.mrb[169].mxu0  ;;  %7588 = vmatprep.mubr.msk.f32.mxu1 %vm1408_vm2, %v10293_v48 }
 0x3e5   : > { %v8483_v59 = vpop.eup %8482  ;;  %v3256_v31 = vadd.f32 %v10060_v58, %v3255_v3  ;;  %7589 = vmatmul.mubr.msk.f32.gmra.mrb[160].mxu1 %vm1408_vm2, %v10296_v29  ;;  %v10308_v40 = vadd.f32 %v8481_v37, %v9711_v4 }
 0x3e6   : > { %8492 = vtanh.f32 %v3261_v15  ;;  %v10305_v60 = vadd.f32 %v8483_v59, %v9714_v10 }
 0x3e7   : > { %8494 = vtanh.f32 %v3256_v31  ;;  %v7485_v56 = vpop.f32.mrb[170].mxu0 }
 0x3e8   : > { %v8485_v25 = vpop.eup %8484  ;;  %v3271_v27 = vadd.f32 %v7485_v56, %v10060_v58  ;;  %v3265_v32 = vpop.f32.mrb[171].mxu0  ;;  %7591 = vmatprep.mubr.msk.f32.mxu1 %vm1408_vm2, %v10305_v60 }
 0x3e9   : > { %v8487_v5 = vpop.eup %8486  ;;  %v3266_v47 = vadd.f32 %v10060_v58, %v3265_v32  ;;  %7592 = vmatmul.mubr.msk.f32.gmra.mrb[162].mxu1 %vm1408_vm2, %v10308_v40  ;;  %v10320_v50 = vadd.f32 %v8485_v25, %v9723_v17 }
 0x3ea   : > { %8496 = vtanh.f32 %v3271_v27  ;;  %v10317_v10 = vadd.f32 %v8487_v5, %v9726_v24 }
 0x3eb   : > { %8498 = vtanh.f32 %v3266_v47  ;;  %v7488_v4 = vpop.f32.mrb[172].mxu0 }
 0x3ec   : > { %v8489_v26 = vpop.eup %8488  ;;  %v3281_v43 = vadd.f32 %v7488_v4, %v10060_v58  ;;  %v3275_v37 = vpop.f32.mrb[173].mxu0  ;;  %7594 = vmatprep.mubr.msk.f32.mxu1 %vm1408_vm2, %v10317_v10 }
 0x3ed   : > { %v8491_v15 = vpop.eup %8490  ;;  %v3276_v3 = vadd.f32 %v10060_v58, %v3275_v37  ;;  %7595 = vmatmul.mubr.msk.f32.gmra.mrb[164].mxu1 %vm1408_vm2, %v10320_v50  ;;  %v10332_v59 = vadd.f32 %v8489_v26, %v9735_v38 }
 0x3ee   : > { %8500 = vtanh.f32 %v3281_v43  ;;  %v10329_v24 = vadd.f32 %v8491_v15, %v9738_v45 }
 0x3ef   : > { %8502 = vtanh.f32 %v3276_v3  ;;  %v7491_v17 = vpop.f32.mrb[174].mxu0 }
 0x3f0   : > { %v8493_v31 = vpop.eup %8492  ;;  %v3291_v56 = vadd.f32 %v7491_v17, %v10060_v58  ;;  %v3285_v25 = vpop.f32.mrb[175].mxu0  ;;  %7597 = vmatprep.mubr.msk.f32.mxu1 %vm1408_vm2, %v10329_v24 }
 0x3f1   : > { %v8495_v27 = vpop.eup %8494  ;;  %v3286_v32 = vadd.f32 %v10060_v58, %v3285_v25  ;;  %7598 = vmatmul.mubr.msk.f32.gmra.mrb[166].mxu1 %vm1408_vm2, %v10332_v59  ;;  %v10344_v5 = vadd.f32 %v8493_v31, %v9747_v55 }
 0x3f2   : > { %8504 = vtanh.f32 %v3291_v56  ;;  %v10341_v45 = vadd.f32 %v8495_v27, %v9750_v61 }
 0x3f3   : > { %8506 = vtanh.f32 %v3286_v32  ;;  %v7494_v38 = vpop.f32.mrb[176].mxu0 }
 0x3f4   : > { %v8497_v47 = vpop.eup %8496  ;;  %v3301_v4 = vadd.f32 %v7494_v38, %v10060_v58  ;;  %v3295_v26 = vpop.f32.mrb[177].mxu0  ;;  %7600 = vmatprep.mubr.msk.f32.mxu1 %vm1408_vm2, %v10341_v45 }
 0x3f5   : > { %v8499_v43 = vpop.eup %8498  ;;  %v3296_v37 = vadd.f32 %v10060_v58, %v3295_v26  ;;  %7601 = vmatmul.mubr.msk.f32.gmra.mrb[168].mxu1 %vm1408_vm2, %v10344_v5  ;;  %v10356_v15 = vadd.f32 %v8497_v47, %v9759_v7 }
 0x3f6   : > { %8508 = vtanh.f32 %v3301_v4  ;;  %v10353_v61 = vadd.f32 %v8499_v43, %v9762_v14 }
 0x3f7   : > { %8510 = vtanh.f32 %v3296_v37  ;;  %v7497_v55 = vpop.f32.mrb[178].mxu0 }
 0x3f8   : > { %v8501_v3 = vpop.eup %8500  ;;  %v3311_v17 = vadd.f32 %v7497_v55, %v10060_v58  ;;  %v3305_v31 = vpop.f32.mrb[179].mxu0  ;;  %7603 = vmatprep.mubr.msk.f32.mxu1 %vm1408_vm2, %v10353_v61 }
 0x3f9   : > { %v8503_v56 = vpop.eup %8502  ;;  %v3306_v25 = vadd.f32 %v10060_v58, %v3305_v31  ;;  %7604 = vmatmul.mubr.msk.f32.gmra.mrb[170].mxu1 %vm1408_vm2, %v10356_v15  ;;  %v10368_v27 = vadd.f32 %v8501_v3, %v9771_v30 }
 0x3fa   : > { %8512 = vtanh.f32 %v3311_v17  ;;  %v10365_v14 = vadd.f32 %v8503_v56, %v9774_v39 }
 0x3fb   : > { %8514 = vtanh.f32 %v3306_v25  ;;  %v7500_v7 = vpop.f32.mrb[180].mxu0 }
 0x3fc   : > { %v8505_v32 = vpop.eup %8504  ;;  %v3321_v38 = vadd.f32 %v7500_v7, %v10060_v58  ;;  %v3315_v47 = vpop.f32.mrb[181].mxu0  ;;  %7606 = vmatprep.mubr.msk.f32.mxu1 %vm1408_vm2, %v10365_v14 }
 0x3fd   : > { %v8507_v4 = vpop.eup %8506  ;;  %v3316_v26 = vadd.f32 %v10060_v58, %v3315_v47  ;;  %7607 = vmatmul.mubr.msk.f32.gmra.mrb[172].mxu1 %vm1408_vm2, %v10368_v27  ;;  %v10380_v43 = vadd.f32 %v8505_v32, %v9783_v53 }
 0x3fe   : > { %8516 = vtanh.f32 %v3321_v38  ;;  %v10377_v39 = vadd.f32 %v8507_v4, %v9786_v0 }
 0x3ff   : > { %8518 = vtanh.f32 %v3316_v26  ;;  %v7503_v30 = vpop.f32.mrb[182].mxu0  ;;  %v11139_v26 = vld [vmem:[#allocation2_spill] sm:$0xff] }
 0x400   : > { %v8509_v37 = vpop.eup %8508  ;;  %v3331_v55 = vadd.f32 %v7503_v30, %v10060_v58  ;;  %v3325_v3 = vpop.f32.mrb[183].mxu0  ;;  %7609 = vmatprep.mubr.msk.f32.mxu1 %vm1408_vm2, %v10377_v39 }
 0x401   : > { %v8511_v17 = vpop.eup %8510  ;;  %v3326_v31 = vadd.f32 %v10060_v58, %v3325_v3  ;;  %7610 = vmatmul.mubr.msk.f32.gmra.mrb[174].mxu1 %vm1408_vm2, %v10380_v43  ;;  %v10392_v56 = vadd.f32 %v8509_v37, %v9795_v13 }
 0x402   : > { %8520 = vtanh.f32 %v3331_v55  ;;  %v10389_v0 = vadd.f32 %v8511_v17, %v9798_v22  ;;  %v11137_v22 = vld [vmem:[#allocation3_spill] sm:$0xff] }
 0x403   : > { %8522 = vtanh.f32 %v3326_v31  ;;  %v7506_v53 = vpop.f32.mrb[184].mxu0 }
 0x404   : > { %v8513_v25 = vpop.eup %8512  ;;  %v3341_v7 = vadd.f32 %v7506_v53, %v10060_v58  ;;  %v3335_v32 = vpop.f32.mrb[185].mxu0  ;;  %7612 = vmatprep.mubr.msk.f32.mxu1 %vm1408_vm2, %v10389_v0  ;;  %v11141_v53 = vld [vmem:[#allocation5_spill] sm:$0xff] }
 0x405   : > { %v8515_v38 = vpop.eup %8514  ;;  %v3336_v47 = vadd.f32 %v10060_v58, %v3335_v32  ;;  %7613 = vmatmul.mubr.msk.f32.gmra.mrb[176].mxu1 %vm1408_vm2, %v10392_v56  ;;  %v10404_v30 = vadd.f32 %v8513_v25, %v11139_v26  ;;  %v11143_v32 = vld [vmem:[#allocation4_spill] sm:$0xff] }
 0x406   : > { %8524 = vtanh.f32 %v3341_v7  ;;  %v10401_v4 = vadd.f32 %v8515_v38, %v11137_v22 }
 0x407   : > { %8526 = vtanh.f32 %v3336_v47  ;;  %v7509_v13 = vpop.f32.mrb[186].mxu0  ;;  %11140 = vst [vmem:[#allocation2_spill] sm:$0xff] %v10404_v30 }
 0x408   : > { %11138 = vst [vmem:[#allocation3_spill] sm:$0xff] %v10401_v4  ;;  %v8517_v37 = vpop.eup %8516  ;;  %v3351_v55 = vadd.f32 %v7509_v13, %v10060_v58  ;;  %v3345_v3 = vpop.f32.mrb[187].mxu0  ;;  %7615 = vmatprep.mubr.msk.f32.mxu1 %vm1408_vm2, %v10401_v4 }
 0x409   : > { %v8519_v17 = vpop.eup %8518  ;;  %v3346_v31 = vadd.f32 %v10060_v58, %v3345_v3  ;;  %7616 = vmatmul.mubr.msk.f32.gmra.mrb[178].mxu1 %vm1408_vm2, %v10404_v30  ;;  %v10416_v38 = vadd.f32 %v8517_v37, %v11143_v32 }
 0x40a   : > { %8528 = vtanh.f32 %v3351_v55  ;;  %v10413_v7 = vadd.f32 %v8519_v17, %v11141_v53  ;;  %v11145_v55 = vld [vmem:[#allocation7_spill] sm:$0xff] }
 0x40b   : > { %8530 = vtanh.f32 %v3346_v31  ;;  %v7512_v25 = vpop.f32.mrb[188].mxu0  ;;  %11144 = vst [vmem:[#allocation4_spill] sm:$0xff] %v10416_v38  ;;  %v11147_v31 = vld [vmem:[#allocation6_spill] sm:$0xff] }
 0x40c   : > { %11142 = vst [vmem:[#allocation5_spill] sm:$0xff] %v10413_v7  ;;  %v8521_v47 = vpop.eup %8520  ;;  %v3361_v22 = vadd.f32 %v7512_v25, %v10060_v58  ;;  %v3355_v13 = vpop.f32.mrb[189].mxu0  ;;  %7618 = vmatprep.mubr.msk.f32.mxu1 %vm1408_vm2, %v10413_v7 }
 0x40d   : > { %v8523_v26 = vpop.eup %8522  ;;  %v3356_v3 = vadd.f32 %v10060_v58, %v3355_v13  ;;  %7619 = vmatmul.mubr.msk.f32.gmra.mrb[180].mxu1 %vm1408_vm2, %v10416_v38  ;;  %v10428_v53 = vadd.f32 %v8521_v47, %v11147_v31  ;;  %v11151_v47 = vld [vmem:[#allocation8_spill] sm:$0xff]  ;;  %v11155_v31 = vld [vmem:[#allocation10_spill] sm:$0xff] }
 0x40e   : > { %8532 = vtanh.f32 %v3361_v22  ;;  %v10425_v17 = vadd.f32 %v8523_v26, %v11145_v55  ;;  %v11149_v22 = vld [vmem:[#allocation9_spill] sm:$0xff]  ;;  %v4900_v38 = vld [vmem:[%s11050_s6 + $0x50] sm:$0xff] }
 0x40f   : > { %8534 = vtanh.f32 %v3356_v3  ;;  %v7515_v37 = vpop.f32.mrb[190].mxu0  ;;  %11148 = vst [vmem:[#allocation6_spill] sm:$0xff] %v10428_v53 }
 0x410   : > { %11146 = vst [vmem:[#allocation7_spill] sm:$0xff] %v10425_v17  ;;  %v8525_v25 = vpop.eup %8524  ;;  %v3371_v32 = vadd.f32 %v7515_v37, %v10060_v58  ;;  %v3365_v30 = vpop.f32.mrb[191].mxu0  ;;  %7621 = vmatprep.mubr.msk.f32.mxu1 %vm1408_vm2, %v10425_v17 }
 0x411   : > { %v8527_v13 = vpop.eup %8526  ;;  %v3366_v7 = vadd.f32 %v10060_v58, %v3365_v30  ;;  %7622 = vmatmul.mubr.msk.f32.gmra.mrb[182].mxu1 %vm1408_vm2, %v10428_v53  ;;  %v10440_v3 = vadd.f32 %v8525_v25, %v11151_v47  ;;  %v11153_v58 = vld [vmem:[#allocation11_spill] sm:$0xff]  ;;  %v11157_v25 = vld [vmem:[#allocation13_spill] sm:$0xff]  ;;  %v11159_v47 = vld [vmem:[#allocation12_spill] sm:$0xff] }
 0x412   : > { %8536 = vtanh.f32 %v3371_v32  ;;  %v10437_v26 = vadd.f32 %v8527_v13, %v11149_v22  ;;  %v4898_v53 = vld [vmem:[%s11050_s6 + $0x40] sm:$0xff] }
 0x413   : > { %8538 = vtanh.f32 %v3366_v7  ;;  %11152 = vst [vmem:[#allocation8_spill] sm:$0xff] %v10440_v3 }
 0x414   : > { %11150 = vst [vmem:[#allocation9_spill] sm:$0xff] %v10437_v26  ;;  %v8529_v55 = vpop.eup %8528  ;;  %7624 = vmatprep.mubr.msk.f32.mxu1 %vm1408_vm2, %v10437_v26 }
 0x415   : > { %v8531_v37 = vpop.eup %8530  ;;  %7625 = vmatmul.mubr.msk.f32.gmra.mrb[184].mxu1 %vm1408_vm2, %v10440_v3  ;;  %v10450_v32 = vadd.f32 %v8529_v55, %v11155_v31  ;;  %v11163_v31 = vld [vmem:[#allocation14_spill] sm:$0xff] }
 0x416   : > { %v10447_v30 = vadd.f32 %v8531_v37, %v11153_v58  ;;  %v11161_v37 = vld [vmem:[#allocation15_spill] sm:$0xff] }
 0x417   : > { %11156 = vst [vmem:[#allocation10_spill] sm:$0xff] %v10450_v32 }
 0x418   : > { %11154 = vst [vmem:[#allocation11_spill] sm:$0xff] %v10447_v30  ;;  %v8533_v13 = vpop.eup %8532  ;;  %7627 = vmatprep.mubr.msk.f32.mxu1 %vm1408_vm2, %v10447_v30 }
 0x419   : > { %v8535_v7 = vpop.eup %8534  ;;  %7628 = vmatmul.mubr.msk.f32.gmra.mrb[186].mxu1 %vm1408_vm2, %v10450_v32  ;;  %v10460_v26 = vadd.f32 %v8533_v13, %v11159_v47  ;;  %v4890_v13 = vld [vmem:[%s11050_s6] sm:$0xff] }
 0x41a   : > { %v10457_v22 = vadd.f32 %v8535_v7, %v11157_v25  ;;  %v4891_v7 = vld [vmem:[%s11050_s6 + $0x8] sm:$0xff] }
 0x41b   : > { %11160 = vst [vmem:[#allocation12_spill] sm:$0xff] %v10460_v26  ;;  %v7996_v25 = vpack.c.bf16 %v4891_v7, %v4890_v13 }
 0x41c   : > { %11158 = vst [vmem:[#allocation13_spill] sm:$0xff] %v10457_v22  ;;  %v8537_v3 = vpop.eup %8536  ;;  %7630 = vmatprep.mubr.msk.f32.mxu1 %vm1408_vm2, %v10457_v22  ;;  %v4895_v22 = vld [vmem:[%s11050_s6 + $0x28] sm:$0xff] }
 0x41d   : > { %v8539_v55 = vpop.eup %8538  ;;  %7631 = vmatmul.mubr.msk.f32.gmra.mrb[188].mxu1 %vm1408_vm2, %v10460_v26  ;;  %v10470_v30 = vadd.f32 %v8537_v3, %v11163_v31  ;;  %7997 = vmatprep.subr.bf16.mxu1 %v7996_v25  ;;  %v10485_v3 = vld [vmem:[%s11049_s5 + $0x3] ss:$0 sm:$0xff] }
 0x41e   : > { %v10467_v58 = vadd.f32 %v8539_v55, %v11161_v37  ;;  %7999 = vmatpush3.bf16.msra.mxu1 %v7996_v25  ;;  %v4892_v25 = vld [vmem:[%s11050_s6 + $0x10] sm:$0xff] }
 0x41f   : > { %11164 = vst [vmem:[#allocation14_spill] sm:$0xff] %v10470_v30 }
 0x420   : > { %11162 = vst [vmem:[#allocation15_spill] sm:$0xff] %v10467_v58  ;;  %7633 = vmatprep.mubr.msk.f32.mxu1 %vm1408_vm2, %v10467_v58 }
 0x421   : > { %7634 = vmatmul.mubr.msk.f32.gmra.mrb[190].mxu1 %vm1408_vm2, %v10470_v30 }
 0x478   : > { %v7542_v47 = vpop.f32.mrb[128].mxu1 }
 0x479   : > { %v3787_v55 = vadd.f32 %v7542_v47, %v10485_v3  ;;  %v3781_v37 = vpop.f32.mrb[129].mxu1  ;;  %v4893_v47 = vld [vmem:[%s11050_s6 + $0x18] sm:$0xff] }
 0x47a   : > { %v3782_v31 = vadd.f32 %v10485_v3, %v3781_v37 }
 0x47c   : > { %8540 = vtanh.f32 %v3782_v31  ;;  %v7545_v30 = vpop.f32.mrb[130].mxu1 }
 0x47d   : > { %8542 = vtanh.f32 %v3787_v55  ;;  %v3797_v58 = vadd.f32 %v7545_v30, %v10485_v3  ;;  %v3791_v26 = vpop.f32.mrb[131].mxu1  ;;  %v8000_v55 = vpack.c.bf16 %v4893_v47, %v4892_v25 }
 0x47e   : > { %v3792_v13 = vadd.f32 %v10485_v3, %v3791_v26 }
 0x47f   : > { %8001 = vmatprep.subr.bf16.mxu1 %v8000_v55 }
 0x480   : > { %8544 = vtanh.f32 %v3792_v13  ;;  %v7548_v7 = vpop.f32.mrb[132].mxu1  ;;  %8003 = vmatpush3.bf16.msra.mxu1 %v8000_v55  ;;  %v4894_v13 = vld [vmem:[%s11050_s6 + $0x20] sm:$0xff] }
 0x481   : > { %8546 = vtanh.f32 %v3797_v58  ;;  %v3807_v37 = vadd.f32 %v7548_v7, %v10485_v3  ;;  %v3801_v31 = vpop.f32.mrb[133].mxu1  ;;  %v4896_v58 = vld [vmem:[%s11050_s6 + $0x30] sm:$0xff]  ;;  %v8004_v47 = vpack.c.bf16 %v4895_v22, %v4894_v13 }
 0x482   : > { %v3802_v30 = vadd.f32 %v10485_v3, %v3801_v31  ;;  %v4897_v31 = vld [vmem:[%s11050_s6 + $0x38] sm:$0xff] }
 0x483   : > { %v8008_v32 = vpack.c.bf16 %v4897_v31, %v4896_v58  ;;  %8005 = vmatprep.subr.bf16.mxu1 %v8004_v47 }
 0x484   : > { %8548 = vtanh.f32 %v3802_v30  ;;  %v7551_v26 = vpop.f32.mrb[134].mxu1  ;;  %8007 = vmatpush3.bf16.msra.mxu1 %v8004_v47 }
 0x485   : > { %8550 = vtanh.f32 %v3807_v37  ;;  %v3817_v7 = vadd.f32 %v7551_v26, %v10485_v3  ;;  %v3811_v25 = vpop.f32.mrb[135].mxu1  ;;  %v4899_v37 = vld [vmem:[%s11050_s6 + $0x48] sm:$0xff]  ;;  %8009 = vmatprep.subr.bf16.mxu1 %v8008_v32 }
 0x486   : > { %v8541_v55 = vpop.eup %8540  ;;  %v3812_v30 = vadd.f32 %v10485_v3, %v3811_v25  ;;  %v8012_v58 = vpack.c.bf16 %v4899_v37, %v4898_v53 }
 0x487   : > { %v8543_v17 = vpop.eup %8542  ;;  %7660 = vmatprep.mubr.msk.f32.mxu0 %vm1408_vm2, %v8541_v55  ;;  %v4901_v55 = vld [vmem:[%s11050_s6 + $0x58] sm:$0xff] }
 0x488   : > { %8552 = vtanh.f32 %v3812_v30  ;;  %v7554_v22 = vpop.f32.mrb[136].mxu1  ;;  %7661 = vmatmul.mubr.msk.f32.vlgmr.msra.gmra.mrb[192].mxu0 %vm1408_vm2, %v8543_v17  ;;  %8011 = vmatpush3.bf16.msra.mxu1 %v8008_v32  ;;  %v8016_v47 = vpack.c.bf16 %v4901_v55, %v4900_v38 }
 0x489   : > { %8554 = vtanh.f32 %v3817_v7  ;;  %v3827_v26 = vadd.f32 %v7554_v22, %v10485_v3  ;;  %v3821_v13 = vpop.f32.mrb[137].mxu1  ;;  %8013 = vmatprep.subr.bf16.mxu1 %v8012_v58 }
 0x48a   : > { %v8545_v25 = vpop.eup %8544  ;;  %v3822_v31 = vadd.f32 %v10485_v3, %v3821_v13 }
 0x48b   : > { %v8547_v30 = vpop.eup %8546  ;;  %7663 = vmatprep.mubr.msk.f32.mxu0 %vm1408_vm2, %v8545_v25 }
 0x48c   : > { %8556 = vtanh.f32 %v3822_v31  ;;  %v7557_v17 = vpop.f32.mrb[138].mxu1  ;;  %7664 = vmatmul.mubr.msk.f32.gmra.mrb[194].mxu0 %vm1408_vm2, %v8547_v30  ;;  %8015 = vmatpush3.bf16.msra.mxu1 %v8012_v58 }
 0x48d   : > { %8558 = vtanh.f32 %v3827_v26  ;;  %v3837_v53 = vadd.f32 %v7557_v17, %v10485_v3  ;;  %v3831_v7 = vpop.f32.mrb[139].mxu1  ;;  %8017 = vmatprep.subr.bf16.mxu1 %v8016_v47 }
 0x48e   : > { %v8549_v37 = vpop.eup %8548  ;;  %v3832_v22 = vadd.f32 %v10485_v3, %v3831_v7 }
 0x48f   : > { %v8551_v13 = vpop.eup %8550  ;;  %7666 = vmatprep.mubr.msk.f32.mxu0 %vm1408_vm2, %v8549_v37 }
 0x490   : > { %8560 = vtanh.f32 %v3832_v22  ;;  %v7560_v4 = vpop.f32.mrb[140].mxu1  ;;  %7667 = vmatmul.mubr.msk.f32.gmra.mrb[196].mxu0 %vm1408_vm2, %v8551_v13  ;;  %8019 = vmatpush3.bf16.msra.mxu1 %v8016_v47 }
 0x491   : > { %8562 = vtanh.f32 %v3837_v53  ;;  %v3847_v32 = vadd.f32 %v7560_v4, %v10485_v3  ;;  %v3841_v26 = vpop.f32.mrb[141].mxu1 }
 0x492   : > { %v8553_v25 = vpop.eup %8552  ;;  %v3842_v31 = vadd.f32 %v10485_v3, %v3841_v26 }
 0x493   : > { %v8555_v38 = vpop.eup %8554  ;;  %7669 = vmatprep.mubr.msk.f32.mxu0 %vm1408_vm2, %v8553_v25 }
 0x494   : > { %8564 = vtanh.f32 %v3842_v31  ;;  %v7563_v55 = vpop.f32.mrb[142].mxu1  ;;  %7670 = vmatmul.mubr.msk.f32.gmra.mrb[198].mxu0 %vm1408_vm2, %v8555_v38 }
 0x495   : > { %8566 = vtanh.f32 %v3847_v32  ;;  %v3857_v30 = vadd.f32 %v7563_v55, %v10485_v3  ;;  %v3851_v58 = vpop.f32.mrb[143].mxu1 }
 0x496   : > { %v8557_v17 = vpop.eup %8556  ;;  %v3852_v4 = vadd.f32 %v10485_v3, %v3851_v58 }
 0x497   : > { %v8559_v53 = vpop.eup %8558  ;;  %7672 = vmatprep.mubr.msk.f32.mxu0 %vm1408_vm2, %v8557_v17 }
 0x498   : > { %8568 = vtanh.f32 %v3852_v4  ;;  %v7566_v7 = vpop.f32.mrb[144].mxu1  ;;  %7673 = vmatmul.mubr.msk.f32.gmra.mrb[200].mxu0 %vm1408_vm2, %v8559_v53 }
 0x499   : > { %8570 = vtanh.f32 %v3857_v30  ;;  %v3867_v37 = vadd.f32 %v7566_v7, %v10485_v3  ;;  %v3861_v22 = vpop.f32.mrb[145].mxu1 }
 0x49a   : > { %v8561_v13 = vpop.eup %8560  ;;  %v3862_v47 = vadd.f32 %v10485_v3, %v3861_v22 }
 0x49b   : > { %v8563_v32 = vpop.eup %8562  ;;  %7675 = vmatprep.mubr.msk.f32.mxu0 %vm1408_vm2, %v8561_v13 }
 0x49c   : > { %8572 = vtanh.f32 %v3862_v47  ;;  %v7569_v26 = vpop.f32.mrb[146].mxu1  ;;  %7676 = vmatmul.mubr.msk.f32.gmra.mrb[202].mxu0 %vm1408_vm2, %v8563_v32 }
 0x49d   : > { %8574 = vtanh.f32 %v3867_v37  ;;  %v3877_v25 = vadd.f32 %v7569_v26, %v10485_v3  ;;  %v3871_v31 = vpop.f32.mrb[147].mxu1 }
 0x49e   : > { %v8565_v38 = vpop.eup %8564  ;;  %v3872_v55 = vadd.f32 %v10485_v3, %v3871_v31 }
 0x49f   : > { %v8567_v30 = vpop.eup %8566  ;;  %7678 = vmatprep.mubr.msk.f32.mxu0 %vm1408_vm2, %v8565_v38 }
 0x4a0   : > { %8576 = vtanh.f32 %v3872_v55  ;;  %v7572_v58 = vpop.f32.mrb[148].mxu1  ;;  %7679 = vmatmul.mubr.msk.f32.gmra.mrb[204].mxu0 %vm1408_vm2, %v8567_v30 }
 0x4a1   : > { %8578 = vtanh.f32 %v3877_v25  ;;  %v3887_v17 = vadd.f32 %v7572_v58, %v10485_v3  ;;  %v3881_v4 = vpop.f32.mrb[149].mxu1 }
 0x4a2   : > { %v8569_v53 = vpop.eup %8568  ;;  %v3882_v7 = vadd.f32 %v10485_v3, %v3881_v4 }
 0x4a3   : > { %v8571_v37 = vpop.eup %8570  ;;  %7681 = vmatprep.mubr.msk.f32.mxu0 %vm1408_vm2, %v8569_v53 }
 0x4a4   : > { %8580 = vtanh.f32 %v3882_v7  ;;  %v7575_v22 = vpop.f32.mrb[150].mxu1  ;;  %7682 = vmatmul.mubr.msk.f32.gmra.mrb[206].mxu0 %vm1408_vm2, %v8571_v37 }
 0x4a5   : > { %8582 = vtanh.f32 %v3887_v17  ;;  %v3897_v13 = vadd.f32 %v7575_v22, %v10485_v3  ;;  %v3891_v47 = vpop.f32.mrb[151].mxu1 }
 0x4a6   : > { %v8573_v32 = vpop.eup %8572  ;;  %v3892_v26 = vadd.f32 %v10485_v3, %v3891_v47 }
 0x4a7   : > { %v8575_v25 = vpop.eup %8574  ;;  %7684 = vmatprep.mubr.msk.f32.mxu0 %vm1408_vm2, %v8573_v32 }
 0x4a8   : > { %8584 = vtanh.f32 %v3892_v26  ;;  %v7578_v31 = vpop.f32.mrb[152].mxu1  ;;  %7685 = vmatmul.mubr.msk.f32.gmra.mrb[208].mxu0 %vm1408_vm2, %v8575_v25 }
 0x4a9   : > { %8586 = vtanh.f32 %v3897_v13  ;;  %v3907_v38 = vadd.f32 %v7578_v31, %v10485_v3  ;;  %v3901_v55 = vpop.f32.mrb[153].mxu1 }
 0x4aa   : > { %v8577_v30 = vpop.eup %8576  ;;  %v3902_v58 = vadd.f32 %v10485_v3, %v3901_v55 }
 0x4ab   : > { %v8579_v17 = vpop.eup %8578  ;;  %7687 = vmatprep.mubr.msk.f32.mxu0 %vm1408_vm2, %v8577_v30 }
 0x4ac   : > { %8588 = vtanh.f32 %v3902_v58  ;;  %v7581_v4 = vpop.f32.mrb[154].mxu1  ;;  %7688 = vmatmul.mubr.msk.f32.gmra.mrb[210].mxu0 %vm1408_vm2, %v8579_v17 }
 0x4ad   : > { %8590 = vtanh.f32 %v3907_v38  ;;  %v3917_v53 = vadd.f32 %v7581_v4, %v10485_v3  ;;  %v3911_v7 = vpop.f32.mrb[155].mxu1 }
 0x4ae   : > { %v8581_v37 = vpop.eup %8580  ;;  %v3912_v22 = vadd.f32 %v10485_v3, %v3911_v7 }
 0x4af   : > { %v8583_v13 = vpop.eup %8582  ;;  %7690 = vmatprep.mubr.msk.f32.mxu0 %vm1408_vm2, %v8581_v37 }
 0x4b0   : > { %8592 = vtanh.f32 %v3912_v22  ;;  %v7584_v47 = vpop.f32.mrb[156].mxu1  ;;  %7691 = vmatmul.mubr.msk.f32.gmra.mrb[212].mxu0 %vm1408_vm2, %v8583_v13 }
 0x4b1   : > { %8594 = vtanh.f32 %v3917_v53  ;;  %v3927_v32 = vadd.f32 %v7584_v47, %v10485_v3  ;;  %v3921_v26 = vpop.f32.mrb[157].mxu1 }
 0x4b2   : > { %v8585_v25 = vpop.eup %8584  ;;  %v3922_v31 = vadd.f32 %v10485_v3, %v3921_v26 }
 0x4b3   : > { %v8587_v38 = vpop.eup %8586  ;;  %7693 = vmatprep.mubr.msk.f32.mxu0 %vm1408_vm2, %v8585_v25 }
 0x4b4   : > { %8596 = vtanh.f32 %v3922_v31  ;;  %v7587_v55 = vpop.f32.mrb[158].mxu1  ;;  %7694 = vmatmul.mubr.msk.f32.gmra.mrb[214].mxu0 %vm1408_vm2, %v8587_v38 }
 0x4b5   : > { %8598 = vtanh.f32 %v3927_v32  ;;  %v3937_v30 = vadd.f32 %v7587_v55, %v10485_v3  ;;  %v3931_v58 = vpop.f32.mrb[159].mxu1 }
 0x4b6   : > { %v8589_v17 = vpop.eup %8588  ;;  %v3932_v4 = vadd.f32 %v10485_v3, %v3931_v58 }
 0x4b7   : > { %v8591_v53 = vpop.eup %8590  ;;  %7696 = vmatprep.mubr.msk.f32.mxu0 %vm1408_vm2, %v8589_v17 }
 0x4b8   : > { %8600 = vtanh.f32 %v3932_v4  ;;  %v7590_v7 = vpop.f32.mrb[160].mxu1  ;;  %7697 = vmatmul.mubr.msk.f32.gmra.mrb[216].mxu0 %vm1408_vm2, %v8591_v53 }
 0x4b9   : > { %8602 = vtanh.f32 %v3937_v30  ;;  %v3947_v37 = vadd.f32 %v7590_v7, %v10485_v3  ;;  %v3941_v22 = vpop.f32.mrb[161].mxu1 }
 0x4ba   : > { %v8593_v13 = vpop.eup %8592  ;;  %v3942_v47 = vadd.f32 %v10485_v3, %v3941_v22 }
 0x4bb   : > { %v8595_v32 = vpop.eup %8594  ;;  %7699 = vmatprep.mubr.msk.f32.mxu0 %vm1408_vm2, %v8593_v13 }
 0x4bc   : > { %8604 = vtanh.f32 %v3942_v47  ;;  %v7593_v26 = vpop.f32.mrb[162].mxu1  ;;  %7700 = vmatmul.mubr.msk.f32.gmra.mrb[218].mxu0 %vm1408_vm2, %v8595_v32 }
 0x4bd   : > { %8606 = vtanh.f32 %v3947_v37  ;;  %v3957_v25 = vadd.f32 %v7593_v26, %v10485_v3  ;;  %v3951_v31 = vpop.f32.mrb[163].mxu1 }
 0x4be   : > { %v8597_v38 = vpop.eup %8596  ;;  %v3952_v55 = vadd.f32 %v10485_v3, %v3951_v31 }
 0x4bf   : > { %v8599_v30 = vpop.eup %8598  ;;  %7702 = vmatprep.mubr.msk.f32.mxu0 %vm1408_vm2, %v8597_v38 }
 0x4c0   : > { %8608 = vtanh.f32 %v3952_v55  ;;  %v7596_v58 = vpop.f32.mrb[164].mxu1  ;;  %7703 = vmatmul.mubr.msk.f32.gmra.mrb[220].mxu0 %vm1408_vm2, %v8599_v30 }
 0x4c1   : > { %8610 = vtanh.f32 %v3957_v25  ;;  %v3967_v17 = vadd.f32 %v7596_v58, %v10485_v3  ;;  %v3961_v4 = vpop.f32.mrb[165].mxu1 }
 0x4c2   : > { %v8601_v53 = vpop.eup %8600  ;;  %v3962_v7 = vadd.f32 %v10485_v3, %v3961_v4 }
 0x4c3   : > { %v8603_v37 = vpop.eup %8602  ;;  %7705 = vmatprep.mubr.msk.f32.mxu0 %vm1408_vm2, %v8601_v53 }
 0x4c4   : > { %8612 = vtanh.f32 %v3962_v7  ;;  %v7599_v22 = vpop.f32.mrb[166].mxu1  ;;  %7706 = vmatmul.mubr.msk.f32.gmra.mrb[222].mxu0 %vm1408_vm2, %v8603_v37 }
 0x4c5   : > { %8614 = vtanh.f32 %v3967_v17  ;;  %v3977_v13 = vadd.f32 %v7599_v22, %v10485_v3  ;;  %v3971_v47 = vpop.f32.mrb[167].mxu1 }
 0x4c6   : > { %v8605_v32 = vpop.eup %8604  ;;  %v3972_v26 = vadd.f32 %v10485_v3, %v3971_v47 }
 0x4c7   : > { %v8607_v25 = vpop.eup %8606  ;;  %7708 = vmatprep.mubr.msk.f32.mxu0 %vm1408_vm2, %v8605_v32 }
 0x4c8   : > { %8616 = vtanh.f32 %v3972_v26  ;;  %v7602_v31 = vpop.f32.mrb[168].mxu1  ;;  %7709 = vmatmul.mubr.msk.f32.gmra.mrb[224].mxu0 %vm1408_vm2, %v8607_v25 }
 0x4c9   : > { %8618 = vtanh.f32 %v3977_v13  ;;  %v3987_v38 = vadd.f32 %v7602_v31, %v10485_v3  ;;  %v3981_v55 = vpop.f32.mrb[169].mxu1 }
 0x4ca   : > { %v8609_v30 = vpop.eup %8608  ;;  %v3982_v58 = vadd.f32 %v10485_v3, %v3981_v55 }
 0x4cb   : > { %v8611_v17 = vpop.eup %8610  ;;  %7711 = vmatprep.mubr.msk.f32.mxu0 %vm1408_vm2, %v8609_v30 }
 0x4cc   : > { %8620 = vtanh.f32 %v3982_v58  ;;  %v7605_v4 = vpop.f32.mrb[170].mxu1  ;;  %7712 = vmatmul.mubr.msk.f32.gmra.mrb[226].mxu0 %vm1408_vm2, %v8611_v17 }
 0x4cd   : > { %8622 = vtanh.f32 %v3987_v38  ;;  %v3997_v53 = vadd.f32 %v7605_v4, %v10485_v3  ;;  %v3991_v7 = vpop.f32.mrb[171].mxu1 }
 0x4ce   : > { %v8613_v37 = vpop.eup %8612  ;;  %v3992_v22 = vadd.f32 %v10485_v3, %v3991_v7 }
 0x4cf   : > { %v8615_v13 = vpop.eup %8614  ;;  %7714 = vmatprep.mubr.msk.f32.mxu0 %vm1408_vm2, %v8613_v37 }
 0x4d0   : > { %8624 = vtanh.f32 %v3992_v22  ;;  %v7608_v47 = vpop.f32.mrb[172].mxu1  ;;  %7715 = vmatmul.mubr.msk.f32.gmra.mrb[228].mxu0 %vm1408_vm2, %v8615_v13 }
 0x4d1   : > { %8626 = vtanh.f32 %v3997_v53  ;;  %v4007_v32 = vadd.f32 %v7608_v47, %v10485_v3  ;;  %v4001_v26 = vpop.f32.mrb[173].mxu1 }
 0x4d2   : > { %v8617_v25 = vpop.eup %8616  ;;  %v4002_v31 = vadd.f32 %v10485_v3, %v4001_v26 }
 0x4d3   : > { %v8619_v38 = vpop.eup %8618  ;;  %7717 = vmatprep.mubr.msk.f32.mxu0 %vm1408_vm2, %v8617_v25 }
 0x4d4   : > { %8628 = vtanh.f32 %v4002_v31  ;;  %v7611_v55 = vpop.f32.mrb[174].mxu1  ;;  %7718 = vmatmul.mubr.msk.f32.gmra.mrb[230].mxu0 %vm1408_vm2, %v8619_v38 }
 0x4d5   : > { %8630 = vtanh.f32 %v4007_v32  ;;  %v4017_v30 = vadd.f32 %v7611_v55, %v10485_v3  ;;  %v4011_v58 = vpop.f32.mrb[175].mxu1 }
 0x4d6   : > { %v8621_v17 = vpop.eup %8620  ;;  %v4012_v4 = vadd.f32 %v10485_v3, %v4011_v58 }
 0x4d7   : > { %v8623_v53 = vpop.eup %8622  ;;  %7720 = vmatprep.mubr.msk.f32.mxu0 %vm1408_vm2, %v8621_v17 }
 0x4d8   : > { %8632 = vtanh.f32 %v4012_v4  ;;  %v7614_v7 = vpop.f32.mrb[176].mxu1  ;;  %7721 = vmatmul.mubr.msk.f32.gmra.mrb[232].mxu0 %vm1408_vm2, %v8623_v53 }
 0x4d9   : > { %8634 = vtanh.f32 %v4017_v30  ;;  %v4027_v37 = vadd.f32 %v7614_v7, %v10485_v3  ;;  %v4021_v22 = vpop.f32.mrb[177].mxu1 }
 0x4da   : > { %v8625_v13 = vpop.eup %8624  ;;  %v4022_v47 = vadd.f32 %v10485_v3, %v4021_v22 }
 0x4db   : > { %v8627_v32 = vpop.eup %8626  ;;  %7723 = vmatprep.mubr.msk.f32.mxu0 %vm1408_vm2, %v8625_v13 }
 0x4dc   : > { %8636 = vtanh.f32 %v4022_v47  ;;  %v7617_v26 = vpop.f32.mrb[178].mxu1  ;;  %7724 = vmatmul.mubr.msk.f32.gmra.mrb[234].mxu0 %vm1408_vm2, %v8627_v32 }
 0x4dd   : > { %8638 = vtanh.f32 %v4027_v37  ;;  %v4037_v25 = vadd.f32 %v7617_v26, %v10485_v3  ;;  %v4031_v31 = vpop.f32.mrb[179].mxu1 }
 0x4de   : > { %v8629_v38 = vpop.eup %8628  ;;  %v4032_v55 = vadd.f32 %v10485_v3, %v4031_v31 }
 0x4df   : > { %v8631_v30 = vpop.eup %8630  ;;  %7726 = vmatprep.mubr.msk.f32.mxu0 %vm1408_vm2, %v8629_v38 }
 0x4e0   : > { %8640 = vtanh.f32 %v4032_v55  ;;  %v7620_v58 = vpop.f32.mrb[180].mxu1  ;;  %7727 = vmatmul.mubr.msk.f32.gmra.mrb[236].mxu0 %vm1408_vm2, %v8631_v30 }
 0x4e1   : > { %8642 = vtanh.f32 %v4037_v25  ;;  %v4047_v17 = vadd.f32 %v7620_v58, %v10485_v3  ;;  %v4041_v4 = vpop.f32.mrb[181].mxu1 }
 0x4e2   : > { %v8633_v53 = vpop.eup %8632  ;;  %v4042_v7 = vadd.f32 %v10485_v3, %v4041_v4 }
 0x4e3   : > { %v8635_v37 = vpop.eup %8634  ;;  %7729 = vmatprep.mubr.msk.f32.mxu0 %vm1408_vm2, %v8633_v53 }
 0x4e4   : > { %8644 = vtanh.f32 %v4042_v7  ;;  %v7623_v22 = vpop.f32.mrb[182].mxu1  ;;  %7730 = vmatmul.mubr.msk.f32.gmra.mrb[238].mxu0 %vm1408_vm2, %v8635_v37 }
 0x4e5   : > { %8646 = vtanh.f32 %v4047_v17  ;;  %v4057_v13 = vadd.f32 %v7623_v22, %v10485_v3  ;;  %v4051_v47 = vpop.f32.mrb[183].mxu1 }
 0x4e6   : > { %v8637_v32 = vpop.eup %8636  ;;  %v4052_v26 = vadd.f32 %v10485_v3, %v4051_v47 }
 0x4e7   : > { %v8639_v25 = vpop.eup %8638  ;;  %7732 = vmatprep.mubr.msk.f32.mxu0 %vm1408_vm2, %v8637_v32 }
 0x4e8   : > { %8648 = vtanh.f32 %v4052_v26  ;;  %v7626_v31 = vpop.f32.mrb[184].mxu1  ;;  %7733 = vmatmul.mubr.msk.f32.gmra.mrb[240].mxu0 %vm1408_vm2, %v8639_v25 }
 0x4e9   : > { %8650 = vtanh.f32 %v4057_v13  ;;  %v4067_v38 = vadd.f32 %v7626_v31, %v10485_v3  ;;  %v4061_v55 = vpop.f32.mrb[185].mxu1 }
 0x4ea   : > { %v8641_v30 = vpop.eup %8640  ;;  %v4062_v58 = vadd.f32 %v10485_v3, %v4061_v55 }
 0x4eb   : > { %v8643_v17 = vpop.eup %8642  ;;  %7735 = vmatprep.mubr.msk.f32.mxu0 %vm1408_vm2, %v8641_v30 }
 0x4ec   : > { %8652 = vtanh.f32 %v4062_v58  ;;  %v7629_v4 = vpop.f32.mrb[186].mxu1  ;;  %7736 = vmatmul.mubr.msk.f32.gmra.mrb[242].mxu0 %vm1408_vm2, %v8643_v17 }
 0x4ed   : > { %8654 = vtanh.f32 %v4067_v38  ;;  %v4077_v53 = vadd.f32 %v7629_v4, %v10485_v3  ;;  %v4071_v7 = vpop.f32.mrb[187].mxu1 }
 0x4ee   : > { %v8645_v37 = vpop.eup %8644  ;;  %v4072_v22 = vadd.f32 %v10485_v3, %v4071_v7 }
 0x4ef   : > { %v8647_v13 = vpop.eup %8646  ;;  %7738 = vmatprep.mubr.msk.f32.mxu0 %vm1408_vm2, %v8645_v37 }
 0x4f0   : > { %8656 = vtanh.f32 %v4072_v22  ;;  %v7632_v47 = vpop.f32.mrb[188].mxu1  ;;  %7739 = vmatmul.mubr.msk.f32.gmra.mrb[244].mxu0 %vm1408_vm2, %v8647_v13 }
 0x4f1   : > { %8658 = vtanh.f32 %v4077_v53  ;;  %v4087_v32 = vadd.f32 %v7632_v47, %v10485_v3  ;;  %v4081_v26 = vpop.f32.mrb[189].mxu1 }
 0x4f2   : > { %v8649_v25 = vpop.eup %8648  ;;  %v4082_v31 = vadd.f32 %v10485_v3, %v4081_v26 }
 0x4f3   : > { %v8651_v38 = vpop.eup %8650  ;;  %7741 = vmatprep.mubr.msk.f32.mxu0 %vm1408_vm2, %v8649_v25 }
 0x4f4   : > { %8660 = vtanh.f32 %v4082_v31  ;;  %v7635_v55 = vpop.f32.mrb[190].mxu1  ;;  %7742 = vmatmul.mubr.msk.f32.gmra.mrb[246].mxu0 %vm1408_vm2, %v8651_v38 }
 0x4f5   : > { %8662 = vtanh.f32 %v4087_v32  ;;  %v4097_v30 = vadd.f32 %v7635_v55, %v10485_v3  ;;  %v4091_v58 = vpop.f32.mrb[191].mxu1  ;;  %v10648_v32 = vld [vmem:[%s11049_s5 + $0x4] ss:$0 sm:$0xff] }
 0x4f6   : > { %v8653_v17 = vpop.eup %8652  ;;  %v4092_v4 = vadd.f32 %v10485_v3, %v4091_v58 }
 0x4f7   : > { %v8655_v53 = vpop.eup %8654  ;;  %7744 = vmatprep.mubr.msk.f32.mxu0 %vm1408_vm2, %v8653_v17 }
 0x4f8   : > { %8664 = vtanh.f32 %v4092_v4  ;;  %7745 = vmatmul.mubr.msk.f32.gmra.mrb[248].mxu0 %vm1408_vm2, %v8655_v53 }
 0x4f9   : > { %8666 = vtanh.f32 %v4097_v30 }
 0x4fa   : > { %v8657_v7 = vpop.eup %8656 }
 0x4fb   : > { %v8659_v37 = vpop.eup %8658  ;;  %7747 = vmatprep.mubr.msk.f32.mxu0 %vm1408_vm2, %v8657_v7 }
 0x4fc   : > { %7748 = vmatmul.mubr.msk.f32.gmra.mrb[250].mxu0 %vm1408_vm2, %v8659_v37 }
 0x4fe   : > { %v8661_v22 = vpop.eup %8660 }
 0x4ff   : > { %v8663_v13 = vpop.eup %8662  ;;  %7750 = vmatprep.mubr.msk.f32.mxu0 %vm1408_vm2, %v8661_v22 }
 0x500   : > { %7751 = vmatmul.mubr.msk.f32.gmra.mrb[252].mxu0 %vm1408_vm2, %v8663_v13 }
 0x502   : > { %v8665_v3 = vpop.eup %8664 }
 0x503   : > { %v8667_v47 = vpop.eup %8666  ;;  %7753 = vmatprep.mubr.msk.f32.mxu0 %vm1408_vm2, %v8665_v3 }
 0x504   : > { %7754 = vmatmul.mubr.msk.f32.gmra.mrb[254].mxu0 %vm1408_vm2, %v8667_v47 }
 0x55b   : > { %v7662_v26 = vpop.f32.mrb[192].mxu0 }
 0x55c   : > { %v4449_v25 = vadd.f32 %v7662_v26, %v10648_v32  ;;  %v4443_v31 = vpop.f32.mrb[193].mxu0 }
 0x55d   : > { %v4444_v38 = vadd.f32 %v10648_v32, %v4443_v31  ;;  %v11165_v31 = vld [vmem:[#allocation17_spill] sm:$0xff] }
 0x55e   : > { %8668 = vtanh.f32 %v4449_v25 }
 0x55f   : > { %8670 = vtanh.f32 %v4444_v38  ;;  %v7665_v55 = vpop.f32.mrb[194].mxu0 }
 0x560   : > { %v4459_v30 = vadd.f32 %v7665_v55, %v10648_v32  ;;  %v4453_v58 = vpop.f32.mrb[195].mxu0  ;;  %v11166_v55 = vld [vmem:[#allocation16_spill] sm:$0xff] }
 0x561   : > { %v4454_v17 = vadd.f32 %v10648_v32, %v4453_v58 }
 0x562   : > { %8672 = vtanh.f32 %v4459_v30 }
 0x563   : > { %8674 = vtanh.f32 %v4454_v17  ;;  %v7668_v4 = vpop.f32.mrb[196].mxu0 }
 0x564   : > { %v4469_v53 = vadd.f32 %v7668_v4, %v10648_v32  ;;  %v4463_v7 = vpop.f32.mrb[197].mxu0 }
 0x565   : > { %v4464_v37 = vadd.f32 %v10648_v32, %v4463_v7 }
 0x566   : > { %8676 = vtanh.f32 %v4469_v53 }
 0x567   : > { %8678 = vtanh.f32 %v4464_v37  ;;  %v7671_v22 = vpop.f32.mrb[198].mxu0 }
 0x568   : > { %v8669_v13 = vpop.eup %8668  ;;  %v4479_v3 = vadd.f32 %v7671_v22, %v10648_v32  ;;  %v4473_v47 = vpop.f32.mrb[199].mxu0  ;;  %v11167_v22 = vld [vmem:[#allocation18_spill] sm:$0xff] }
 0x569   : > { %v8671_v26 = vpop.eup %8670  ;;  %v4474_v25 = vadd.f32 %v10648_v32, %v4473_v47  ;;  %v4827_v30 = vadd.f32 %v8669_v13, %v11166_v55 }
 0x56a   : > { %8680 = vtanh.f32 %v4479_v3  ;;  %v4826_v38 = vadd.f32 %v8671_v26, %v11165_v31 }
 0x56b   : > { %8682 = vtanh.f32 %v4474_v25  ;;  %v7674_v58 = vpop.f32.mrb[200].mxu0 }
 0x56c   : > { %v8673_v17 = vpop.eup %8672  ;;  %v4489_v4 = vadd.f32 %v7674_v58, %v10648_v32  ;;  %v4483_v53 = vpop.f32.mrb[201].mxu0  ;;  %7780 = vmatprep.mubr.msk.f32.mxu1 %vm1408_vm2, %v4826_v38 }
 0x56d   : > { %v8675_v7 = vpop.eup %8674  ;;  %v4484_v37 = vadd.f32 %v10648_v32, %v4483_v53  ;;  %7781 = vmatmul.mubr.msk.f32.vlgmr.msra.gmra.mrb[192].mxu1 %vm1408_vm2, %v4827_v30  ;;  %v4829_v13 = vadd.f32 %v8673_v17, %v10110_v57 }
 0x56e   : > { %8684 = vtanh.f32 %v4489_v4  ;;  %v4828_v3 = vadd.f32 %v8675_v7, %v11167_v22 }
 0x56f   : > { %8686 = vtanh.f32 %v4484_v37  ;;  %v7677_v47 = vpop.f32.mrb[202].mxu0 }
 0x570   : > { %v8677_v26 = vpop.eup %8676  ;;  %v4499_v25 = vadd.f32 %v7677_v47, %v10648_v32  ;;  %v4493_v31 = vpop.f32.mrb[203].mxu0  ;;  %7783 = vmatprep.mubr.msk.f32.mxu1 %vm1408_vm2, %v4828_v3 }
 0x571   : > { %v8679_v55 = vpop.eup %8678  ;;  %v4494_v38 = vadd.f32 %v10648_v32, %v4493_v31  ;;  %7784 = vmatmul.mubr.msk.f32.gmra.mrb[194].mxu1 %vm1408_vm2, %v4829_v13  ;;  %v4831_v4 = vadd.f32 %v8677_v26, %v10128_v20 }
 0x572   : > { %8688 = vtanh.f32 %v4499_v25  ;;  %v4830_v30 = vadd.f32 %v8679_v55, %v10125_v2 }
 0x573   : > { %8690 = vtanh.f32 %v4494_v38  ;;  %v7680_v58 = vpop.f32.mrb[204].mxu0 }
 0x574   : > { %v8681_v53 = vpop.eup %8680  ;;  %v4509_v57 = vadd.f32 %v7680_v58, %v10648_v32  ;;  %v4503_v17 = vpop.f32.mrb[205].mxu0  ;;  %7786 = vmatprep.mubr.msk.f32.mxu1 %vm1408_vm2, %v4830_v30 }
 0x575   : > { %v8683_v7 = vpop.eup %8682  ;;  %v4504_v37 = vadd.f32 %v10648_v32, %v4503_v17  ;;  %7787 = vmatmul.mubr.msk.f32.gmra.mrb[196].mxu1 %vm1408_vm2, %v4831_v4  ;;  %v4833_v3 = vadd.f32 %v8681_v53, %v10140_v6 }
 0x576   : > { %8692 = vtanh.f32 %v4509_v57  ;;  %v4832_v22 = vadd.f32 %v8683_v7, %v10137_v11 }
 0x577   : > { %8694 = vtanh.f32 %v4504_v37  ;;  %v7683_v2 = vpop.f32.mrb[206].mxu0 }
 0x578   : > { %v8685_v47 = vpop.eup %8684  ;;  %v4519_v20 = vadd.f32 %v7683_v2, %v10648_v32  ;;  %v4513_v13 = vpop.f32.mrb[207].mxu0  ;;  %7789 = vmatprep.mubr.msk.f32.mxu1 %vm1408_vm2, %v4832_v22 }
 0x579   : > { %v8687_v26 = vpop.eup %8686  ;;  %v4514_v25 = vadd.f32 %v10648_v32, %v4513_v13  ;;  %7790 = vmatmul.mubr.msk.f32.gmra.mrb[198].mxu1 %vm1408_vm2, %v4833_v3  ;;  %v4835_v55 = vadd.f32 %v8685_v47, %v10152_v28 }
 0x57a   : > { %8696 = vtanh.f32 %v4519_v20  ;;  %v4834_v31 = vadd.f32 %v8687_v26, %v10149_v41 }
 0x57b   : > { %8698 = vtanh.f32 %v4514_v25  ;;  %v7686_v11 = vpop.f32.mrb[208].mxu0 }
 0x57c   : > { %v8689_v38 = vpop.eup %8688  ;;  %v4529_v6 = vadd.f32 %v7686_v11, %v10648_v32  ;;  %v4523_v30 = vpop.f32.mrb[209].mxu0  ;;  %7792 = vmatprep.mubr.msk.f32.mxu1 %vm1408_vm2, %v4834_v31 }
 0x57d   : > { %v8691_v58 = vpop.eup %8690  ;;  %v4524_v4 = vadd.f32 %v10648_v32, %v4523_v30  ;;  %7793 = vmatmul.mubr.msk.f32.gmra.mrb[200].mxu1 %vm1408_vm2, %v4835_v55  ;;  %v4837_v57 = vadd.f32 %v8689_v38, %v10164_v51 }
 0x57e   : > { %8700 = vtanh.f32 %v4529_v6  ;;  %v4836_v53 = vadd.f32 %v8691_v58, %v10161_v52 }
 0x57f   : > { %8702 = vtanh.f32 %v4524_v4  ;;  %v7689_v41 = vpop.f32.mrb[210].mxu0 }
 0x580   : > { %v8693_v17 = vpop.eup %8692  ;;  %v4539_v28 = vadd.f32 %v7689_v41, %v10648_v32  ;;  %v4533_v7 = vpop.f32.mrb[211].mxu0  ;;  %7795 = vmatprep.mubr.msk.f32.mxu1 %vm1408_vm2, %v4836_v53 }
 0x581   : > { %v8695_v37 = vpop.eup %8694  ;;  %v4534_v22 = vadd.f32 %v10648_v32, %v4533_v7  ;;  %7796 = vmatmul.mubr.msk.f32.gmra.mrb[202].mxu1 %vm1408_vm2, %v4837_v57  ;;  %v4839_v3 = vadd.f32 %v8693_v17, %v10176_v49 }
 0x582   : > { %8704 = vtanh.f32 %v4539_v28  ;;  %v4838_v2 = vadd.f32 %v8695_v37, %v10173_v1 }
 0x583   : > { %8706 = vtanh.f32 %v4534_v22  ;;  %v7692_v52 = vpop.f32.mrb[212].mxu0 }
 0x584   : > { %v8697_v47 = vpop.eup %8696  ;;  %v4549_v51 = vadd.f32 %v7692_v52, %v10648_v32  ;;  %v4543_v20 = vpop.f32.mrb[213].mxu0  ;;  %7798 = vmatprep.mubr.msk.f32.mxu1 %vm1408_vm2, %v4838_v2 }
 0x585   : > { %v8699_v13 = vpop.eup %8698  ;;  %v4544_v26 = vadd.f32 %v10648_v32, %v4543_v20  ;;  %7799 = vmatmul.mubr.msk.f32.gmra.mrb[204].mxu1 %vm1408_vm2, %v4839_v3  ;;  %v4841_v31 = vadd.f32 %v8697_v47, %v10188_v34 }
 0x586   : > { %8708 = vtanh.f32 %v4549_v51  ;;  %v4840_v25 = vadd.f32 %v8699_v13, %v10185_v12 }
 0x587   : > { %8710 = vtanh.f32 %v4544_v26  ;;  %v7695_v1 = vpop.f32.mrb[214].mxu0 }
 0x588   : > { %v8701_v11 = vpop.eup %8700  ;;  %v4559_v49 = vadd.f32 %v7695_v1, %v10648_v32  ;;  %v4553_v55 = vpop.f32.mrb[215].mxu0  ;;  %7801 = vmatprep.mubr.msk.f32.mxu1 %vm1408_vm2, %v4840_v25 }
 0x589   : > { %v8703_v38 = vpop.eup %8702  ;;  %v4554_v6 = vadd.f32 %v10648_v32, %v4553_v55  ;;  %7802 = vmatmul.mubr.msk.f32.gmra.mrb[206].mxu1 %vm1408_vm2, %v4841_v31  ;;  %v4843_v58 = vadd.f32 %v8701_v11, %v10200_v36 }
 0x58a   : > { %8712 = vtanh.f32 %v4559_v49  ;;  %v4842_v30 = vadd.f32 %v8703_v38, %v10197_v21 }
 0x58b   : > { %8714 = vtanh.f32 %v4554_v6  ;;  %v7698_v12 = vpop.f32.mrb[216].mxu0 }
 0x58c   : > { %v8705_v4 = vpop.eup %8704  ;;  %v4569_v34 = vadd.f32 %v7698_v12, %v10648_v32  ;;  %v4563_v53 = vpop.f32.mrb[217].mxu0  ;;  %7804 = vmatprep.mubr.msk.f32.mxu1 %vm1408_vm2, %v4842_v30 }
 0x58d   : > { %v8707_v41 = vpop.eup %8706  ;;  %v4564_v57 = vadd.f32 %v10648_v32, %v4563_v53  ;;  %7805 = vmatmul.mubr.msk.f32.gmra.mrb[208].mxu1 %vm1408_vm2, %v4843_v58  ;;  %v4845_v28 = vadd.f32 %v8705_v4, %v10212_v16 }
 0x58e   : > { %8716 = vtanh.f32 %v4569_v34  ;;  %v4844_v17 = vadd.f32 %v8707_v41, %v10209_v33 }
 0x58f   : > { %8718 = vtanh.f32 %v4564_v57  ;;  %v7701_v21 = vpop.f32.mrb[218].mxu0 }
 0x590   : > { %v8709_v7 = vpop.eup %8708  ;;  %v4579_v36 = vadd.f32 %v7701_v21, %v10648_v32  ;;  %v4573_v37 = vpop.f32.mrb[219].mxu0  ;;  %7807 = vmatprep.mubr.msk.f32.mxu1 %vm1408_vm2, %v4844_v17 }
 0x591   : > { %v8711_v22 = vpop.eup %8710  ;;  %v4574_v2 = vadd.f32 %v10648_v32, %v4573_v37  ;;  %7808 = vmatmul.mubr.msk.f32.gmra.mrb[210].mxu1 %vm1408_vm2, %v4845_v28  ;;  %v4847_v3 = vadd.f32 %v8709_v7, %v10224_v23 }
 0x592   : > { %8720 = vtanh.f32 %v4579_v36  ;;  %v4846_v52 = vadd.f32 %v8711_v22, %v10221_v44 }
 0x593   : > { %8722 = vtanh.f32 %v4574_v2  ;;  %v7704_v33 = vpop.f32.mrb[220].mxu0 }
 0x594   : > { %v8713_v47 = vpop.eup %8712  ;;  %v4589_v16 = vadd.f32 %v7704_v33, %v10648_v32  ;;  %v4583_v51 = vpop.f32.mrb[221].mxu0  ;;  %7810 = vmatprep.mubr.msk.f32.mxu1 %vm1408_vm2, %v4846_v52 }
 0x595   : > { %v8715_v20 = vpop.eup %8714  ;;  %v4584_v13 = vadd.f32 %v10648_v32, %v4583_v51  ;;  %7811 = vmatmul.mubr.msk.f32.gmra.mrb[212].mxu1 %vm1408_vm2, %v4847_v3  ;;  %v4849_v25 = vadd.f32 %v8713_v47, %v10236_v42 }
 0x596   : > { %8724 = vtanh.f32 %v4589_v16  ;;  %v4848_v26 = vadd.f32 %v8715_v20, %v10233_v54 }
 0x597   : > { %8726 = vtanh.f32 %v4584_v13  ;;  %v7707_v44 = vpop.f32.mrb[222].mxu0 }
 0x598   : > { %v8717_v1 = vpop.eup %8716  ;;  %v4599_v23 = vadd.f32 %v7707_v44, %v10648_v32  ;;  %v4593_v31 = vpop.f32.mrb[223].mxu0  ;;  %7813 = vmatprep.mubr.msk.f32.mxu1 %vm1408_vm2, %v4848_v26 }
 0x599   : > { %v8719_v11 = vpop.eup %8718  ;;  %v4594_v49 = vadd.f32 %v10648_v32, %v4593_v31  ;;  %7814 = vmatmul.mubr.msk.f32.gmra.mrb[214].mxu1 %vm1408_vm2, %v4849_v25  ;;  %v4851_v38 = vadd.f32 %v8717_v1, %v10248_v46 }
 0x59a   : > { %8728 = vtanh.f32 %v4599_v23  ;;  %v4850_v55 = vadd.f32 %v8719_v11, %v10245_v63 }
 0x59b   : > { %8730 = vtanh.f32 %v4594_v49  ;;  %v7710_v54 = vpop.f32.mrb[224].mxu0 }
 0x59c   : > { %v8721_v6 = vpop.eup %8720  ;;  %v4609_v42 = vadd.f32 %v7710_v54, %v10648_v32  ;;  %v4603_v30 = vpop.f32.mrb[225].mxu0  ;;  %7816 = vmatprep.mubr.msk.f32.mxu1 %vm1408_vm2, %v4850_v55 }
 0x59d   : > { %v8723_v12 = vpop.eup %8722  ;;  %v4604_v58 = vadd.f32 %v10648_v32, %v4603_v30  ;;  %7817 = vmatmul.mubr.msk.f32.gmra.mrb[216].mxu1 %vm1408_vm2, %v4851_v38  ;;  %v4853_v34 = vadd.f32 %v8721_v6, %v10260_v62 }
 0x59e   : > { %8732 = vtanh.f32 %v4609_v42  ;;  %v4852_v4 = vadd.f32 %v8723_v12, %v10257_v8 }
 0x59f   : > { %8734 = vtanh.f32 %v4604_v58  ;;  %v7713_v63 = vpop.f32.mrb[226].mxu0 }
 0x5a0   : > { %v8725_v53 = vpop.eup %8724  ;;  %v4619_v46 = vadd.f32 %v7713_v63, %v10648_v32  ;;  %v4613_v41 = vpop.f32.mrb[227].mxu0  ;;  %7819 = vmatprep.mubr.msk.f32.mxu1 %vm1408_vm2, %v4852_v4 }
 0x5a1   : > { %v8727_v57 = vpop.eup %8726  ;;  %v4614_v17 = vadd.f32 %v10648_v32, %v4613_v41  ;;  %7820 = vmatmul.mubr.msk.f32.gmra.mrb[218].mxu1 %vm1408_vm2, %v4853_v34  ;;  %v4855_v28 = vadd.f32 %v8725_v53, %v10272_v9 }
 0x5a2   : > { %8736 = vtanh.f32 %v4619_v46  ;;  %v4854_v21 = vadd.f32 %v8727_v57, %v10269_v19 }
 0x5a3   : > { %8738 = vtanh.f32 %v4614_v17  ;;  %v7716_v8 = vpop.f32.mrb[228].mxu0 }
 0x5a4   : > { %v8729_v7 = vpop.eup %8728  ;;  %v4629_v62 = vadd.f32 %v7716_v8, %v10648_v32  ;;  %v4623_v36 = vpop.f32.mrb[229].mxu0  ;;  %7822 = vmatprep.mubr.msk.f32.mxu1 %vm1408_vm2, %v4854_v21 }
 0x5a5   : > { %v8731_v37 = vpop.eup %8730  ;;  %v4624_v22 = vadd.f32 %v10648_v32, %v4623_v36  ;;  %7823 = vmatmul.mubr.msk.f32.gmra.mrb[220].mxu1 %vm1408_vm2, %v4855_v28  ;;  %v4857_v52 = vadd.f32 %v8729_v7, %v10284_v18 }
 0x5a6   : > { %8740 = vtanh.f32 %v4629_v62  ;;  %v4856_v2 = vadd.f32 %v8731_v37, %v10281_v35 }
 0x5a7   : > { %8742 = vtanh.f32 %v4624_v22  ;;  %v7719_v19 = vpop.f32.mrb[230].mxu0 }
 0x5a8   : > { %v8733_v33 = vpop.eup %8732  ;;  %v4639_v9 = vadd.f32 %v7719_v19, %v10648_v32  ;;  %v4633_v3 = vpop.f32.mrb[231].mxu0  ;;  %7825 = vmatprep.mubr.msk.f32.mxu1 %vm1408_vm2, %v4856_v2 }
 0x5a9   : > { %v8735_v47 = vpop.eup %8734  ;;  %v4634_v16 = vadd.f32 %v10648_v32, %v4633_v3  ;;  %7826 = vmatmul.mubr.msk.f32.gmra.mrb[222].mxu1 %vm1408_vm2, %v4857_v52  ;;  %v4859_v20 = vadd.f32 %v8733_v33, %v10296_v29 }
 0x5aa   : > { %8744 = vtanh.f32 %v4639_v9  ;;  %v4858_v51 = vadd.f32 %v8735_v47, %v10293_v48 }
 0x5ab   : > { %8746 = vtanh.f32 %v4634_v16  ;;  %v7722_v35 = vpop.f32.mrb[232].mxu0 }
 0x5ac   : > { %v8737_v13 = vpop.eup %8736  ;;  %v4649_v18 = vadd.f32 %v7722_v35, %v10648_v32  ;;  %v4643_v26 = vpop.f32.mrb[233].mxu0  ;;  %7828 = vmatprep.mubr.msk.f32.mxu1 %vm1408_vm2, %v4858_v51 }
 0x5ad   : > { %v8739_v44 = vpop.eup %8738  ;;  %v4644_v25 = vadd.f32 %v10648_v32, %v4643_v26  ;;  %7829 = vmatmul.mubr.msk.f32.gmra.mrb[224].mxu1 %vm1408_vm2, %v4859_v20  ;;  %v4861_v23 = vadd.f32 %v8737_v13, %v10308_v40 }
 0x5ae   : > { %8748 = vtanh.f32 %v4649_v18  ;;  %v4860_v1 = vadd.f32 %v8739_v44, %v10305_v60 }
 0x5af   : > { %8750 = vtanh.f32 %v4644_v25  ;;  %v7725_v48 = vpop.f32.mrb[234].mxu0 }
 0x5b0   : > { %v8741_v31 = vpop.eup %8740  ;;  %v4659_v29 = vadd.f32 %v7725_v48, %v10648_v32  ;;  %v4653_v11 = vpop.f32.mrb[235].mxu0  ;;  %7831 = vmatprep.mubr.msk.f32.mxu1 %vm1408_vm2, %v4860_v1 }
 0x5b1   : > { %v8743_v49 = vpop.eup %8742  ;;  %v4654_v55 = vadd.f32 %v10648_v32, %v4653_v11  ;;  %7832 = vmatmul.mubr.msk.f32.gmra.mrb[226].mxu1 %vm1408_vm2, %v4861_v23  ;;  %v4863_v38 = vadd.f32 %v8741_v31, %v10320_v50  ;;  %v11168_v31 = vld [vmem:[#allocation3_spill] sm:$0xff]  ;;  %v11169_v11 = vld [vmem:[#allocation2_spill] sm:$0xff] }
 0x5b2   : > { %8752 = vtanh.f32 %v4659_v29  ;;  %v4862_v54 = vadd.f32 %v8743_v49, %v10317_v10 }
 0x5b3   : > { %8754 = vtanh.f32 %v4654_v55  ;;  %v7728_v60 = vpop.f32.mrb[236].mxu0 }
 0x5b4   : > { %v8745_v6 = vpop.eup %8744  ;;  %v4669_v40 = vadd.f32 %v7728_v60, %v10648_v32  ;;  %v4663_v42 = vpop.f32.mrb[237].mxu0  ;;  %7834 = vmatprep.mubr.msk.f32.mxu1 %vm1408_vm2, %v4862_v54 }
 0x5b5   : > { %v8747_v30 = vpop.eup %8746  ;;  %v4664_v12 = vadd.f32 %v10648_v32, %v4663_v42  ;;  %7835 = vmatmul.mubr.msk.f32.gmra.mrb[228].mxu1 %vm1408_vm2, %v4863_v38  ;;  %v4865_v4 = vadd.f32 %v8745_v6, %v10332_v59  ;;  %v11170_v6 = vld [vmem:[#allocation5_spill] sm:$0xff] }
 0x5b6   : > { %8756 = vtanh.f32 %v4669_v40  ;;  %v4864_v58 = vadd.f32 %v8747_v30, %v10329_v24  ;;  %v11171_v30 = vld [vmem:[#allocation4_spill] sm:$0xff] }
 0x5b7   : > { %8758 = vtanh.f32 %v4664_v12  ;;  %v7731_v10 = vpop.f32.mrb[238].mxu0 }
 0x5b8   : > { %v8749_v63 = vpop.eup %8748  ;;  %v4679_v50 = vadd.f32 %v7731_v10, %v10648_v32  ;;  %v4673_v34 = vpop.f32.mrb[239].mxu0  ;;  %7837 = vmatprep.mubr.msk.f32.mxu1 %vm1408_vm2, %v4864_v58 }
 0x5b9   : > { %v8751_v53 = vpop.eup %8750  ;;  %v4674_v46 = vadd.f32 %v10648_v32, %v4673_v34  ;;  %7838 = vmatmul.mubr.msk.f32.gmra.mrb[230].mxu1 %vm1408_vm2, %v4865_v4  ;;  %v4867_v57 = vadd.f32 %v8749_v63, %v10344_v5  ;;  %v11172_v34 = vld [vmem:[#allocation7_spill] sm:$0xff] }
 0x5ba   : > { %8760 = vtanh.f32 %v4679_v50  ;;  %v4866_v41 = vadd.f32 %v8751_v53, %v10341_v45 }
 0x5bb   : > { %8762 = vtanh.f32 %v4674_v46  ;;  %v7734_v24 = vpop.f32.mrb[240].mxu0 }
 0x5bc   : > { %v8753_v17 = vpop.eup %8752  ;;  %v4689_v59 = vadd.f32 %v7734_v24, %v10648_v32  ;;  %v4683_v21 = vpop.f32.mrb[241].mxu0  ;;  %7840 = vmatprep.mubr.msk.f32.mxu1 %vm1408_vm2, %v4866_v41  ;;  %v11173_v41 = vld [vmem:[#allocation6_spill] sm:$0xff] }
 0x5bd   : > { %v8755_v8 = vpop.eup %8754  ;;  %v4684_v28 = vadd.f32 %v10648_v32, %v4683_v21  ;;  %7841 = vmatmul.mubr.msk.f32.gmra.mrb[232].mxu1 %vm1408_vm2, %v4867_v57  ;;  %v4869_v62 = vadd.f32 %v8753_v17, %v10356_v15 }
 0x5be   : > { %8764 = vtanh.f32 %v4689_v59  ;;  %v4868_v7 = vadd.f32 %v8755_v8, %v10353_v61 }
 0x5bf   : > { %8766 = vtanh.f32 %v4684_v28  ;;  %v7737_v45 = vpop.f32.mrb[242].mxu0  ;;  %v11174_v28 = vld [vmem:[#allocation9_spill] sm:$0xff] }
 0x5c0   : > { %v8757_v36 = vpop.eup %8756  ;;  %v4699_v5 = vadd.f32 %v7737_v45, %v10648_v32  ;;  %v4693_v37 = vpop.f32.mrb[243].mxu0  ;;  %7843 = vmatprep.mubr.msk.f32.mxu1 %vm1408_vm2, %v4868_v7  ;;  %v11175_v45 = vld [vmem:[#allocation8_spill] sm:$0xff] }
 0x5c1   : > { %v8759_v22 = vpop.eup %8758  ;;  %v4694_v2 = vadd.f32 %v10648_v32, %v4693_v37  ;;  %7844 = vmatmul.mubr.msk.f32.gmra.mrb[234].mxu1 %vm1408_vm2, %v4869_v62  ;;  %v4871_v52 = vadd.f32 %v8757_v36, %v10368_v27  ;;  %v11176_v37 = vld [vmem:[#allocation11_spill] sm:$0xff] }
 0x5c2   : > { %8768 = vtanh.f32 %v4699_v5  ;;  %v4870_v19 = vadd.f32 %v8759_v22, %v10365_v14 }
 0x5c3   : > { %8770 = vtanh.f32 %v4694_v2  ;;  %v7740_v61 = vpop.f32.mrb[244].mxu0  ;;  %v11177_v2 = vld [vmem:[#allocation10_spill] sm:$0xff] }
 0x5c4   : > { %v8761_v33 = vpop.eup %8760  ;;  %v4709_v15 = vadd.f32 %v7740_v61, %v10648_v32  ;;  %v4703_v9 = vpop.f32.mrb[245].mxu0  ;;  %7846 = vmatprep.mubr.msk.f32.mxu1 %vm1408_vm2, %v4870_v19 }
 0x5c5   : > { %v8763_v3 = vpop.eup %8762  ;;  %v4704_v47 = vadd.f32 %v10648_v32, %v4703_v9  ;;  %7847 = vmatmul.mubr.msk.f32.gmra.mrb[236].mxu1 %vm1408_vm2, %v4871_v52  ;;  %v4873_v51 = vadd.f32 %v8761_v33, %v10380_v43  ;;  %v11178_v52 = vld [vmem:[#allocation13_spill] sm:$0xff] }
 0x5c6   : > { %8772 = vtanh.f32 %v4709_v15  ;;  %v4872_v16 = vadd.f32 %v8763_v3, %v10377_v39  ;;  %v11179_v15 = vld [vmem:[#allocation12_spill] sm:$0xff] }
 0x5c7   : > { %8774 = vtanh.f32 %v4704_v47  ;;  %v7743_v14 = vpop.f32.mrb[246].mxu0 }
 0x5c8   : > { %v8765_v35 = vpop.eup %8764  ;;  %v4719_v27 = vadd.f32 %v7743_v14, %v10648_v32  ;;  %v4713_v20 = vpop.f32.mrb[247].mxu0  ;;  %7849 = vmatprep.mubr.msk.f32.mxu1 %vm1408_vm2, %v4872_v16  ;;  %v11180_v16 = vld [vmem:[#allocation15_spill] sm:$0xff] }
 0x5c9   : > { %v8767_v13 = vpop.eup %8766  ;;  %v4714_v18 = vadd.f32 %v10648_v32, %v4713_v20  ;;  %7850 = vmatmul.mubr.msk.f32.gmra.mrb[238].mxu1 %vm1408_vm2, %v4873_v51  ;;  %v4875_v44 = vadd.f32 %v8765_v35, %v10392_v56  ;;  %v11181_v51 = vld [vmem:[#allocation14_spill] sm:$0xff] }
 0x5ca   : > { %8776 = vtanh.f32 %v4719_v27  ;;  %v4874_v26 = vadd.f32 %v8767_v13, %v10389_v0  ;;  %v8796_v27 = vld [vmem:[%s8942_s19 + $0x8] sm:$0xff]  ;;  %v8797_v13 = vld [vmem:[%s8942_s19] sm:$0xff] }
 0x5cb   : > { %8778 = vtanh.f32 %v4714_v18  ;;  %v7746_v39 = vpop.f32.mrb[248].mxu0  ;;  %v5480_v20 = vsub.f32 3.1415927, %v8796_v27  ;;  %v5479_v18 = vsub.f32 3.1415927, %v8797_v13 }
 0x5cc   : > { %v8769_v25 = vpop.eup %8768  ;;  %v4729_v43 = vadd.f32 %v7746_v39, %v10648_v32  ;;  %v4723_v1 = vpop.f32.mrb[249].mxu0  ;;  %7852 = vmatprep.mubr.msk.f32.mxu1 %vm1408_vm2, %v4874_v26  ;;  %v8798_v39 = vld [vmem:[%s8942_s19 + $0x18] sm:$0xff] }
 0x5cd   : > { %v8771_v48 = vpop.eup %8770  ;;  %v4724_v23 = vadd.f32 %v10648_v32, %v4723_v1  ;;  %7853 = vmatmul.mubr.msk.f32.gmra.mrb[240].mxu1 %vm1408_vm2, %v4875_v44  ;;  %v4877_v49 = vadd.f32 %v8769_v25, %v11169_v11  ;;  %v5544_v26 = vmul.f32 %v8796_v27, %v5480_v20  ;;  %v5482_v44 = vsub.f32 3.1415927, %v8798_v39  ;;  %v8810_v27 = vld [vmem:[%s8942_s19 + $0x78] sm:$0xff] }
 0x5ce   : > { %8780 = vtanh.f32 %v4729_v43  ;;  %v4876_v29 = vadd.f32 %v8771_v48, %v11168_v31  ;;  %v5543_v25 = vmul.f32 %v8797_v13, %v5479_v18  ;;  %v8799_v43 = vld [vmem:[%s8942_s19 + $0x10] sm:$0xff]  ;;  %v5494_v20 = vsub.f32 3.1415927, %v8810_v27 }
 0x5cf   : > { %8782 = vtanh.f32 %v4724_v23  ;;  %v7749_v0 = vpop.f32.mrb[250].mxu0  ;;  %v5481_v1 = vsub.f32 3.1415927, %v8799_v43 }
 0x5d0   : > { %v8773_v55 = vpop.eup %8772  ;;  %v4739_v56 = vadd.f32 %v7749_v0, %v10648_v32  ;;  %v4733_v54 = vpop.f32.mrb[251].mxu0  ;;  %7855 = vmatprep.mubr.msk.f32.mxu1 %vm1408_vm2, %v4876_v29  ;;  %v5546_v29 = vmul.f32 %v8798_v39, %v5482_v44  ;;  %v8800_v0 = vld [vmem:[%s8942_s19 + $0x28] sm:$0xff] }
 0x5d1   : > { %v8775_v60 = vpop.eup %8774  ;;  %v4734_v38 = vadd.f32 %v10648_v32, %v4733_v54  ;;  %7856 = vmatmul.mubr.msk.f32.gmra.mrb[242].mxu1 %vm1408_vm2, %v4877_v49  ;;  %v4879_v12 = vadd.f32 %v8773_v55, %v11171_v30  ;;  %v5484_v11 = vsub.f32 3.1415927, %v8800_v0  ;;  %v5545_v55 = vmul.f32 %v8799_v43, %v5481_v1 }
 0x5d2   : > { %8784 = vtanh.f32 %v4739_v56  ;;  %v4878_v40 = vadd.f32 %v8775_v60, %v11170_v6  ;;  %v8801_v56 = vld [vmem:[%s8942_s19 + $0x20] sm:$0xff]  ;;  %v5558_v1 = vmul.f32 %v8810_v27, %v5494_v20  ;;  %v8823_v27 = vld [vmem:[%s8942_s19 + $0xd0] sm:$0xff] }
 0x5d3   : > { %8786 = vtanh.f32 %v4734_v38  ;;  %v7752_v42 = vpop.f32.mrb[252].mxu0  ;;  %v5483_v54 = vsub.f32 3.1415927, %v8801_v56  ;;  %v5505_v20 = vsub.f32 3.1415927, %v8823_v27 }
 0x5d4   : > { %v8777_v58 = vpop.eup %8776  ;;  %v4749_v10 = vadd.f32 %v7752_v42, %v10648_v32  ;;  %v4743_v4 = vpop.f32.mrb[253].mxu0  ;;  %7858 = vmatprep.mubr.msk.f32.mxu1 %vm1408_vm2, %v4878_v40  ;;  %v5548_v40 = vmul.f32 %v8800_v0, %v5484_v11  ;;  %v8802_v42 = vld [vmem:[%s8942_s19 + $0x38] sm:$0xff]  ;;  %v8813_v0 = vld [vmem:[%s8942_s19 + $0x80] sm:$0xff] }
 0x5d5   : > { %v8779_v63 = vpop.eup %8778  ;;  %v4744_v50 = vadd.f32 %v10648_v32, %v4743_v4  ;;  %7859 = vmatmul.mubr.msk.f32.gmra.mrb[244].mxu1 %vm1408_vm2, %v4879_v12  ;;  %v4881_v24 = vadd.f32 %v8777_v58, %v11173_v41  ;;  %v5486_v30 = vsub.f32 3.1415927, %v8802_v42  ;;  %v5547_v58 = vmul.f32 %v8801_v56, %v5483_v54 }
 0x5d6   : > { %8788 = vtanh.f32 %v4749_v10  ;;  %v4880_v53 = vadd.f32 %v8779_v63, %v11172_v34  ;;  %v8803_v10 = vld [vmem:[%s8942_s19 + $0x30] sm:$0xff]  ;;  %v5495_v11 = vsub.f32 3.1415927, %v8813_v0 }
 0x5d7   : > { %8790 = vtanh.f32 %v4744_v50  ;;  %v7755_v46 = vpop.f32.mrb[254].mxu0  ;;  %v5485_v4 = vsub.f32 3.1415927, %v8803_v10 }
 0x5d8   : > { %v8781_v57 = vpop.eup %8780  ;;  %v4759_v17 = vadd.f32 %v7755_v46, %v10648_v32  ;;  %v4753_v59 = vpop.f32.mrb[255].mxu0  ;;  %7861 = vmatprep.mubr.msk.f32.mxu1 %vm1408_vm2, %v4880_v53  ;;  %v5550_v53 = vmul.f32 %v8802_v42, %v5486_v30  ;;  %v8804_v46 = vld [vmem:[%s8942_s19 + $0x48] sm:$0xff]  ;;  %v8815_v42 = vld [vmem:[%s8942_s19 + $0x90] sm:$0xff] }
 0x5d9   : > { %v8783_v21 = vpop.eup %8782  ;;  %v4754_v8 = vadd.f32 %v10648_v32, %v4753_v59  ;;  %7862 = vmatmul.mubr.msk.f32.gmra.mrb[246].mxu1 %vm1408_vm2, %v4881_v24  ;;  %v4883_v62 = vadd.f32 %v8781_v57, %v11175_v45  ;;  %v5488_v41 = vsub.f32 3.1415927, %v8804_v46  ;;  %v5549_v57 = vmul.f32 %v8803_v10, %v5485_v4  ;;  %v8806_v45 = vld [vmem:[%s8942_s19 + $0x58] sm:$0xff] }
 0x5da   : > { %8792 = vtanh.f32 %v4759_v17  ;;  %v4882_v7 = vadd.f32 %v8783_v21, %v11174_v28  ;;  %v8805_v17 = vld [vmem:[%s8942_s19 + $0x40] sm:$0xff]  ;;  %v5497_v30 = vsub.f32 3.1415927, %v8815_v42 }
 0x5db   : > { %8794 = vtanh.f32 %v4754_v8  ;;  %v5487_v59 = vsub.f32 3.1415927, %v8805_v17 }
 0x5dc   : > { %v8785_v36 = vpop.eup %8784  ;;  %7864 = vmatprep.mubr.msk.f32.mxu1 %vm1408_vm2, %v4882_v7  ;;  %v5552_v7 = vmul.f32 %v8804_v46, %v5488_v41  ;;  %v8817_v46 = vld [vmem:[%s8942_s19 + $0xa0] sm:$0xff] }
 0x5dd   : > { %v8787_v5 = vpop.eup %8786  ;;  %7865 = vmatmul.mubr.msk.f32.gmra.mrb[248].mxu1 %vm1408_vm2, %v4883_v62  ;;  %v4885_v19 = vadd.f32 %v8785_v36, %v11177_v2  ;;  %v5490_v62 = vsub.f32 3.1415927, %v8806_v45  ;;  %v5499_v41 = vsub.f32 3.1415927, %v8817_v46 }
 0x5de   : > { %v4884_v22 = vadd.f32 %v8787_v5, %v11176_v37  ;;  %v5551_v5 = vmul.f32 %v8805_v17, %v5487_v59  ;;  %v8807_v37 = vld [vmem:[%s8942_s19 + $0x50] sm:$0xff] }
 0x5e0   : > { %v8789_v32 = vpop.eup %8788  ;;  %7867 = vmatprep.mubr.msk.f32.mxu1 %vm1408_vm2, %v4884_v22  ;;  %v5489_v22 = vsub.f32 3.1415927, %v8807_v37 }
 0x5e1   : > { %v8791_v61 = vpop.eup %8790  ;;  %7868 = vmatmul.mubr.msk.f32.gmra.mrb[250].mxu1 %vm1408_vm2, %v4885_v19  ;;  %v4887_v9 = vadd.f32 %v8789_v32, %v11179_v15 }
 0x5e2   : > { %v4886_v33 = vadd.f32 %v8791_v61, %v11178_v52  ;;  %v5554_v61 = vmul.f32 %v8806_v45, %v5490_v62  ;;  %v8808_v52 = vld [vmem:[%s8942_s19 + $0x68] sm:$0xff]  ;;  %v8819_v45 = vld [vmem:[%s8942_s19 + $0xb0] sm:$0xff] }
 0x5e3   : > { %v5501_v62 = vsub.f32 3.1415927, %v8819_v45 }
 0x5e4   : > { %v8793_v3 = vpop.eup %8792  ;;  %7870 = vmatprep.mubr.msk.f32.mxu1 %vm1408_vm2, %v4886_v33  ;;  %v5492_v33 = vsub.f32 3.1415927, %v8808_v52 }
 0x5e5   : > { %v8795_v47 = vpop.eup %8794  ;;  %7871 = vmatmul.mubr.msk.f32.gmra.mrb[252].mxu1 %vm1408_vm2, %v4887_v9  ;;  %v4889_v35 = vadd.f32 %v8793_v3, %v11181_v51  ;;  %v5553_v9 = vmul.f32 %v8807_v37, %v5489_v22  ;;  %v8809_v3 = vld [vmem:[%s8942_s19 + $0x60] sm:$0xff] }
 0x5e6   : > { %v4888_v14 = vadd.f32 %v8795_v47, %v11180_v16  ;;  %v5491_v47 = vsub.f32 3.1415927, %v8809_v3 }
 0x5e8   : > { %7873 = vmatprep.mubr.msk.f32.mxu1 %vm1408_vm2, %v4888_v14  ;;  %v5555_v18 = vmul.f32 %v8809_v3, %v5491_v47 }
 0x5e9   : > { %7874 = vmatmul.mubr.msk.f32.gmra.mrb[254].mxu1 %vm1408_vm2, %v4889_v35  ;;  %v5556_v35 = vmul.f32 %v8808_v52, %v5492_v33  ;;  %v8821_v52 = vld [vmem:[%s8942_s19 + $0xc0] sm:$0xff] }
 0x5ea   : > { %v5503_v33 = vsub.f32 3.1415927, %v8821_v52 }
 0x640   : > { %v7782_v48 = vpop.f32.mrb[192].mxu1 }
 0x641   : > { %v5608_v23 = vmul.f32 %v7782_v48, %v5544_v26  ;;  %v5160_v31 = vpop.f32.mrb[193].mxu1  ;;  %v8811_v26 = vld [vmem:[%s8942_s19 + $0x70] sm:$0xff]  ;;  %v8812_v48 = vld [vmem:[%s8942_s19 + $0x88] sm:$0xff] }
 0x642   : > { %v5607_v49 = vmul.f32 %v5543_v25, %v5160_v31  ;;  %v5493_v39 = vsub.f32 3.1415927, %v8811_v26 }
 0x643   : > { %5672 = vst.msk [vmem:[%s10851_s17 + $0x8] sm:$0xff] %vm347_vm1, %v5608_v23  ;;  %v5496_v23 = vsub.f32 3.1415927, %v8812_v48 }
 0x644   : > { %5671 = vst.msk [vmem:[%s10851_s17] sm:$0xff] %vm347_vm1, %v5607_v49  ;;  %v7785_v60 = vpop.f32.mrb[194].mxu1 }
 0x645   : > { %v5610_v38 = vmul.f32 %v7785_v60, %v5546_v29  ;;  %v5170_v6 = vpop.f32.mrb[195].mxu1  ;;  %v5557_v29 = vmul.f32 %v8811_v26, %v5493_v39  ;;  %v5560_v54 = vmul.f32 %v8812_v48, %v5496_v23  ;;  %v8814_v60 = vld [vmem:[%s8942_s19 + $0x98] sm:$0xff]  ;;  %v8825_v48 = vld [vmem:[%s8942_s19 + $0xe0] sm:$0xff] }
 0x646   : > { %v5609_v12 = vmul.f32 %v5545_v55, %v5170_v6  ;;  %v5507_v23 = vsub.f32 3.1415927, %v8825_v48 }
 0x647   : > { %5674 = vst.msk [vmem:[%s10851_s17 + $0x18] sm:$0xff] %vm347_vm1, %v5610_v38  ;;  %v5498_v38 = vsub.f32 3.1415927, %v8814_v60 }
 0x648   : > { %5673 = vst.msk [vmem:[%s10851_s17 + $0x10] sm:$0xff] %vm347_vm1, %v5609_v12  ;;  %v7788_v63 = vpop.f32.mrb[196].mxu1 }
 0x649   : > { %v5612_v50 = vmul.f32 %v7788_v63, %v5548_v40  ;;  %v5180_v34 = vpop.f32.mrb[197].mxu1  ;;  %v5559_v40 = vmul.f32 %v8813_v0, %v5495_v11  ;;  %v5562_v4 = vmul.f32 %v8814_v60, %v5498_v38  ;;  %v8816_v63 = vld [vmem:[%s8942_s19 + $0xa8] sm:$0xff]  ;;  %v8827_v60 = vld [vmem:[%s8942_s19 + $0xf0] sm:$0xff] }
 0x64a   : > { %v5611_v24 = vmul.f32 %v5547_v58, %v5180_v34  ;;  %v5509_v38 = vsub.f32 3.1415927, %v8827_v60 }
 0x64b   : > { %5676 = vst.msk [vmem:[%s10851_s17 + $0x28] sm:$0xff] %vm347_vm1, %v5612_v50  ;;  %v5500_v50 = vsub.f32 3.1415927, %v8816_v63 }
 0x64c   : > { %5675 = vst.msk [vmem:[%s10851_s17 + $0x20] sm:$0xff] %vm347_vm1, %v5611_v24  ;;  %v7791_v21 = vpop.f32.mrb[198].mxu1 }
 0x64d   : > { %v5614_v8 = vmul.f32 %v7791_v21, %v5550_v53  ;;  %v5190_v28 = vpop.f32.mrb[199].mxu1  ;;  %v5561_v53 = vmul.f32 %v8815_v42, %v5497_v30  ;;  %v5564_v59 = vmul.f32 %v8816_v63, %v5500_v50  ;;  %v8818_v21 = vld [vmem:[%s8942_s19 + $0xb8] sm:$0xff]  ;;  %v8829_v63 = vld [vmem:[%s8942_s19 + $0x100] sm:$0xff] }
 0x64e   : > { %v5613_v36 = vmul.f32 %v5549_v57, %v5190_v28  ;;  %v5511_v50 = vsub.f32 3.1415927, %v8829_v63 }
 0x64f   : > { %5678 = vst.msk [vmem:[%s10851_s17 + $0x38] sm:$0xff] %vm347_vm1, %v5614_v8  ;;  %v5502_v8 = vsub.f32 3.1415927, %v8818_v21 }
 0x650   : > { %5677 = vst.msk [vmem:[%s10851_s17 + $0x30] sm:$0xff] %vm347_vm1, %v5613_v36  ;;  %v7794_v2 = vpop.f32.mrb[200].mxu1 }
 0x651   : > { %v5616_v19 = vmul.f32 %v7794_v2, %v5552_v7  ;;  %v5200_v32 = vpop.f32.mrb[201].mxu1  ;;  %v5563_v7 = vmul.f32 %v8817_v46, %v5499_v41  ;;  %v5566_v22 = vmul.f32 %v8818_v21, %v5502_v8  ;;  %v8820_v2 = vld [vmem:[%s8942_s19 + $0xc8] sm:$0xff]  ;;  %v8831_v21 = vld [vmem:[%s8942_s19 + $0x110] sm:$0xff] }
 0x652   : > { %v5615_v15 = vmul.f32 %v5551_v5, %v5200_v32  ;;  %v5513_v8 = vsub.f32 3.1415927, %v8831_v21 }
 0x653   : > { %5680 = vst.msk [vmem:[%s10851_s17 + $0x48] sm:$0xff] %vm347_vm1, %v5616_v19  ;;  %v5504_v19 = vsub.f32 3.1415927, %v8820_v2 }
 0x654   : > { %5679 = vst.msk [vmem:[%s10851_s17 + $0x40] sm:$0xff] %vm347_vm1, %v5615_v15  ;;  %v7797_v16 = vpop.f32.mrb[202].mxu1 }
 0x655   : > { %v5618_v14 = vmul.f32 %v7797_v16, %v5554_v61  ;;  %v5210_v51 = vpop.f32.mrb[203].mxu1  ;;  %v5565_v61 = vmul.f32 %v8819_v45, %v5501_v62  ;;  %v5568_v47 = vmul.f32 %v8820_v2, %v5504_v19  ;;  %v8822_v16 = vld [vmem:[%s8942_s19 + $0xd8] sm:$0xff]  ;;  %v8833_v2 = vld [vmem:[%s8942_s19 + $0x120] sm:$0xff] }
 0x656   : > { %v5617_v13 = vmul.f32 %v5553_v9, %v5210_v51  ;;  %v5515_v19 = vsub.f32 3.1415927, %v8833_v2 }
 0x657   : > { %5682 = vst.msk [vmem:[%s10851_s17 + $0x58] sm:$0xff] %vm347_vm1, %v5618_v14  ;;  %v5506_v14 = vsub.f32 3.1415927, %v8822_v16 }
 0x658   : > { %5681 = vst.msk [vmem:[%s10851_s17 + $0x50] sm:$0xff] %vm347_vm1, %v5617_v13  ;;  %v7800_v44 = vpop.f32.mrb[204].mxu1 }
 0x659   : > { %v5620_v25 = vmul.f32 %v7800_v44, %v5556_v35  ;;  %v5220_v43 = vpop.f32.mrb[205].mxu1  ;;  %v5567_v35 = vmul.f32 %v8821_v52, %v5503_v33  ;;  %v5570_v39 = vmul.f32 %v8822_v16, %v5506_v14  ;;  %v8824_v44 = vld [vmem:[%s8942_s19 + $0xe8] sm:$0xff]  ;;  %v8835_v16 = vld [vmem:[%s8942_s19 + $0x130] sm:$0xff] }
 0x65a   : > { %v5619_v31 = vmul.f32 %v5555_v18, %v5220_v43  ;;  %v5517_v14 = vsub.f32 3.1415927, %v8835_v16 }
 0x65b   : > { %5684 = vst.msk [vmem:[%s10851_s17 + $0x68] sm:$0xff] %vm347_vm1, %v5620_v25  ;;  %v5508_v25 = vsub.f32 3.1415927, %v8824_v44 }
 0x65c   : > { %5683 = vst.msk [vmem:[%s10851_s17 + $0x60] sm:$0xff] %vm347_vm1, %v5619_v31  ;;  %v7803_v49 = vpop.f32.mrb[206].mxu1 }
 0x65d   : > { %v5622_v55 = vmul.f32 %v7803_v49, %v5558_v1  ;;  %v5230_v56 = vpop.f32.mrb[207].mxu1  ;;  %v5569_v1 = vmul.f32 %v8823_v27, %v5505_v20  ;;  %v5572_v11 = vmul.f32 %v8824_v44, %v5508_v25  ;;  %v8826_v49 = vld [vmem:[%s8942_s19 + $0xf8] sm:$0xff]  ;;  %v8837_v44 = vld [vmem:[%s8942_s19 + $0x140] sm:$0xff] }
 0x65e   : > { %v5621_v6 = vmul.f32 %v5557_v29, %v5230_v56  ;;  %v5519_v25 = vsub.f32 3.1415927, %v8837_v44 }
 0x65f   : > { %5686 = vst.msk [vmem:[%s10851_s17 + $0x78] sm:$0xff] %vm347_vm1, %v5622_v55  ;;  %v5510_v55 = vsub.f32 3.1415927, %v8826_v49 }
 0x660   : > { %5685 = vst.msk [vmem:[%s10851_s17 + $0x70] sm:$0xff] %vm347_vm1, %v5621_v6  ;;  %v7806_v12 = vpop.f32.mrb[208].mxu1 }
 0x661   : > { %v5624_v58 = vmul.f32 %v7806_v12, %v5560_v54  ;;  %v5240_v10 = vpop.f32.mrb[209].mxu1  ;;  %v5571_v54 = vmul.f32 %v8825_v48, %v5507_v23  ;;  %v5574_v30 = vmul.f32 %v8826_v49, %v5510_v55  ;;  %v8828_v12 = vld [vmem:[%s8942_s19 + $0x108] sm:$0xff]  ;;  %v8839_v49 = vld [vmem:[%s8942_s19 + $0x150] sm:$0xff] }
 0x662   : > { %v5623_v34 = vmul.f32 %v5559_v40, %v5240_v10  ;;  %v5521_v55 = vsub.f32 3.1415927, %v8839_v49 }
 0x663   : > { %5688 = vst.msk [vmem:[%s10851_s17 + $0x88] sm:$0xff] %vm347_vm1, %v5624_v58  ;;  %v5512_v58 = vsub.f32 3.1415927, %v8828_v12 }
 0x664   : > { %5687 = vst.msk [vmem:[%s10851_s17 + $0x80] sm:$0xff] %vm347_vm1, %v5623_v34  ;;  %v7809_v24 = vpop.f32.mrb[210].mxu1 }
 0x665   : > { %v5626_v57 = vmul.f32 %v7809_v24, %v5562_v4  ;;  %v5250_v17 = vpop.f32.mrb[211].mxu1  ;;  %v5573_v4 = vmul.f32 %v8827_v60, %v5509_v38  ;;  %v5576_v41 = vmul.f32 %v8828_v12, %v5512_v58  ;;  %v8830_v24 = vld [vmem:[%s8942_s19 + $0x118] sm:$0xff]  ;;  %v8841_v12 = vld [vmem:[%s8942_s19 + $0x160] sm:$0xff] }
 0x666   : > { %v5625_v28 = vmul.f32 %v5561_v53, %v5250_v17  ;;  %v5523_v58 = vsub.f32 3.1415927, %v8841_v12 }
 0x667   : > { %5690 = vst.msk [vmem:[%s10851_s17 + $0x98] sm:$0xff] %vm347_vm1, %v5626_v57  ;;  %v5514_v57 = vsub.f32 3.1415927, %v8830_v24 }
 0x668   : > { %5689 = vst.msk [vmem:[%s10851_s17 + $0x90] sm:$0xff] %vm347_vm1, %v5625_v28  ;;  %v7812_v36 = vpop.f32.mrb[212].mxu1 }
 0x669   : > { %v5628_v5 = vmul.f32 %v7812_v36, %v5564_v59  ;;  %v5260_v37 = vpop.f32.mrb[213].mxu1  ;;  %v5575_v59 = vmul.f32 %v8829_v63, %v5511_v50  ;;  %v5578_v62 = vmul.f32 %v8830_v24, %v5514_v57  ;;  %v8832_v36 = vld [vmem:[%s8942_s19 + $0x128] sm:$0xff]  ;;  %v8843_v24 = vld [vmem:[%s8942_s19 + $0x170] sm:$0xff] }
 0x66a   : > { %v5627_v32 = vmul.f32 %v5563_v7, %v5260_v37  ;;  %v5525_v57 = vsub.f32 3.1415927, %v8843_v24 }
 0x66b   : > { %5692 = vst.msk [vmem:[%s10851_s17 + $0xa8] sm:$0xff] %vm347_vm1, %v5628_v5  ;;  %v5516_v5 = vsub.f32 3.1415927, %v8832_v36 }
 0x66c   : > { %5691 = vst.msk [vmem:[%s10851_s17 + $0xa0] sm:$0xff] %vm347_vm1, %v5627_v32  ;;  %v7815_v15 = vpop.f32.mrb[214].mxu1 }
 0x66d   : > { %v5630_v9 = vmul.f32 %v7815_v15, %v5566_v22  ;;  %v5270_v3 = vpop.f32.mrb[215].mxu1  ;;  %v5577_v22 = vmul.f32 %v8831_v21, %v5513_v8  ;;  %v5580_v33 = vmul.f32 %v8832_v36, %v5516_v5  ;;  %v8834_v15 = vld [vmem:[%s8942_s19 + $0x138] sm:$0xff]  ;;  %v8845_v36 = vld [vmem:[%s8942_s19 + $0x180] sm:$0xff] }
 0x66e   : > { %v5629_v51 = vmul.f32 %v5565_v61, %v5270_v3  ;;  %v5527_v5 = vsub.f32 3.1415927, %v8845_v36 }
 0x66f   : > { %5694 = vst.msk [vmem:[%s10851_s17 + $0xb8] sm:$0xff] %vm347_vm1, %v5630_v9  ;;  %v5518_v9 = vsub.f32 3.1415927, %v8834_v15 }
 0x670   : > { %5693 = vst.msk [vmem:[%s10851_s17 + $0xb0] sm:$0xff] %vm347_vm1, %v5629_v51  ;;  %v7818_v13 = vpop.f32.mrb[216].mxu1 }
 0x671   : > { %v5632_v18 = vmul.f32 %v7818_v13, %v5568_v47  ;;  %v5280_v26 = vpop.f32.mrb[217].mxu1  ;;  %v5579_v47 = vmul.f32 %v8833_v2, %v5515_v19  ;;  %v5582_v20 = vmul.f32 %v8834_v15, %v5518_v9  ;;  %v8836_v13 = vld [vmem:[%s8942_s19 + $0x148] sm:$0xff]  ;;  %v8847_v15 = vld [vmem:[%s8942_s19 + $0x190] sm:$0xff] }
 0x672   : > { %v5631_v43 = vmul.f32 %v5567_v35, %v5280_v26  ;;  %v5529_v9 = vsub.f32 3.1415927, %v8847_v15 }
 0x673   : > { %5696 = vst.msk [vmem:[%s10851_s17 + $0xc8] sm:$0xff] %vm347_vm1, %v5632_v18  ;;  %v5520_v18 = vsub.f32 3.1415927, %v8836_v13 }
 0x674   : > { %5695 = vst.msk [vmem:[%s10851_s17 + $0xc0] sm:$0xff] %vm347_vm1, %v5631_v43  ;;  %v7821_v31 = vpop.f32.mrb[218].mxu1 }
 0x675   : > { %v5634_v29 = vmul.f32 %v7821_v31, %v5570_v39  ;;  %v5290_v0 = vpop.f32.mrb[219].mxu1  ;;  %v5581_v39 = vmul.f32 %v8835_v16, %v5517_v14  ;;  %v5584_v23 = vmul.f32 %v8836_v13, %v5520_v18  ;;  %v8838_v31 = vld [vmem:[%s8942_s19 + $0x158] sm:$0xff]  ;;  %v8849_v13 = vld [vmem:[%s8942_s19 + $0x1a0] sm:$0xff] }
 0x676   : > { %v5633_v56 = vmul.f32 %v5569_v1, %v5290_v0  ;;  %v5531_v18 = vsub.f32 3.1415927, %v8849_v13 }
 0x677   : > { %5698 = vst.msk [vmem:[%s10851_s17 + $0xd8] sm:$0xff] %vm347_vm1, %v5634_v29  ;;  %v5522_v29 = vsub.f32 3.1415927, %v8838_v31 }
 0x678   : > { %5697 = vst.msk [vmem:[%s10851_s17 + $0xd0] sm:$0xff] %vm347_vm1, %v5633_v56  ;;  %v7824_v6 = vpop.f32.mrb[220].mxu1 }
 0x679   : > { %v5636_v40 = vmul.f32 %v7824_v6, %v5572_v11  ;;  %v5300_v42 = vpop.f32.mrb[221].mxu1  ;;  %v5583_v11 = vmul.f32 %v8837_v44, %v5519_v25  ;;  %v5586_v38 = vmul.f32 %v8838_v31, %v5522_v29  ;;  %v8840_v6 = vld [vmem:[%s8942_s19 + $0x168] sm:$0xff]  ;;  %v8851_v31 = vld [vmem:[%s8942_s19 + $0x1b0] sm:$0xff] }
 0x67a   : > { %v5635_v10 = vmul.f32 %v5571_v54, %v5300_v42  ;;  %v5533_v29 = vsub.f32 3.1415927, %v8851_v31 }
 0x67b   : > { %5700 = vst.msk [vmem:[%s10851_s17 + $0xe8] sm:$0xff] %vm347_vm1, %v5636_v40  ;;  %v5524_v40 = vsub.f32 3.1415927, %v8840_v6 }
 0x67c   : > { %5699 = vst.msk [vmem:[%s10851_s17 + $0xe0] sm:$0xff] %vm347_vm1, %v5635_v10  ;;  %v7827_v34 = vpop.f32.mrb[222].mxu1 }
 0x67d   : > { %v5638_v53 = vmul.f32 %v7827_v34, %v5574_v30  ;;  %v5310_v46 = vpop.f32.mrb[223].mxu1  ;;  %v5585_v30 = vmul.f32 %v8839_v49, %v5521_v55  ;;  %v5588_v50 = vmul.f32 %v8840_v6, %v5524_v40  ;;  %v8842_v34 = vld [vmem:[%s8942_s19 + $0x178] sm:$0xff]  ;;  %v8853_v6 = vld [vmem:[%s8942_s19 + $0x1c0] sm:$0xff] }
 0x67e   : > { %v5637_v17 = vmul.f32 %v5573_v4, %v5310_v46  ;;  %v5535_v40 = vsub.f32 3.1415927, %v8853_v6 }
 0x67f   : > { %5702 = vst.msk [vmem:[%s10851_s17 + $0xf8] sm:$0xff] %vm347_vm1, %v5638_v53  ;;  %v5526_v53 = vsub.f32 3.1415927, %v8842_v34 }
 0x680   : > { %5701 = vst.msk [vmem:[%s10851_s17 + $0xf0] sm:$0xff] %vm347_vm1, %v5637_v17  ;;  %v7830_v28 = vpop.f32.mrb[224].mxu1 }
 0x681   : > { %v5640_v7 = vmul.f32 %v7830_v28, %v5576_v41  ;;  %v5320_v45 = vpop.f32.mrb[225].mxu1  ;;  %v5587_v41 = vmul.f32 %v8841_v12, %v5523_v58  ;;  %v5590_v8 = vmul.f32 %v8842_v34, %v5526_v53  ;;  %v8844_v28 = vld [vmem:[%s8942_s19 + $0x188] sm:$0xff]  ;;  %v8855_v34 = vld [vmem:[%s8942_s19 + $0x1d0] sm:$0xff] }
 0x682   : > { %v5639_v37 = vmul.f32 %v5575_v59, %v5320_v45  ;;  %v5537_v53 = vsub.f32 3.1415927, %v8855_v34 }
 0x683   : > { %5704 = vst.msk [vmem:[%s10851_s17 + $0x108] sm:$0xff] %vm347_vm1, %v5640_v7  ;;  %v5528_v7 = vsub.f32 3.1415927, %v8844_v28 }
 0x684   : > { %5703 = vst.msk [vmem:[%s10851_s17 + $0x100] sm:$0xff] %vm347_vm1, %v5639_v37  ;;  %v7833_v32 = vpop.f32.mrb[226].mxu1 }
 0x685   : > { %v5642_v61 = vmul.f32 %v7833_v32, %v5578_v62  ;;  %v5330_v52 = vpop.f32.mrb[227].mxu1  ;;  %v5589_v62 = vmul.f32 %v8843_v24, %v5525_v57  ;;  %v5592_v19 = vmul.f32 %v8844_v28, %v5528_v7  ;;  %v8846_v32 = vld [vmem:[%s8942_s19 + $0x198] sm:$0xff]  ;;  %v8857_v28 = vld [vmem:[%s8942_s19 + $0x1e0] sm:$0xff] }
 0x686   : > { %v5641_v3 = vmul.f32 %v5577_v22, %v5330_v52  ;;  %v5539_v7 = vsub.f32 3.1415927, %v8857_v28 }
 0x687   : > { %5706 = vst.msk [vmem:[%s10851_s17 + $0x118] sm:$0xff] %vm347_vm1, %v5642_v61  ;;  %v5530_v61 = vsub.f32 3.1415927, %v8846_v32 }
 0x688   : > { %5705 = vst.msk [vmem:[%s10851_s17 + $0x110] sm:$0xff] %vm347_vm1, %v5641_v3  ;;  %v7836_v51 = vpop.f32.mrb[228].mxu1 }
 0x689   : > { %v5644_v35 = vmul.f32 %v7836_v51, %v5580_v33  ;;  %v5340_v27 = vpop.f32.mrb[229].mxu1  ;;  %v5591_v33 = vmul.f32 %v8845_v36, %v5527_v5  ;;  %v5594_v14 = vmul.f32 %v8846_v32, %v5530_v61  ;;  %v8848_v51 = vld [vmem:[%s8942_s19 + $0x1a8] sm:$0xff]  ;;  %v8859_v32 = vld [vmem:[%s8942_s19 + $0x1f0] sm:$0xff] }
 0x68a   : > { %v5643_v26 = vmul.f32 %v5579_v47, %v5340_v27  ;;  %v5541_v61 = vsub.f32 3.1415927, %v8859_v32 }
 0x68b   : > { %5708 = vst.msk [vmem:[%s10851_s17 + $0x128] sm:$0xff] %vm347_vm1, %v5644_v35  ;;  %v5532_v35 = vsub.f32 3.1415927, %v8848_v51 }
 0x68c   : > { %5707 = vst.msk [vmem:[%s10851_s17 + $0x120] sm:$0xff] %vm347_vm1, %v5643_v26  ;;  %v7839_v43 = vpop.f32.mrb[230].mxu1 }
 0x68d   : > { %v5646_v1 = vmul.f32 %v7839_v43, %v5582_v20  ;;  %v5350_v48 = vpop.f32.mrb[231].mxu1  ;;  %v5593_v20 = vmul.f32 %v8847_v15, %v5529_v9  ;;  %v5596_v25 = vmul.f32 %v8848_v51, %v5532_v35  ;;  %v8850_v43 = vld [vmem:[%s8942_s19 + $0x1b8] sm:$0xff] }
 0x68e   : > { %v5645_v0 = vmul.f32 %v5581_v39, %v5350_v48 }
 0x68f   : > { %5710 = vst.msk [vmem:[%s10851_s17 + $0x138] sm:$0xff] %vm347_vm1, %v5646_v1  ;;  %v5534_v1 = vsub.f32 3.1415927, %v8850_v43 }
 0x690   : > { %5709 = vst.msk [vmem:[%s10851_s17 + $0x130] sm:$0xff] %vm347_vm1, %v5645_v0  ;;  %v7842_v56 = vpop.f32.mrb[232].mxu1 }
 0x691   : > { %v5648_v54 = vmul.f32 %v7842_v56, %v5584_v23  ;;  %v5360_v60 = vpop.f32.mrb[233].mxu1  ;;  %v5595_v23 = vmul.f32 %v8849_v13, %v5531_v18  ;;  %v5598_v55 = vmul.f32 %v8850_v43, %v5534_v1  ;;  %v8852_v56 = vld [vmem:[%s8942_s19 + $0x1c8] sm:$0xff] }
 0x692   : > { %v5647_v42 = vmul.f32 %v5583_v11, %v5360_v60 }
 0x693   : > { %5712 = vst.msk [vmem:[%s10851_s17 + $0x148] sm:$0xff] %vm347_vm1, %v5648_v54  ;;  %v5536_v54 = vsub.f32 3.1415927, %v8852_v56 }
 0x694   : > { %5711 = vst.msk [vmem:[%s10851_s17 + $0x140] sm:$0xff] %vm347_vm1, %v5647_v42  ;;  %v7845_v10 = vpop.f32.mrb[234].mxu1 }
 0x695   : > { %v5650_v4 = vmul.f32 %v7845_v10, %v5586_v38  ;;  %v5370_v63 = vpop.f32.mrb[235].mxu1  ;;  %v5597_v38 = vmul.f32 %v8851_v31, %v5533_v29  ;;  %v5600_v58 = vmul.f32 %v8852_v56, %v5536_v54  ;;  %v8854_v10 = vld [vmem:[%s8942_s19 + $0x1d8] sm:$0xff] }
 0x696   : > { %v5649_v46 = vmul.f32 %v5585_v30, %v5370_v63 }
 0x697   : > { %5714 = vst.msk [vmem:[%s10851_s17 + $0x158] sm:$0xff] %vm347_vm1, %v5650_v4  ;;  %v5538_v4 = vsub.f32 3.1415927, %v8854_v10 }
 0x698   : > { %5713 = vst.msk [vmem:[%s10851_s17 + $0x150] sm:$0xff] %vm347_vm1, %v5649_v46  ;;  %v7848_v17 = vpop.f32.mrb[236].mxu1 }
 0x699   : > { %v5652_v59 = vmul.f32 %v7848_v17, %v5588_v50  ;;  %v5380_v21 = vpop.f32.mrb[237].mxu1  ;;  %v5599_v50 = vmul.f32 %v8853_v6, %v5535_v40  ;;  %v5602_v57 = vmul.f32 %v8854_v10, %v5538_v4  ;;  %v8856_v17 = vld [vmem:[%s8942_s19 + $0x1e8] sm:$0xff] }
 0x69a   : > { %v5651_v45 = vmul.f32 %v5587_v41, %v5380_v21 }
 0x69b   : > { %5716 = vst.msk [vmem:[%s10851_s17 + $0x168] sm:$0xff] %vm347_vm1, %v5652_v59  ;;  %v5540_v59 = vsub.f32 3.1415927, %v8856_v17 }
 0x69c   : > { %5715 = vst.msk [vmem:[%s10851_s17 + $0x160] sm:$0xff] %vm347_vm1, %v5651_v45  ;;  %v7851_v37 = vpop.f32.mrb[238].mxu1 }
 0x69d   : > { %v5654_v22 = vmul.f32 %v7851_v37, %v5590_v8  ;;  %v5390_v2 = vpop.f32.mrb[239].mxu1  ;;  %v5601_v8 = vmul.f32 %v8855_v34, %v5537_v53  ;;  %v5604_v5 = vmul.f32 %v8856_v17, %v5540_v59  ;;  %v8858_v37 = vld [vmem:[%s8942_s19 + $0x1f8] sm:$0xff] }
 0x69e   : > { %v5653_v52 = vmul.f32 %v5589_v62, %v5390_v2 }
 0x69f   : > { %5718 = vst.msk [vmem:[%s10851_s17 + $0x178] sm:$0xff] %vm347_vm1, %v5654_v22  ;;  %v5542_v22 = vsub.f32 3.1415927, %v8858_v37 }
 0x6a0   : > { %5717 = vst.msk [vmem:[%s10851_s17 + $0x170] sm:$0xff] %vm347_vm1, %v5653_v52  ;;  %v7854_v3 = vpop.f32.mrb[240].mxu1 }
 0x6a1   : > { %v5656_v47 = vmul.f32 %v7854_v3, %v5592_v19  ;;  %v5400_v16 = vpop.f32.mrb[241].mxu1  ;;  %v5603_v19 = vmul.f32 %v8857_v28, %v5539_v7  ;;  %v5606_v9 = vmul.f32 %v8858_v37, %v5542_v22 }
 0x6a2   : > { %v5655_v27 = vmul.f32 %v5591_v33, %v5400_v16 }
 0x6a3   : > { %5720 = vst.msk [vmem:[%s10851_s17 + $0x188] sm:$0xff] %vm347_vm1, %v5656_v47  ;;  %v5605_v47 = vmul.f32 %v8859_v32, %v5541_v61 }
 0x6a4   : > { %5719 = vst.msk [vmem:[%s10851_s17 + $0x180] sm:$0xff] %vm347_vm1, %v5655_v27  ;;  %v7857_v26 = vpop.f32.mrb[242].mxu1 }
 0x6a5   : > { %v5658_v39 = vmul.f32 %v7857_v26, %v5594_v14  ;;  %v5410_v44 = vpop.f32.mrb[243].mxu1 }
 0x6a6   : > { %v5657_v48 = vmul.f32 %v5593_v20, %v5410_v44 }
 0x6a7   : > { %5722 = vst.msk [vmem:[%s10851_s17 + $0x198] sm:$0xff] %vm347_vm1, %v5658_v39 }
 0x6a8   : > { %5721 = vst.msk [vmem:[%s10851_s17 + $0x190] sm:$0xff] %vm347_vm1, %v5657_v48  ;;  %v7860_v0 = vpop.f32.mrb[244].mxu1 }
 0x6a9   : > { %v5660_v11 = vmul.f32 %v7860_v0, %v5596_v25  ;;  %v5420_v49 = vpop.f32.mrb[245].mxu1 }
 0x6aa   : > { %v5659_v60 = vmul.f32 %v5595_v23, %v5420_v49 }
 0x6ab   : > { %5724 = vst.msk [vmem:[%s10851_s17 + $0x1a8] sm:$0xff] %vm347_vm1, %v5660_v11 }
 0x6ac   : > { %5723 = vst.msk [vmem:[%s10851_s17 + $0x1a0] sm:$0xff] %vm347_vm1, %v5659_v60  ;;  %v7863_v42 = vpop.f32.mrb[246].mxu1 }
 0x6ad   : > { %v5662_v30 = vmul.f32 %v7863_v42, %v5598_v55  ;;  %v5430_v12 = vpop.f32.mrb[247].mxu1 }
 0x6ae   : > { %v5661_v63 = vmul.f32 %v5597_v38, %v5430_v12 }
 0x6af   : > { %5726 = vst.msk [vmem:[%s10851_s17 + $0x1b8] sm:$0xff] %vm347_vm1, %v5662_v30 }
 0x6b0   : > { %5725 = vst.msk [vmem:[%s10851_s17 + $0x1b0] sm:$0xff] %vm347_vm1, %v5661_v63  ;;  %v7866_v46 = vpop.f32.mrb[248].mxu1 }
 0x6b1   : > { %v5664_v41 = vmul.f32 %v7866_v46, %v5600_v58  ;;  %v5440_v24 = vpop.f32.mrb[249].mxu1 }
 0x6b2   : > { %v5663_v21 = vmul.f32 %v5599_v50, %v5440_v24 }
 0x6b3   : > { %5728 = vst.msk [vmem:[%s10851_s17 + $0x1c8] sm:$0xff] %vm347_vm1, %v5664_v41 }
 0x6b4   : > { %5727 = vst.msk [vmem:[%s10851_s17 + $0x1c0] sm:$0xff] %vm347_vm1, %v5663_v21  ;;  %v7869_v45 = vpop.f32.mrb[250].mxu1 }
 0x6b5   : > { %v5666_v62 = vmul.f32 %v7869_v45, %v5602_v57  ;;  %v5450_v36 = vpop.f32.mrb[251].mxu1 }
 0x6b6   : > { %v5665_v2 = vmul.f32 %v5601_v8, %v5450_v36 }
 0x6b7   : > { %5730 = vst.msk [vmem:[%s10851_s17 + $0x1d8] sm:$0xff] %vm347_vm1, %v5666_v62 }
 0x6b8   : > { %5729 = vst.msk [vmem:[%s10851_s17 + $0x1d0] sm:$0xff] %vm347_vm1, %v5665_v2  ;;  %v7872_v52 = vpop.f32.mrb[252].mxu1 }
 0x6b9   : > { %v5668_v33 = vmul.f32 %v7872_v52, %v5604_v5  ;;  %v5460_v15 = vpop.f32.mrb[253].mxu1 }
 0x6ba   : > { %v5667_v3 = vmul.f32 %v5603_v19, %v5460_v15 }
 0x6bb   : > { %5732 = vst.msk [vmem:[%s10851_s17 + $0x1e8] sm:$0xff] %vm347_vm1, %v5668_v33 }
 0x6bc   : > { %5731 = vst.msk [vmem:[%s10851_s17 + $0x1e0] sm:$0xff] %vm347_vm1, %v5667_v3  ;;  %v7875_v16 = vpop.f32.mrb[254].mxu1 }
 0x6bd   : > { %v5670_v14 = vmul.f32 %v7875_v16, %v5606_v9  ;;  %v5470_v51 = vpop.f32.mrb[255].mxu1 }
 0x6be   : > { %v5669_v35 = vmul.f32 %v5605_v47, %v5470_v51 }
 0x6bf   : > { %5734 = vst.msk [vmem:[%s10851_s17 + $0x1f8] sm:$0xff] %vm347_vm1, %v5670_v14 }
 0x6c0   : > { %5733 = vst.msk [vmem:[%s10851_s17 + $0x1f0] sm:$0xff] %vm347_vm1, %v5669_v35 }
 0x6c1 PF: > { %s17_s24 = sadd.s32 1, %s8866_s24  }
 0x6c2   : > { %p14_p4 = scmp.ge.s32.totalorder %s17_s24, 4  }
 0x6c4   :  { %16 = sbr.rel (!%p14_p4) target bundleno = 1 (0x1), region = 86 }

</bundles_post_ra>
